<compile_context>
chip_gen: v7x
topology: tpu7x:2x2x1
jax: 0.10.0
libtpu: 0.0.40
codegen_flags: <defaults>
</compile_context>

<pallas_src>
import functools

import jax
import jax.numpy as jnp
from jax import lax
from jax.experimental import pallas as pl
from jax.experimental.pallas import tpu as pltpu

BN_EPS = 1e-5
KS = 3        # conv kernel size (module default shape=3)
POOL = 2      # pooling factor (module default)
LANE = 128

VMEM_WORKSET_BUDGET = 16 * 1024 * 1024   # accounted (lane-padded) per-step working set target
VMEM_LIMIT_BYTES = 48 * 1024 * 1024      # raised scoped-VMEM limit; safe on v5e/v6e (128 MiB)
                                         # and within v7x's 64 MiB physical VMEM


def _round_up(x, m):
    return (x + m - 1) // m * m


def _pick_tile_hp(hp, wp, cin, cout, itemsize):
    """Largest divisor of Hp whose *lane-padded* per-step working set fits the budget.

    Accounting (per review): last dim rounds to 128 lanes, second-to-last to 8 sublanes;
    the parity-plane input tile is double-buffered; the f32 output tile is double-buffered;
    the four per-slot f32 accumulators and the weight block are counted once.
    """
    def fits(thp):
        m = thp * wp
        in_tile = 4 * (thp + 1) * _round_up(wp + 1, 8) * _round_up(cin, LANE) * itemsize
        out_tile = _round_up(m, 8) * _round_up(cout, LANE) * 4
        accs = 4 * _round_up(m, 8) * _round_up(cout, LANE) * 4
        w_b = _round_up(KS * KS * cin, 8) * _round_up(cout, LANE) * itemsize
        return 2 * in_tile + 2 * out_tile + accs + w_b <= VMEM_WORKSET_BUDGET

    for d in range(hp, 0, -1):
        if hp % d == 0 and fits(d):
            return d
    return 1


# ----------------------------- shared in-kernel implicit-GEMM conv -----------------------------
def _conv_pool_slots(x_ref, w_ref, *, thp, wp, cin, cout):
    """Return the four 2x2-pool-slot conv results, each (thp*wp, cout) float32.

    x_ref: (4*(thp+1), wp+1, cin) -- the four parity planes (row-parity major, col-parity minor)
           of the zero-padded input slab for this tile, each with a one-row halo.
    w_ref: (9*cin, cout)          -- conv weights, tap-major ((kh, kw) major, cin minor).
    """
    m = thp * wp
    taps = {}  # trace-time memoization: taps with the same (row-offset, col-offset) are shared

    def tap(u, v):
        if (u, v) not in taps:
            plane = (u % 2) * 2 + (v % 2)
            r0 = plane * (thp + 1) + u // 2
            c0 = v // 2
            t = x_ref[r0:r0 + thp, c0:c0 + wp, :]          # (thp, wp, cin) static VMEM slice
            taps[(u, v)] = t.reshape(m, cin)
        return taps[(u, v)]

    slots = []
    for a in range(POOL):
        for b in range(POOL):
            acc = jnp.zeros((m, cout), jnp.float32)
            for kh in range(KS):
                for kw in range(KS):
                    k = kh * KS + kw
                    w_k = w_ref[k * cin:(k + 1) * cin, :]  # (cin, cout)
                    acc = acc + jnp.dot(tap(a + kh, b + kw), w_k,
                                        preferred_element_type=jnp.float32)
            slots.append(acc)
    return slots


# ----------------------- pass 1: implicit-GEMM conv + global BN batch statistics ---------------
def _stats_kernel(x_ref, w_ref, stat_ref, *, thp, wp, cin, cout):
    # stat_ref block index depends only on the leading ("parallel") core axis -> it is the
    # VMEM-resident accumulator for this core; no scratch buffer / final copy needed.
    @pl.when(pl.program_id(1) == 0)
    def _():
        stat_ref[...] = jnp.zeros_like(stat_ref)

    slots = _conv_pool_slots(x_ref, w_ref, thp=thp, wp=wp, cin=cin, cout=cout)
    cnt = float(POOL * POOL * thp * wp)                    # conv pixels per tile (all valid)

    s = slots[0].sum(axis=0, keepdims=True)
    for y in slots[1:]:
        s = s + y.sum(axis=0, keepdims=True)               # (1, cout)  sum(x)
    tmean = s * (1.0 / cnt)
    css = jnp.zeros_like(s)
    for y in slots:
        d = y - tmean                                      # tile-centered (stable variance)
        css = css + (d * d).sum(axis=0, keepdims=True)

    # TODO(synk): straight f32 accumulation of sum(x) across tiles; for extremely large N*H*W
    # per channel a compensated / per-tile-mean accumulation would be more robust.
    stat_ref[0:1, :] += s                                  # sum(x)
    stat_ref[1:2, :] += css                                # sum((x - tile_mean)^2)
    stat_ref[2:3, :] += cnt * tmean * tmean                # n_tile * tile_mean^2


# ------------------ pass 2: conv recompute + BN affine + ReLU + 2x2 max-pool -------------------
def _apply_kernel(x_ref, w_ref, scale_ref, shift_ref, o_ref, *, thp, wp, cin, cout):
    slots = _conv_pool_slots(x_ref, w_ref, thp=thp, wp=wp, cin=cin, cout=cout)
    scale = scale_ref[...]                                 # (1, cout)
    shift = shift_ref[...]
    y = slots[0] * scale + shift
    for s in slots[1:]:
        y = jnp.maximum(y, s * scale + shift)              # max-pool over the 4 window slots
    o_ref[0] = jnp.maximum(y, 0.0).astype(o_ref.dtype)     # ReLU (commutes with the max)


@functools.partial(jax.jit, static_argnames=("use_bf16", "tile_hp"))
def conv2d_block_forward(x_nchw, conv_w, conv_b, bn_gamma, bn_beta, *,
                         use_bf16=True, tile_hp=None):
    """Forward pass of the PyTorch Conv_2d module. x_nchw: (N, Cin, H, W) float32."""
    del conv_b  # per-channel bias before training-mode BatchNorm is cancelled by the centering
    N, Cin, H, W = x_nchw.shape
    Cout = conv_w.shape[0]
    if H % POOL or W % POOL:
        # PyTorch's MaxPool2d drops the trailing row/col, but BatchNorm2d batch stats still use
        # ALL H*W conv pixels -- this kernel does not model that remainder, so refuse loudly.
        raise ValueError("conv2d_block_forward requires even H and W")
    Hp, Wp = H // POOL, W // POOL
    mm_dtype = jnp.bfloat16 if use_bf16 else jnp.float32
    itemsize = 2 if use_bf16 else 4

    if tile_hp is None:
        tile_hp = _pick_tile_hp(Hp, Wp, Cin, Cout, itemsize)
    thp = int(tile_hp)
    if Hp % thp != 0:
        raise ValueError("tile_hp must divide H // 2")
    t_img = Hp // thp
    NT = N * t_img                                          # total row tiles
    M = thp * Wp                                            # pooled outputs per tile

    # --------- XLA glue: NHWC + zero-pad + 2x2 parity-plane regroup (~1x input bytes) ---------
    # TODO(synk): the NCHW->NHWC transpose + parity regroup could also move in-kernel (manual
    # halo DMA from the raw input) to shave the remaining glue traffic.
    xh = jnp.transpose(x_nchw, (0, 2, 3, 1)).astype(mm_dtype)           # (N, H, W, Cin)
    xp = jnp.pad(xh, ((0, 0), (1, 1), (1, 1), (0, 0)))                  # (N, H+2, W+2, Cin)
    pp = xp.reshape(N, Hp + 1, 2, Wp + 1, 2, Cin)
    pp = jnp.transpose(pp, (0, 2, 4, 1, 3, 5))                          # (N, 2, 2, Hp+1, Wp+1, Cin)
    if t_img == 1:
        pt = pp
    else:
        # pre-tile the pooled-row axis with a 1-row halo so BlockSpec blocks never overlap
        pt = jnp.stack([pp[:, :, :, j * thp:j * thp + thp + 1] for j in range(t_img)], axis=1)
    pt = pt.reshape(NT * 4 * (thp + 1), Wp + 1, Cin)                    # per-tile contiguous slab

    # conv weight (Cout, Cin, kh, kw) -> (9*Cin, Cout), tap-major; true Cout lane width (no 128 pad)
    w_mat = jnp.transpose(conv_w, (2, 3, 1, 0)).reshape(KS * KS * Cin, Cout).astype(mm_dtype)

    # ---------------- pass 1: global per-channel batch statistics ----------------
    C2 = 2 if (NT % 2 == 0 and NT >= 2) else 1              # v7x: split stats loop across 2 cores
    T2 = NT // C2
    x_spec1 = pl.BlockSpec((4 * (thp + 1), Wp + 1, Cin), lambda c, j: (c * T2 + j, 0, 0))
    w_spec1 = pl.BlockSpec((KS * KS * Cin, Cout), lambda c, j: (0, 0))

    stats = pl.pallas_call(
        functools.partial(_stats_kernel, thp=thp, wp=Wp, cin=Cin, cout=Cout),
        out_shape=jax.ShapeDtypeStruct((C2 * 8, Cout), jnp.float32),
        grid=(C2, T2),
        in_specs=[x_spec1, w_spec1],
        out_specs=pl.BlockSpec((8, Cout), lambda c, j: (c, 0)),
        compiler_params=pltpu.CompilerParams(
            dimension_semantics=("parallel", "arbitrary"),
            vmem_limit_bytes=VMEM_LIMIT_BYTES),
    )(pt, w_mat)

    st = stats.reshape(C2, 8, Cout).sum(axis=0)             # reduce the per-core partial stats
    n_total = jnp.float32(N * H * W)                        # conv pixels per channel
    mean = st[0] / n_total
    var_within = st[1] / n_total
    var_between = jnp.maximum(st[2] / n_total - mean * mean, 0.0)
    var = var_within + var_between                          # biased variance (PyTorch normalizer)
    scale = (bn_gamma.astype(jnp.float32) * lax.rsqrt(var + BN_EPS)).reshape(1, Cout)
    shift = (bn_beta.astype(jnp.float32) - mean * scale[0]).reshape(1, Cout)

    # ---------------- pass 2: conv recompute + BN affine + ReLU + 2x2 max-pool ----------------
    out = pl.pallas_call(
        functools.partial(_apply_kernel, thp=thp, wp=Wp, cin=Cin, cout=Cout),
        out_shape=jax.ShapeDtypeStruct((NT, M, Cout), jnp.float32),
        grid=(NT,),
        in_specs=[pl.BlockSpec((4 * (thp + 1), Wp + 1, Cin), lambda i: (i, 0, 0)),
                  pl.BlockSpec((KS * KS * Cin, Cout), lambda i: (0, 0)),
                  pl.BlockSpec((1, Cout), lambda i: (0, 0)),
                  pl.BlockSpec((1, Cout), lambda i: (0, 0))],
        out_specs=pl.BlockSpec((1, M, Cout), lambda i: (i, 0, 0)),
        compiler_params=pltpu.CompilerParams(
            dimension_semantics=("parallel",),
            vmem_limit_bytes=VMEM_LIMIT_BYTES),
    )(pt, w_mat, scale, shift)

    out = out.reshape(N, Hp, Wp, Cout)                      # tile-major rows == pooled-row order
    return jnp.transpose(out, (0, 3, 1, 2))                 # (N, Cout, H//2, W//2)


def _reference_forward(x, w, b, gamma, beta, eps=BN_EPS):
    """Pure-JAX reference mirroring the PyTorch module (training-mode BN)."""
    conv = lax.conv_general_dilated(
        x, w, window_strides=(1, 1), padding=((1, 1), (1, 1)),
        dimension_numbers=("NCHW", "OIHW", "NCHW")) + b[None, :, None, None]
    mean = conv.mean(axis=(0, 2, 3), keepdims=True)
    var = ((conv - mean) ** 2).mean(axis=(0, 2, 3), keepdims=True)
    y = (conv - mean) * lax.rsqrt(var + eps) * gamma[None, :, None, None] \
        + beta[None, :, None, None]
    y = jnp.maximum(y, 0.0)
    n, c, h, w_ = y.shape
    return y.reshape(n, c, h // 2, 2, w_ // 2, 2).max(axis=(3, 5))


if __name__ == "__main__":
    # Small shapes consistent with the module: batch=2, input_channels=4,
    # output_channels=8, spatial=16, kernel=3, pooling=2.
    N, Cin, Cout, H, W = 2, 4, 8, 16, 16

    key = jax.random.PRNGKey(0)
    kx, kw, kb, kg, kbt = jax.random.split(key, 5)
    x = jax.random.normal(kx, (N, Cin, H, W), dtype=jnp.float32)
    conv_w = jax.random.normal(kw, (Cout, Cin, 3, 3), dtype=jnp.float32) * 0.1
    conv_b = jax.random.normal(kb, (Cout,), dtype=jnp.float32) * 0.1
    bn_gamma = 1.0 + 0.1 * jax.random.normal(kg, (Cout,), dtype=jnp.float32)
    bn_beta = 0.1 * jax.random.normal(kbt, (Cout,), dtype=jnp.float32)
    # TODO(synk): BatchNorm running_mean/var updates are stateful bookkeeping with no effect on
    # the training-mode forward output; not modeled here.

    ref = _reference_forward(x, conv_w, conv_b, bn_gamma, bn_beta)

    # f32 operand path (bit-accuracy check of the implicit-GEMM conv + streaming BN stats).
    out_f32 = conv2d_block_forward(x, conv_w, conv_b, bn_gamma, bn_beta, use_bf16=False)
    out_f32 = jax.block_until_ready(out_f32)
    assert out_f32.shape == (N, Cout, H // 2, W // 2), out_f32.shape
    assert jnp.allclose(out_f32, ref, atol=2e-3, rtol=2e-3), \
        float(jnp.max(jnp.abs(out_f32 - ref)))

    # Default path: bf16 matmul operands (f32 accumulation + f32 epilogue); BN stats are computed
    # from the bf16-rounded conv output, hence the looser tolerance.
    out_bf16 = conv2d_block_forward(x, conv_w, conv_b, bn_gamma, bn_beta)
    out_bf16 = jax.block_until_ready(out_bf16)
    assert jnp.allclose(out_bf16, ref, atol=6e-2, rtol=6e-2), \
        float(jnp.max(jnp.abs(out_bf16 - ref)))

    # Row-tiled path (tile_hp < Hp): exercises the halo pre-tiling, the 2-core stats split
    # (grid (2, 2)) and the cross-tile BN accumulation.
    out_tiled = conv2d_block_forward(x, conv_w, conv_b, bn_gamma, bn_beta,
                                     use_bf16=False, tile_hp=4)
    out_tiled = jax.block_until_ready(out_tiled)
    assert jnp.allclose(out_tiled, ref, atol=2e-3, rtol=2e-3), \
        float(jnp.max(jnp.abs(out_tiled - ref)))

    print("KERNEL_OK")
</pallas_src>

<mosaic_0001>
module attributes {stable_mosaic.version = 11 : i64} {
  func.func @_stats_kernel(%arg0: i32, %arg1: i32, %arg2: memref<36x9x4xf32, #tpu.memory_space<vmem>>, %arg3: memref<36x8xf32, #tpu.memory_space<vmem>>, %arg4: memref<8x8xf32, #tpu.memory_space<vmem>>) attributes {dimension_semantics = [#tpu.dimension_semantics<parallel>, #tpu.dimension_semantics<arbitrary>], iteration_bounds = array<i64: 2, 1>, scalar_prefetch = 0 : i64, scratch_operands = 0 : i64, tpu.core_type = #tpu.core_type<tc>, window_params = [{transform_indices = @transform_0, window_bounds = array<i64: 36, 9, 4>}, {pipeline_mode = #tpu.pipeline_mode<synchronous>, transform_indices = @transform_1, window_bounds = array<i64: 36, 8>}, {transform_indices = @transform_2, window_bounds = array<i64: 8, 8>}]} {
    %c0_i32 = arith.constant 0 : i32
    %0 = arith.cmpi eq, %arg1, %c0_i32 : i32
    %1 = arith.extui %0 : i1 to i32
    %c0_i32_0 = arith.constant 0 : i32
    %2 = arith.cmpi ne, %1, %c0_i32_0 : i32
    scf.if %2 {
      %cst_167 = arith.constant 0.000000e+00 : f32
      %197 = vector.broadcast %cst_167 : f32 to vector<8x8xf32>
      %c0_168 = arith.constant 0 : index
      %c0_169 = arith.constant 0 : index
      %198 = vector.load %arg4[%c0_168, %c0_169] : memref<8x8xf32, #tpu.memory_space<vmem>>, vector<8x8xf32>
      tpu.vector_store %arg4[%c0_168, %c0_169], %197 {strides = array<i32>} : memref<8x8xf32, #tpu.memory_space<vmem>>, vector<8x8xf32>,
    } else {
    }
    %cst = arith.constant 0.000000e+00 : f32
    %3 = vector.broadcast %cst : f32 to vector<64x8xf32>
    %c0 = arith.constant 0 : index
    %c0_1 = arith.constant 0 : index
    %4 = vector.load %arg3[%c0, %c0_1] : memref<36x8xf32, #tpu.memory_space<vmem>>, vector<4x8xf32>
    %c0_2 = arith.constant 0 : index
    %c0_3 = arith.constant 0 : index
    %c0_4 = arith.constant 0 : index
    %5 = vector.load %arg2[%c0_2, %c0_3, %c0_4] : memref<36x9x4xf32, #tpu.memory_space<vmem>>, vector<8x8x4xf32>
    %6 = vector.shape_cast %5 : vector<8x8x4xf32> to vector<64x4xf32>
    %cst_5 = arith.constant dense<0.000000e+00> : vector<64x8xf32>
    %7 = tpu.matmul %6, %4, %cst_5 {dimension_numbers = #tpu.dot_dimension_numbers<[1], [0], [0], [1], [0, 0, 1, 1], [], []>} : vector<64x4xf32>, vector<4x8xf32>, vector<64x8xf32> -> vector<64x8xf32>
    %8 = arith.addf %3, %7 : vector<64x8xf32>
    %c4 = arith.constant 4 : index
    %c0_6 = arith.constant 0 : index
    %9 = vector.load %arg3[%c4, %c0_6] : memref<36x8xf32, #tpu.memory_space<vmem>>, vector<4x8xf32>
    %c9 = arith.constant 9 : index
    %c0_7 = arith.constant 0 : index
    %c0_8 = arith.constant 0 : index
    %10 = vector.load %arg2[%c9, %c0_7, %c0_8] : memref<36x9x4xf32, #tpu.memory_space<vmem>>, vector<8x8x4xf32>
    %11 = vector.shape_cast %10 : vector<8x8x4xf32> to vector<64x4xf32>
    %cst_9 = arith.constant dense<0.000000e+00> : vector<64x8xf32>
    %12 = tpu.matmul %11, %9, %cst_9 {dimension_numbers = #tpu.dot_dimension_numbers<[1], [0], [0], [1], [0, 0, 1, 1], [], []>} : vector<64x4xf32>, vector<4x8xf32>, vector<64x8xf32> -> vector<64x8xf32>
    %13 = arith.addf %8, %12 : vector<64x8xf32>
    %c8 = arith.constant 8 : index
    %c0_10 = arith.constant 0 : index
    %14 = vector.load %arg3[%c8, %c0_10] : memref<36x8xf32, #tpu.memory_space<vmem>>, vector<4x8xf32>
    %c0_11 = arith.constant 0 : index
    %c1 = arith.constant 1 : index
    %c0_12 = arith.constant 0 : index
    %15 = vector.load %arg2[%c0_11, %c1, %c0_12] : memref<36x9x4xf32, #tpu.memory_space<vmem>>, vector<8x8x4xf32>
    %16 = vector.shape_cast %15 : vector<8x8x4xf32> to vector<64x4xf32>
    %cst_13 = arith.constant dense<0.000000e+00> : vector<64x8xf32>
    %17 = tpu.matmul %16, %14, %cst_13 {dimension_numbers = #tpu.dot_dimension_numbers<[1], [0], [0], [1], [0, 0, 1, 1], [], []>} : vector<64x4xf32>, vector<4x8xf32>, vector<64x8xf32> -> vector<64x8xf32>
    %18 = arith.addf %13, %17 : vector<64x8xf32>
    %c12 = arith.constant 12 : index
    %c0_14 = arith.constant 0 : index
    %19 = vector.load %arg3[%c12, %c0_14] : memref<36x8xf32, #tpu.memory_space<vmem>>, vector<4x8xf32>
    %c18 = arith.constant 18 : index
    %c0_15 = arith.constant 0 : index
    %c0_16 = arith.constant 0 : index
    %20 = vector.load %arg2[%c18, %c0_15, %c0_16] : memref<36x9x4xf32, #tpu.memory_space<vmem>>, vector<8x8x4xf32>
    %21 = vector.shape_cast %20 : vector<8x8x4xf32> to vector<64x4xf32>
    %cst_17 = arith.constant dense<0.000000e+00> : vector<64x8xf32>
    %22 = tpu.matmul %21, %19, %cst_17 {dimension_numbers = #tpu.dot_dimension_numbers<[1], [0], [0], [1], [0, 0, 1, 1], [], []>} : vector<64x4xf32>, vector<4x8xf32>, vector<64x8xf32> -> vector<64x8xf32>
    %23 = arith.addf %18, %22 : vector<64x8xf32>
    %c16 = arith.constant 16 : index
    %c0_18 = arith.constant 0 : index
    %24 = vector.load %arg3[%c16, %c0_18] : memref<36x8xf32, #tpu.memory_space<vmem>>, vector<4x8xf32>
    %c27 = arith.constant 27 : index
    %c0_19 = arith.constant 0 : index
    %c0_20 = arith.constant 0 : index
    %25 = vector.load %arg2[%c27, %c0_19, %c0_20] : memref<36x9x4xf32, #tpu.memory_space<vmem>>, vector<8x8x4xf32>
    %26 = vector.shape_cast %25 : vector<8x8x4xf32> to vector<64x4xf32>
    %cst_21 = arith.constant dense<0.000000e+00> : vector<64x8xf32>
    %27 = tpu.matmul %26, %24, %cst_21 {dimension_numbers = #tpu.dot_dimension_numbers<[1], [0], [0], [1], [0, 0, 1, 1], [], []>} : vector<64x4xf32>, vector<4x8xf32>, vector<64x8xf32> -> vector<64x8xf32>
    %28 = arith.addf %23, %27 : vector<64x8xf32>
    %c20 = arith.constant 20 : index
    %c0_22 = arith.constant 0 : index
    %29 = vector.load %arg3[%c20, %c0_22] : memref<36x8xf32, #tpu.memory_space<vmem>>, vector<4x8xf32>
    %c18_23 = arith.constant 18 : index
    %c1_24 = arith.constant 1 : index
    %c0_25 = arith.constant 0 : index
    %30 = vector.load %arg2[%c18_23, %c1_24, %c0_25] : memref<36x9x4xf32, #tpu.memory_space<vmem>>, vector<8x8x4xf32>
    %31 = vector.shape_cast %30 : vector<8x8x4xf32> to vector<64x4xf32>
    %cst_26 = arith.constant dense<0.000000e+00> : vector<64x8xf32>
    %32 = tpu.matmul %31, %29, %cst_26 {dimension_numbers = #tpu.dot_dimension_numbers<[1], [0], [0], [1], [0, 0, 1, 1], [], []>} : vector<64x4xf32>, vector<4x8xf32>, vector<64x8xf32> -> vector<64x8xf32>
    %33 = arith.addf %28, %32 : vector<64x8xf32>
    %c24 = arith.constant 24 : index
    %c0_27 = arith.constant 0 : index
    %34 = vector.load %arg3[%c24, %c0_27] : memref<36x8xf32, #tpu.memory_space<vmem>>, vector<4x8xf32>
    %c1_28 = arith.constant 1 : index
    %c0_29 = arith.constant 0 : index
    %c0_30 = arith.constant 0 : index
    %35 = vector.load %arg2[%c1_28, %c0_29, %c0_30] : memref<36x9x4xf32, #tpu.memory_space<vmem>>, vector<8x8x4xf32>
    %36 = vector.shape_cast %35 : vector<8x8x4xf32> to vector<64x4xf32>
    %cst_31 = arith.constant dense<0.000000e+00> : vector<64x8xf32>
    %37 = tpu.matmul %36, %34, %cst_31 {dimension_numbers = #tpu.dot_dimension_numbers<[1], [0], [0], [1], [0, 0, 1, 1], [], []>} : vector<64x4xf32>, vector<4x8xf32>, vector<64x8xf32> -> vector<64x8xf32>
    %38 = arith.addf %33, %37 : vector<64x8xf32>
    %c28 = arith.constant 28 : index
    %c0_32 = arith.constant 0 : index
    %39 = vector.load %arg3[%c28, %c0_32] : memref<36x8xf32, #tpu.memory_space<vmem>>, vector<4x8xf32>
    %c10 = arith.constant 10 : index
    %c0_33 = arith.constant 0 : index
    %c0_34 = arith.constant 0 : index
    %40 = vector.load %arg2[%c10, %c0_33, %c0_34] : memref<36x9x4xf32, #tpu.memory_space<vmem>>, vector<8x8x4xf32>
    %41 = vector.shape_cast %40 : vector<8x8x4xf32> to vector<64x4xf32>
    %cst_35 = arith.constant dense<0.000000e+00> : vector<64x8xf32>
    %42 = tpu.matmul %41, %39, %cst_35 {dimension_numbers = #tpu.dot_dimension_numbers<[1], [0], [0], [1], [0, 0, 1, 1], [], []>} : vector<64x4xf32>, vector<4x8xf32>, vector<64x8xf32> -> vector<64x8xf32>
    %43 = arith.addf %38, %42 : vector<64x8xf32>
    %c32 = arith.constant 32 : index
    %c0_36 = arith.constant 0 : index
    %44 = vector.load %arg3[%c32, %c0_36] : memref<36x8xf32, #tpu.memory_space<vmem>>, vector<4x8xf32>
    %c1_37 = arith.constant 1 : index
    %c1_38 = arith.constant 1 : index
    %c0_39 = arith.constant 0 : index
    %45 = vector.load %arg2[%c1_37, %c1_38, %c0_39] : memref<36x9x4xf32, #tpu.memory_space<vmem>>, vector<8x8x4xf32>
    %46 = vector.shape_cast %45 : vector<8x8x4xf32> to vector<64x4xf32>
    %cst_40 = arith.constant dense<0.000000e+00> : vector<64x8xf32>
    %47 = tpu.matmul %46, %44, %cst_40 {dimension_numbers = #tpu.dot_dimension_numbers<[1], [0], [0], [1], [0, 0, 1, 1], [], []>} : vector<64x4xf32>, vector<4x8xf32>, vector<64x8xf32> -> vector<64x8xf32>
    %48 = arith.addf %43, %47 : vector<64x8xf32>
    %cst_41 = arith.constant 0.000000e+00 : f32
    %49 = vector.broadcast %cst_41 : f32 to vector<64x8xf32>
    %c0_42 = arith.constant 0 : index
    %c0_43 = arith.constant 0 : index
    %50 = vector.load %arg3[%c0_42, %c0_43] : memref<36x8xf32, #tpu.memory_space<vmem>>, vector<4x8xf32>
    %cst_44 = arith.constant dense<0.000000e+00> : vector<64x8xf32>
    %51 = tpu.matmul %11, %50, %cst_44 {dimension_numbers = #tpu.dot_dimension_numbers<[1], [0], [0], [1], [0, 0, 1, 1], [], []>} : vector<64x4xf32>, vector<4x8xf32>, vector<64x8xf32> -> vector<64x8xf32>
    %52 = arith.addf %49, %51 : vector<64x8xf32>
    %c4_45 = arith.constant 4 : index
    %c0_46 = arith.constant 0 : index
    %53 = vector.load %arg3[%c4_45, %c0_46] : memref<36x8xf32, #tpu.memory_space<vmem>>, vector<4x8xf32>
    %cst_47 = arith.constant dense<0.000000e+00> : vector<64x8xf32>
    %54 = tpu.matmul %16, %53, %cst_47 {dimension_numbers = #tpu.dot_dimension_numbers<[1], [0], [0], [1], [0, 0, 1, 1], [], []>} : vector<64x4xf32>, vector<4x8xf32>, vector<64x8xf32> -> vector<64x8xf32>
    %55 = arith.addf %52, %54 : vector<64x8xf32>
    %c8_48 = arith.constant 8 : index
    %c0_49 = arith.constant 0 : index
    %56 = vector.load %arg3[%c8_48, %c0_49] : memref<36x8xf32, #tpu.memory_space<vmem>>, vector<4x8xf32>
    %c9_50 = arith.constant 9 : index
    %c1_51 = arith.constant 1 : index
    %c0_52 = arith.constant 0 : index
    %57 = vector.load %arg2[%c9_50, %c1_51, %c0_52] : memref<36x9x4xf32, #tpu.memory_space<vmem>>, vector<8x8x4xf32>
    %58 = vector.shape_cast %57 : vector<8x8x4xf32> to vector<64x4xf32>
    %cst_53 = arith.constant dense<0.000000e+00> : vector<64x8xf32>
    %59 = tpu.matmul %58, %56, %cst_53 {dimension_numbers = #tpu.dot_dimension_numbers<[1], [0], [0], [1], [0, 0, 1, 1], [], []>} : vector<64x4xf32>, vector<4x8xf32>, vector<64x8xf32> -> vector<64x8xf32>
    %60 = arith.addf %55, %59 : vector<64x8xf32>
    %c12_54 = arith.constant 12 : index
    %c0_55 = arith.constant 0 : index
    %61 = vector.load %arg3[%c12_54, %c0_55] : memref<36x8xf32, #tpu.memory_space<vmem>>, vector<4x8xf32>
    %cst_56 = arith.constant dense<0.000000e+00> : vector<64x8xf32>
    %62 = tpu.matmul %26, %61, %cst_56 {dimension_numbers = #tpu.dot_dimension_numbers<[1], [0], [0], [1], [0, 0, 1, 1], [], []>} : vector<64x4xf32>, vector<4x8xf32>, vector<64x8xf32> -> vector<64x8xf32>
    %63 = arith.addf %60, %62 : vector<64x8xf32>
    %c16_57 = arith.constant 16 : index
    %c0_58 = arith.constant 0 : index
    %64 = vector.load %arg3[%c16_57, %c0_58] : memref<36x8xf32, #tpu.memory_space<vmem>>, vector<4x8xf32>
    %cst_59 = arith.constant dense<0.000000e+00> : vector<64x8xf32>
    %65 = tpu.matmul %31, %64, %cst_59 {dimension_numbers = #tpu.dot_dimension_numbers<[1], [0], [0], [1], [0, 0, 1, 1], [], []>} : vector<64x4xf32>, vector<4x8xf32>, vector<64x8xf32> -> vector<64x8xf32>
    %66 = arith.addf %63, %65 : vector<64x8xf32>
    %c20_60 = arith.constant 20 : index
    %c0_61 = arith.constant 0 : index
    %67 = vector.load %arg3[%c20_60, %c0_61] : memref<36x8xf32, #tpu.memory_space<vmem>>, vector<4x8xf32>
    %c27_62 = arith.constant 27 : index
    %c1_63 = arith.constant 1 : index
    %c0_64 = arith.constant 0 : index
    %68 = vector.load %arg2[%c27_62, %c1_63, %c0_64] : memref<36x9x4xf32, #tpu.memory_space<vmem>>, vector<8x8x4xf32>
    %69 = vector.shape_cast %68 : vector<8x8x4xf32> to vector<64x4xf32>
    %cst_65 = arith.constant dense<0.000000e+00> : vector<64x8xf32>
    %70 = tpu.matmul %69, %67, %cst_65 {dimension_numbers = #tpu.dot_dimension_numbers<[1], [0], [0], [1], [0, 0, 1, 1], [], []>} : vector<64x4xf32>, vector<4x8xf32>, vector<64x8xf32> -> vector<64x8xf32>
    %71 = arith.addf %66, %70 : vector<64x8xf32>
    %c24_66 = arith.constant 24 : index
    %c0_67 = arith.constant 0 : index
    %72 = vector.load %arg3[%c24_66, %c0_67] : memref<36x8xf32, #tpu.memory_space<vmem>>, vector<4x8xf32>
    %cst_68 = arith.constant dense<0.000000e+00> : vector<64x8xf32>
    %73 = tpu.matmul %41, %72, %cst_68 {dimension_numbers = #tpu.dot_dimension_numbers<[1], [0], [0], [1], [0, 0, 1, 1], [], []>} : vector<64x4xf32>, vector<4x8xf32>, vector<64x8xf32> -> vector<64x8xf32>
    %74 = arith.addf %71, %73 : vector<64x8xf32>
    %c28_69 = arith.constant 28 : index
    %c0_70 = arith.constant 0 : index
    %75 = vector.load %arg3[%c28_69, %c0_70] : memref<36x8xf32, #tpu.memory_space<vmem>>, vector<4x8xf32>
    %cst_71 = arith.constant dense<0.000000e+00> : vector<64x8xf32>
    %76 = tpu.matmul %46, %75, %cst_71 {dimension_numbers = #tpu.dot_dimension_numbers<[1], [0], [0], [1], [0, 0, 1, 1], [], []>} : vector<64x4xf32>, vector<4x8xf32>, vector<64x8xf32> -> vector<64x8xf32>
    %77 = arith.addf %74, %76 : vector<64x8xf32>
    %c32_72 = arith.constant 32 : index
    %c0_73 = arith.constant 0 : index
    %78 = vector.load %arg3[%c32_72, %c0_73] : memref<36x8xf32, #tpu.memory_space<vmem>>, vector<4x8xf32>
    %c10_74 = arith.constant 10 : index
    %c1_75 = arith.constant 1 : index
    %c0_76 = arith.constant 0 : index
    %79 = vector.load %arg2[%c10_74, %c1_75, %c0_76] : memref<36x9x4xf32, #tpu.memory_space<vmem>>, vector<8x8x4xf32>
    %80 = vector.shape_cast %79 : vector<8x8x4xf32> to vector<64x4xf32>
    %cst_77 = arith.constant dense<0.000000e+00> : vector<64x8xf32>
    %81 = tpu.matmul %80, %78, %cst_77 {dimension_numbers = #tpu.dot_dimension_numbers<[1], [0], [0], [1], [0, 0, 1, 1], [], []>} : vector<64x4xf32>, vector<4x8xf32>, vector<64x8xf32> -> vector<64x8xf32>
    %82 = arith.addf %77, %81 : vector<64x8xf32>
    %cst_78 = arith.constant 0.000000e+00 : f32
    %83 = vector.broadcast %cst_78 : f32 to vector<64x8xf32>
    %c0_79 = arith.constant 0 : index
    %c0_80 = arith.constant 0 : index
    %84 = vector.load %arg3[%c0_79, %c0_80] : memref<36x8xf32, #tpu.memory_space<vmem>>, vector<4x8xf32>
    %cst_81 = arith.constant dense<0.000000e+00> : vector<64x8xf32>
    %85 = tpu.matmul %21, %84, %cst_81 {dimension_numbers = #tpu.dot_dimension_numbers<[1], [0], [0], [1], [0, 0, 1, 1], [], []>} : vector<64x4xf32>, vector<4x8xf32>, vector<64x8xf32> -> vector<64x8xf32>
    %86 = arith.addf %83, %85 : vector<64x8xf32>
    %c4_82 = arith.constant 4 : index
    %c0_83 = arith.constant 0 : index
    %87 = vector.load %arg3[%c4_82, %c0_83] : memref<36x8xf32, #tpu.memory_space<vmem>>, vector<4x8xf32>
    %cst_84 = arith.constant dense<0.000000e+00> : vector<64x8xf32>
    %88 = tpu.matmul %26, %87, %cst_84 {dimension_numbers = #tpu.dot_dimension_numbers<[1], [0], [0], [1], [0, 0, 1, 1], [], []>} : vector<64x4xf32>, vector<4x8xf32>, vector<64x8xf32> -> vector<64x8xf32>
    %89 = arith.addf %86, %88 : vector<64x8xf32>
    %c8_85 = arith.constant 8 : index
    %c0_86 = arith.constant 0 : index
    %90 = vector.load %arg3[%c8_85, %c0_86] : memref<36x8xf32, #tpu.memory_space<vmem>>, vector<4x8xf32>
    %cst_87 = arith.constant dense<0.000000e+00> : vector<64x8xf32>
    %91 = tpu.matmul %31, %90, %cst_87 {dimension_numbers = #tpu.dot_dimension_numbers<[1], [0], [0], [1], [0, 0, 1, 1], [], []>} : vector<64x4xf32>, vector<4x8xf32>, vector<64x8xf32> -> vector<64x8xf32>
    %92 = arith.addf %89, %91 : vector<64x8xf32>
    %c12_88 = arith.constant 12 : index
    %c0_89 = arith.constant 0 : index
    %93 = vector.load %arg3[%c12_88, %c0_89] : memref<36x8xf32, #tpu.memory_space<vmem>>, vector<4x8xf32>
    %cst_90 = arith.constant dense<0.000000e+00> : vector<64x8xf32>
    %94 = tpu.matmul %36, %93, %cst_90 {dimension_numbers = #tpu.dot_dimension_numbers<[1], [0], [0], [1], [0, 0, 1, 1], [], []>} : vector<64x4xf32>, vector<4x8xf32>, vector<64x8xf32> -> vector<64x8xf32>
    %95 = arith.addf %92, %94 : vector<64x8xf32>
    %c16_91 = arith.constant 16 : index
    %c0_92 = arith.constant 0 : index
    %96 = vector.load %arg3[%c16_91, %c0_92] : memref<36x8xf32, #tpu.memory_space<vmem>>, vector<4x8xf32>
    %cst_93 = arith.constant dense<0.000000e+00> : vector<64x8xf32>
    %97 = tpu.matmul %41, %96, %cst_93 {dimension_numbers = #tpu.dot_dimension_numbers<[1], [0], [0], [1], [0, 0, 1, 1], [], []>} : vector<64x4xf32>, vector<4x8xf32>, vector<64x8xf32> -> vector<64x8xf32>
    %98 = arith.addf %95, %97 : vector<64x8xf32>
    %c20_94 = arith.constant 20 : index
    %c0_95 = arith.constant 0 : index
    %99 = vector.load %arg3[%c20_94, %c0_95] : memref<36x8xf32, #tpu.memory_space<vmem>>, vector<4x8xf32>
    %cst_96 = arith.constant dense<0.000000e+00> : vector<64x8xf32>
    %100 = tpu.matmul %46, %99, %cst_96 {dimension_numbers = #tpu.dot_dimension_numbers<[1], [0], [0], [1], [0, 0, 1, 1], [], []>} : vector<64x4xf32>, vector<4x8xf32>, vector<64x8xf32> -> vector<64x8xf32>
    %101 = arith.addf %98, %100 : vector<64x8xf32>
    %c24_97 = arith.constant 24 : index
    %c0_98 = arith.constant 0 : index
    %102 = vector.load %arg3[%c24_97, %c0_98] : memref<36x8xf32, #tpu.memory_space<vmem>>, vector<4x8xf32>
    %c19 = arith.constant 19 : index
    %c0_99 = arith.constant 0 : index
    %c0_100 = arith.constant 0 : index
    %103 = vector.load %arg2[%c19, %c0_99, %c0_100] : memref<36x9x4xf32, #tpu.memory_space<vmem>>, vector<8x8x4xf32>
    %104 = vector.shape_cast %103 : vector<8x8x4xf32> to vector<64x4xf32>
    %cst_101 = arith.constant dense<0.000000e+00> : vector<64x8xf32>
    %105 = tpu.matmul %104, %102, %cst_101 {dimension_numbers = #tpu.dot_dimension_numbers<[1], [0], [0], [1], [0, 0, 1, 1], [], []>} : vector<64x4xf32>, vector<4x8xf32>, vector<64x8xf32> -> vector<64x8xf32>
    %106 = arith.addf %101, %105 : vector<64x8xf32>
    %c28_102 = arith.constant 28 : index
    %c0_103 = arith.constant 0 : index
    %107 = vector.load %arg3[%c28_102, %c0_103] : memref<36x8xf32, #tpu.memory_space<vmem>>, vector<4x8xf32>
    %c28_104 = arith.constant 28 : index
    %c0_105 = arith.constant 0 : index
    %c0_106 = arith.constant 0 : index
    %108 = vector.load %arg2[%c28_104, %c0_105, %c0_106] : memref<36x9x4xf32, #tpu.memory_space<vmem>>, vector<8x8x4xf32>
    %109 = vector.shape_cast %108 : vector<8x8x4xf32> to vector<64x4xf32>
    %cst_107 = arith.constant dense<0.000000e+00> : vector<64x8xf32>
    %110 = tpu.matmul %109, %107, %cst_107 {dimension_numbers = #tpu.dot_dimension_numbers<[1], [0], [0], [1], [0, 0, 1, 1], [], []>} : vector<64x4xf32>, vector<4x8xf32>, vector<64x8xf32> -> vector<64x8xf32>
    %111 = arith.addf %106, %110 : vector<64x8xf32>
    %c32_108 = arith.constant 32 : index
    %c0_109 = arith.constant 0 : index
    %112 = vector.load %arg3[%c32_108, %c0_109] : memref<36x8xf32, #tpu.memory_space<vmem>>, vector<4x8xf32>
    %c19_110 = arith.constant 19 : index
    %c1_111 = arith.constant 1 : index
    %c0_112 = arith.constant 0 : index
    %113 = vector.load %arg2[%c19_110, %c1_111, %c0_112] : memref<36x9x4xf32, #tpu.memory_space<vmem>>, vector<8x8x4xf32>
    %114 = vector.shape_cast %113 : vector<8x8x4xf32> to vector<64x4xf32>
    %cst_113 = arith.constant dense<0.000000e+00> : vector<64x8xf32>
    %115 = tpu.matmul %114, %112, %cst_113 {dimension_numbers = #tpu.dot_dimension_numbers<[1], [0], [0], [1], [0, 0, 1, 1], [], []>} : vector<64x4xf32>, vector<4x8xf32>, vector<64x8xf32> -> vector<64x8xf32>
    %116 = arith.addf %111, %115 : vector<64x8xf32>
    %cst_114 = arith.constant 0.000000e+00 : f32
    %117 = vector.broadcast %cst_114 : f32 to vector<64x8xf32>
    %c0_115 = arith.constant 0 : index
    %c0_116 = arith.constant 0 : index
    %118 = vector.load %arg3[%c0_115, %c0_116] : memref<36x8xf32, #tpu.memory_space<vmem>>, vector<4x8xf32>
    %cst_117 = arith.constant dense<0.000000e+00> : vector<64x8xf32>
    %119 = tpu.matmul %26, %118, %cst_117 {dimension_numbers = #tpu.dot_dimension_numbers<[1], [0], [0], [1], [0, 0, 1, 1], [], []>} : vector<64x4xf32>, vector<4x8xf32>, vector<64x8xf32> -> vector<64x8xf32>
    %120 = arith.addf %117, %119 : vector<64x8xf32>
    %c4_118 = arith.constant 4 : index
    %c0_119 = arith.constant 0 : index
    %121 = vector.load %arg3[%c4_118, %c0_119] : memref<36x8xf32, #tpu.memory_space<vmem>>, vector<4x8xf32>
    %cst_120 = arith.constant dense<0.000000e+00> : vector<64x8xf32>
    %122 = tpu.matmul %31, %121, %cst_120 {dimension_numbers = #tpu.dot_dimension_numbers<[1], [0], [0], [1], [0, 0, 1, 1], [], []>} : vector<64x4xf32>, vector<4x8xf32>, vector<64x8xf32> -> vector<64x8xf32>
    %123 = arith.addf %120, %122 : vector<64x8xf32>
    %c8_121 = arith.constant 8 : index
    %c0_122 = arith.constant 0 : index
    %124 = vector.load %arg3[%c8_121, %c0_122] : memref<36x8xf32, #tpu.memory_space<vmem>>, vector<4x8xf32>
    %cst_123 = arith.constant dense<0.000000e+00> : vector<64x8xf32>
    %125 = tpu.matmul %69, %124, %cst_123 {dimension_numbers = #tpu.dot_dimension_numbers<[1], [0], [0], [1], [0, 0, 1, 1], [], []>} : vector<64x4xf32>, vector<4x8xf32>, vector<64x8xf32> -> vector<64x8xf32>
    %126 = arith.addf %123, %125 : vector<64x8xf32>
    %c12_124 = arith.constant 12 : index
    %c0_125 = arith.constant 0 : index
    %127 = vector.load %arg3[%c12_124, %c0_125] : memref<36x8xf32, #tpu.memory_space<vmem>>, vector<4x8xf32>
    %cst_126 = arith.constant dense<0.000000e+00> : vector<64x8xf32>
    %128 = tpu.matmul %41, %127, %cst_126 {dimension_numbers = #tpu.dot_dimension_numbers<[1], [0], [0], [1], [0, 0, 1, 1], [], []>} : vector<64x4xf32>, vector<4x8xf32>, vector<64x8xf32> -> vector<64x8xf32>
    %129 = arith.addf %126, %128 : vector<64x8xf32>
    %c16_127 = arith.constant 16 : index
    %c0_128 = arith.constant 0 : index
    %130 = vector.load %arg3[%c16_127, %c0_128] : memref<36x8xf32, #tpu.memory_space<vmem>>, vector<4x8xf32>
    %cst_129 = arith.constant dense<0.000000e+00> : vector<64x8xf32>
    %131 = tpu.matmul %46, %130, %cst_129 {dimension_numbers = #tpu.dot_dimension_numbers<[1], [0], [0], [1], [0, 0, 1, 1], [], []>} : vector<64x4xf32>, vector<4x8xf32>, vector<64x8xf32> -> vector<64x8xf32>
    %132 = arith.addf %129, %131 : vector<64x8xf32>
    %c20_130 = arith.constant 20 : index
    %c0_131 = arith.constant 0 : index
    %133 = vector.load %arg3[%c20_130, %c0_131] : memref<36x8xf32, #tpu.memory_space<vmem>>, vector<4x8xf32>
    %cst_132 = arith.constant dense<0.000000e+00> : vector<64x8xf32>
    %134 = tpu.matmul %80, %133, %cst_132 {dimension_numbers = #tpu.dot_dimension_numbers<[1], [0], [0], [1], [0, 0, 1, 1], [], []>} : vector<64x4xf32>, vector<4x8xf32>, vector<64x8xf32> -> vector<64x8xf32>
    %135 = arith.addf %132, %134 : vector<64x8xf32>
    %c24_133 = arith.constant 24 : index
    %c0_134 = arith.constant 0 : index
    %136 = vector.load %arg3[%c24_133, %c0_134] : memref<36x8xf32, #tpu.memory_space<vmem>>, vector<4x8xf32>
    %cst_135 = arith.constant dense<0.000000e+00> : vector<64x8xf32>
    %137 = tpu.matmul %109, %136, %cst_135 {dimension_numbers = #tpu.dot_dimension_numbers<[1], [0], [0], [1], [0, 0, 1, 1], [], []>} : vector<64x4xf32>, vector<4x8xf32>, vector<64x8xf32> -> vector<64x8xf32>
    %138 = arith.addf %135, %137 : vector<64x8xf32>
    %c28_136 = arith.constant 28 : index
    %c0_137 = arith.constant 0 : index
    %139 = vector.load %arg3[%c28_136, %c0_137] : memref<36x8xf32, #tpu.memory_space<vmem>>, vector<4x8xf32>
    %cst_138 = arith.constant dense<0.000000e+00> : vector<64x8xf32>
    %140 = tpu.matmul %114, %139, %cst_138 {dimension_numbers = #tpu.dot_dimension_numbers<[1], [0], [0], [1], [0, 0, 1, 1], [], []>} : vector<64x4xf32>, vector<4x8xf32>, vector<64x8xf32> -> vector<64x8xf32>
    %141 = arith.addf %138, %140 : vector<64x8xf32>
    %c32_139 = arith.constant 32 : index
    %c0_140 = arith.constant 0 : index
    %142 = vector.load %arg3[%c32_139, %c0_140] : memref<36x8xf32, #tpu.memory_space<vmem>>, vector<4x8xf32>
    %c28_141 = arith.constant 28 : index
    %c1_142 = arith.constant 1 : index
    %c0_143 = arith.constant 0 : index
    %143 = vector.load %arg2[%c28_141, %c1_142, %c0_143] : memref<36x9x4xf32, #tpu.memory_space<vmem>>, vector<8x8x4xf32>
    %144 = vector.shape_cast %143 : vector<8x8x4xf32> to vector<64x4xf32>
    %cst_144 = arith.constant dense<0.000000e+00> : vector<64x8xf32>
    %145 = tpu.matmul %144, %142, %cst_144 {dimension_numbers = #tpu.dot_dimension_numbers<[1], [0], [0], [1], [0, 0, 1, 1], [], []>} : vector<64x4xf32>, vector<4x8xf32>, vector<64x8xf32> -> vector<64x8xf32>
    %146 = arith.addf %141, %145 : vector<64x8xf32>
    %cst_145 = arith.constant dense<0.000000e+00> : vector<8xf32>
    %147 = vector.multi_reduction <add>, %48, %cst_145 [0] : vector<64x8xf32> to vector<8xf32>
    %148 = vector.shape_cast %147 : vector<8xf32> to vector<1x8xf32>
    %cst_146 = arith.constant dense<0.000000e+00> : vector<8xf32>
    %149 = vector.multi_reduction <add>, %82, %cst_146 [0] : vector<64x8xf32> to vector<8xf32>
    %150 = vector.shape_cast %149 : vector<8xf32> to vector<1x8xf32>
    %151 = arith.addf %148, %150 : vector<1x8xf32>
    %cst_147 = arith.constant dense<0.000000e+00> : vector<8xf32>
    %152 = vector.multi_reduction <add>, %116, %cst_147 [0] : vector<64x8xf32> to vector<8xf32>
    %153 = vector.shape_cast %152 : vector<8xf32> to vector<1x8xf32>
    %154 = arith.addf %151, %153 : vector<1x8xf32>
    %cst_148 = arith.constant dense<0.000000e+00> : vector<8xf32>
    %155 = vector.multi_reduction <add>, %146, %cst_148 [0] : vector<64x8xf32> to vector<8xf32>
    %156 = vector.shape_cast %155 : vector<8xf32> to vector<1x8xf32>
    %157 = arith.addf %154, %156 : vector<1x8xf32>
    %cst_149 = arith.constant 3.906250e-03 : f32
    %158 = vector.broadcast %cst_149 : f32 to vector<1x8xf32>
    %159 = arith.mulf %157, %158 : vector<1x8xf32>
    %cst_150 = arith.constant 0.000000e+00 : f32
    %160 = vector.broadcast %cst_150 : f32 to vector<1x8xf32>
    %161 = vector.broadcast %159 : vector<1x8xf32> to vector<64x8xf32>
    %162 = arith.subf %48, %161 : vector<64x8xf32>
    %163 = arith.mulf %162, %162 : vector<64x8xf32>
    %cst_151 = arith.constant dense<0.000000e+00> : vector<8xf32>
    %164 = vector.multi_reduction <add>, %163, %cst_151 [0] : vector<64x8xf32> to vector<8xf32>
    %165 = vector.shape_cast %164 : vector<8xf32> to vector<1x8xf32>
    %166 = arith.addf %160, %165 : vector<1x8xf32>
    %167 = vector.broadcast %159 : vector<1x8xf32> to vector<64x8xf32>
    %168 = arith.subf %82, %167 : vector<64x8xf32>
    %169 = arith.mulf %168, %168 : vector<64x8xf32>
    %cst_152 = arith.constant dense<0.000000e+00> : vector<8xf32>
    %170 = vector.multi_reduction <add>, %169, %cst_152 [0] : vector<64x8xf32> to vector<8xf32>
    %171 = vector.shape_cast %170 : vector<8xf32> to vector<1x8xf32>
    %172 = arith.addf %166, %171 : vector<1x8xf32>
    %173 = vector.broadcast %159 : vector<1x8xf32> to vector<64x8xf32>
    %174 = arith.subf %116, %173 : vector<64x8xf32>
    %175 = arith.mulf %174, %174 : vector<64x8xf32>
    %cst_153 = arith.constant dense<0.000000e+00> : vector<8xf32>
    %176 = vector.multi_reduction <add>, %175, %cst_153 [0] : vector<64x8xf32> to vector<8xf32>
    %177 = vector.shape_cast %176 : vector<8xf32> to vector<1x8xf32>
    %178 = arith.addf %172, %177 : vector<1x8xf32>
    %179 = vector.broadcast %159 : vector<1x8xf32> to vector<64x8xf32>
    %180 = arith.subf %146, %179 : vector<64x8xf32>
    %181 = arith.mulf %180, %180 : vector<64x8xf32>
    %cst_154 = arith.constant dense<0.000000e+00> : vector<8xf32>
    %182 = vector.multi_reduction <add>, %181, %cst_154 [0] : vector<64x8xf32> to vector<8xf32>
    %183 = vector.shape_cast %182 : vector<8xf32> to vector<1x8xf32>
    %184 = arith.addf %178, %183 : vector<1x8xf32>
    %c0_155 = arith.constant 0 : index
    %c0_156 = arith.constant 0 : index
    %185 = vector.load %arg4[%c0_155, %c0_156] : memref<8x8xf32, #tpu.memory_space<vmem>>, vector<1x8xf32>
    %186 = arith.addf %185, %157 : vector<1x8xf32>
    %c0_157 = arith.constant 0 : index
    %c0_158 = arith.constant 0 : index
    %187 = vector.load %arg4[%c0_157, %c0_158] : memref<8x8xf32, #tpu.memory_space<vmem>>, vector<1x8xf32>
    tpu.vector_store %arg4[%c0_157, %c0_158], %186 {strides = array<i32>} : memref<8x8xf32, #tpu.memory_space<vmem>>, vector<1x8xf32>,
    %c1_159 = arith.constant 1 : index
    %c0_160 = arith.constant 0 : index
    %188 = vector.load %arg4[%c1_159, %c0_160] : memref<8x8xf32, #tpu.memory_space<vmem>>, vector<1x8xf32>
    %189 = arith.addf %188, %184 : vector<1x8xf32>
    %c1_161 = arith.constant 1 : index
    %c0_162 = arith.constant 0 : index
    %190 = vector.load %arg4[%c1_161, %c0_162] : memref<8x8xf32, #tpu.memory_space<vmem>>, vector<1x8xf32>
    tpu.vector_store %arg4[%c1_161, %c0_162], %189 {strides = array<i32>} : memref<8x8xf32, #tpu.memory_space<vmem>>, vector<1x8xf32>,
    %c2 = arith.constant 2 : index
    %c0_163 = arith.constant 0 : index
    %191 = vector.load %arg4[%c2, %c0_163] : memref<8x8xf32, #tpu.memory_space<vmem>>, vector<1x8xf32>
    %cst_164 = arith.constant 2.560000e+02 : f32
    %192 = vector.broadcast %cst_164 : f32 to vector<1x8xf32>
    %193 = arith.mulf %192, %159 : vector<1x8xf32>
    %194 = arith.mulf %193, %159 : vector<1x8xf32>
    %195 = arith.addf %191, %194 : vector<1x8xf32>
    %c2_165 = arith.constant 2 : index
    %c0_166 = arith.constant 0 : index
    %196 = vector.load %arg4[%c2_165, %c0_166] : memref<8x8xf32, #tpu.memory_space<vmem>>, vector<1x8xf32>
    tpu.vector_store %arg4[%c2_165, %c0_166], %195 {strides = array<i32>} : memref<8x8xf32, #tpu.memory_space<vmem>>, vector<1x8xf32>,
    return
  }
  func.func @transform_0(%arg0: i32, %arg1: i32) -> (i32, i32, i32) {
    %c1_i32 = arith.constant 1 : i32
    %0 = arith.muli %arg0, %c1_i32 : i32
    %1 = arith.addi %0, %arg1 : i32
    %c0_i32 = arith.constant 0 : i32
    %c0_i32_0 = arith.constant 0 : i32
    %c0_i32_1 = arith.constant 0 : i32
    return %1, %c0_i32, %c0_i32_0 : i32, i32, i32
  }
  func.func @transform_1(%arg0: i32, %arg1: i32) -> (i32, i32) {
    %c0_i32 = arith.constant 0 : i32
    %c0_i32_0 = arith.constant 0 : i32
    %c0_i32_1 = arith.constant 0 : i32
    return %c0_i32, %c0_i32_0 : i32, i32
  }
  func.func @transform_2(%arg0: i32, %arg1: i32) -> (i32, i32) {
    %c0_i32 = arith.constant 0 : i32
    %c0_i32_0 = arith.constant 0 : i32
    return %arg0, %c0_i32 : i32, i32
  }
}

module attributes {stable_mosaic.version = 11 : i64} {
  func.func @_apply_kernel(%arg0: i32, %arg1: memref<36x9x4xf32, #tpu.memory_space<vmem>>, %arg2: memref<36x8xf32, #tpu.memory_space<vmem>>, %arg3: memref<1x8xf32, #tpu.memory_space<vmem>>, %arg4: memref<1x8xf32, #tpu.memory_space<vmem>>, %arg5: memref<1x64x8xf32, #tpu.memory_space<vmem>>) attributes {dimension_semantics = [#tpu.dimension_semantics<parallel>], iteration_bounds = array<i64: 2>, scalar_prefetch = 0 : i64, scratch_operands = 0 : i64, tpu.core_type = #tpu.core_type<tc>, window_params = [{transform_indices = @transform_0, window_bounds = array<i64: 36, 9, 4>}, {pipeline_mode = #tpu.pipeline_mode<synchronous>, transform_indices = @transform_1, window_bounds = array<i64: 36, 8>}, {pipeline_mode = #tpu.pipeline_mode<synchronous>, transform_indices = @transform_2, window_bounds = array<i64: 1, 8>}, {pipeline_mode = #tpu.pipeline_mode<synchronous>, transform_indices = @transform_3, window_bounds = array<i64: 1, 8>}, {transform_indices = @transform_4, window_bounds = array<i64: 1, 64, 8>}]} {
    %cst = arith.constant 0.000000e+00 : f32
    %0 = vector.broadcast %cst : f32 to vector<64x8xf32>
    %c0 = arith.constant 0 : index
    %c0_0 = arith.constant 0 : index
    %1 = vector.load %arg2[%c0, %c0_0] : memref<36x8xf32, #tpu.memory_space<vmem>>, vector<4x8xf32>
    %c0_1 = arith.constant 0 : index
    %c0_2 = arith.constant 0 : index
    %c0_3 = arith.constant 0 : index
    %2 = vector.load %arg1[%c0_1, %c0_2, %c0_3] : memref<36x9x4xf32, #tpu.memory_space<vmem>>, vector<8x8x4xf32>
    %3 = vector.shape_cast %2 : vector<8x8x4xf32> to vector<64x4xf32>
    %cst_4 = arith.constant dense<0.000000e+00> : vector<64x8xf32>
    %4 = tpu.matmul %3, %1, %cst_4 {dimension_numbers = #tpu.dot_dimension_numbers<[1], [0], [0], [1], [0, 0, 1, 1], [], []>} : vector<64x4xf32>, vector<4x8xf32>, vector<64x8xf32> -> vector<64x8xf32>
    %5 = arith.addf %0, %4 : vector<64x8xf32>
    %c4 = arith.constant 4 : index
    %c0_5 = arith.constant 0 : index
    %6 = vector.load %arg2[%c4, %c0_5] : memref<36x8xf32, #tpu.memory_space<vmem>>, vector<4x8xf32>
    %c9 = arith.constant 9 : index
    %c0_6 = arith.constant 0 : index
    %c0_7 = arith.constant 0 : index
    %7 = vector.load %arg1[%c9, %c0_6, %c0_7] : memref<36x9x4xf32, #tpu.memory_space<vmem>>, vector<8x8x4xf32>
    %8 = vector.shape_cast %7 : vector<8x8x4xf32> to vector<64x4xf32>
    %cst_8 = arith.constant dense<0.000000e+00> : vector<64x8xf32>
    %9 = tpu.matmul %8, %6, %cst_8 {dimension_numbers = #tpu.dot_dimension_numbers<[1], [0], [0], [1], [0, 0, 1, 1], [], []>} : vector<64x4xf32>, vector<4x8xf32>, vector<64x8xf32> -> vector<64x8xf32>
    %10 = arith.addf %5, %9 : vector<64x8xf32>
    %c8 = arith.constant 8 : index
    %c0_9 = arith.constant 0 : index
    %11 = vector.load %arg2[%c8, %c0_9] : memref<36x8xf32, #tpu.memory_space<vmem>>, vector<4x8xf32>
    %c0_10 = arith.constant 0 : index
    %c1 = arith.constant 1 : index
    %c0_11 = arith.constant 0 : index
    %12 = vector.load %arg1[%c0_10, %c1, %c0_11] : memref<36x9x4xf32, #tpu.memory_space<vmem>>, vector<8x8x4xf32>
    %13 = vector.shape_cast %12 : vector<8x8x4xf32> to vector<64x4xf32>
    %cst_12 = arith.constant dense<0.000000e+00> : vector<64x8xf32>
    %14 = tpu.matmul %13, %11, %cst_12 {dimension_numbers = #tpu.dot_dimension_numbers<[1], [0], [0], [1], [0, 0, 1, 1], [], []>} : vector<64x4xf32>, vector<4x8xf32>, vector<64x8xf32> -> vector<64x8xf32>
    %15 = arith.addf %10, %14 : vector<64x8xf32>
    %c12 = arith.constant 12 : index
    %c0_13 = arith.constant 0 : index
    %16 = vector.load %arg2[%c12, %c0_13] : memref<36x8xf32, #tpu.memory_space<vmem>>, vector<4x8xf32>
    %c18 = arith.constant 18 : index
    %c0_14 = arith.constant 0 : index
    %c0_15 = arith.constant 0 : index
    %17 = vector.load %arg1[%c18, %c0_14, %c0_15] : memref<36x9x4xf32, #tpu.memory_space<vmem>>, vector<8x8x4xf32>
    %18 = vector.shape_cast %17 : vector<8x8x4xf32> to vector<64x4xf32>
    %cst_16 = arith.constant dense<0.000000e+00> : vector<64x8xf32>
    %19 = tpu.matmul %18, %16, %cst_16 {dimension_numbers = #tpu.dot_dimension_numbers<[1], [0], [0], [1], [0, 0, 1, 1], [], []>} : vector<64x4xf32>, vector<4x8xf32>, vector<64x8xf32> -> vector<64x8xf32>
    %20 = arith.addf %15, %19 : vector<64x8xf32>
    %c16 = arith.constant 16 : index
    %c0_17 = arith.constant 0 : index
    %21 = vector.load %arg2[%c16, %c0_17] : memref<36x8xf32, #tpu.memory_space<vmem>>, vector<4x8xf32>
    %c27 = arith.constant 27 : index
    %c0_18 = arith.constant 0 : index
    %c0_19 = arith.constant 0 : index
    %22 = vector.load %arg1[%c27, %c0_18, %c0_19] : memref<36x9x4xf32, #tpu.memory_space<vmem>>, vector<8x8x4xf32>
    %23 = vector.shape_cast %22 : vector<8x8x4xf32> to vector<64x4xf32>
    %cst_20 = arith.constant dense<0.000000e+00> : vector<64x8xf32>
    %24 = tpu.matmul %23, %21, %cst_20 {dimension_numbers = #tpu.dot_dimension_numbers<[1], [0], [0], [1], [0, 0, 1, 1], [], []>} : vector<64x4xf32>, vector<4x8xf32>, vector<64x8xf32> -> vector<64x8xf32>
    %25 = arith.addf %20, %24 : vector<64x8xf32>
    %c20 = arith.constant 20 : index
    %c0_21 = arith.constant 0 : index
    %26 = vector.load %arg2[%c20, %c0_21] : memref<36x8xf32, #tpu.memory_space<vmem>>, vector<4x8xf32>
    %c18_22 = arith.constant 18 : index
    %c1_23 = arith.constant 1 : index
    %c0_24 = arith.constant 0 : index
    %27 = vector.load %arg1[%c18_22, %c1_23, %c0_24] : memref<36x9x4xf32, #tpu.memory_space<vmem>>, vector<8x8x4xf32>
    %28 = vector.shape_cast %27 : vector<8x8x4xf32> to vector<64x4xf32>
    %cst_25 = arith.constant dense<0.000000e+00> : vector<64x8xf32>
    %29 = tpu.matmul %28, %26, %cst_25 {dimension_numbers = #tpu.dot_dimension_numbers<[1], [0], [0], [1], [0, 0, 1, 1], [], []>} : vector<64x4xf32>, vector<4x8xf32>, vector<64x8xf32> -> vector<64x8xf32>
    %30 = arith.addf %25, %29 : vector<64x8xf32>
    %c24 = arith.constant 24 : index
    %c0_26 = arith.constant 0 : index
    %31 = vector.load %arg2[%c24, %c0_26] : memref<36x8xf32, #tpu.memory_space<vmem>>, vector<4x8xf32>
    %c1_27 = arith.constant 1 : index
    %c0_28 = arith.constant 0 : index
    %c0_29 = arith.constant 0 : index
    %32 = vector.load %arg1[%c1_27, %c0_28, %c0_29] : memref<36x9x4xf32, #tpu.memory_space<vmem>>, vector<8x8x4xf32>
    %33 = vector.shape_cast %32 : vector<8x8x4xf32> to vector<64x4xf32>
    %cst_30 = arith.constant dense<0.000000e+00> : vector<64x8xf32>
    %34 = tpu.matmul %33, %31, %cst_30 {dimension_numbers = #tpu.dot_dimension_numbers<[1], [0], [0], [1], [0, 0, 1, 1], [], []>} : vector<64x4xf32>, vector<4x8xf32>, vector<64x8xf32> -> vector<64x8xf32>
    %35 = arith.addf %30, %34 : vector<64x8xf32>
    %c28 = arith.constant 28 : index
    %c0_31 = arith.constant 0 : index
    %36 = vector.load %arg2[%c28, %c0_31] : memref<36x8xf32, #tpu.memory_space<vmem>>, vector<4x8xf32>
    %c10 = arith.constant 10 : index
    %c0_32 = arith.constant 0 : index
    %c0_33 = arith.constant 0 : index
    %37 = vector.load %arg1[%c10, %c0_32, %c0_33] : memref<36x9x4xf32, #tpu.memory_space<vmem>>, vector<8x8x4xf32>
    %38 = vector.shape_cast %37 : vector<8x8x4xf32> to vector<64x4xf32>
    %cst_34 = arith.constant dense<0.000000e+00> : vector<64x8xf32>
    %39 = tpu.matmul %38, %36, %cst_34 {dimension_numbers = #tpu.dot_dimension_numbers<[1], [0], [0], [1], [0, 0, 1, 1], [], []>} : vector<64x4xf32>, vector<4x8xf32>, vector<64x8xf32> -> vector<64x8xf32>
    %40 = arith.addf %35, %39 : vector<64x8xf32>
    %c32 = arith.constant 32 : index
    %c0_35 = arith.constant 0 : index
    %41 = vector.load %arg2[%c32, %c0_35] : memref<36x8xf32, #tpu.memory_space<vmem>>, vector<4x8xf32>
    %c1_36 = arith.constant 1 : index
    %c1_37 = arith.constant 1 : index
    %c0_38 = arith.constant 0 : index
    %42 = vector.load %arg1[%c1_36, %c1_37, %c0_38] : memref<36x9x4xf32, #tpu.memory_space<vmem>>, vector<8x8x4xf32>
    %43 = vector.shape_cast %42 : vector<8x8x4xf32> to vector<64x4xf32>
    %cst_39 = arith.constant dense<0.000000e+00> : vector<64x8xf32>
    %44 = tpu.matmul %43, %41, %cst_39 {dimension_numbers = #tpu.dot_dimension_numbers<[1], [0], [0], [1], [0, 0, 1, 1], [], []>} : vector<64x4xf32>, vector<4x8xf32>, vector<64x8xf32> -> vector<64x8xf32>
    %45 = arith.addf %40, %44 : vector<64x8xf32>
    %cst_40 = arith.constant 0.000000e+00 : f32
    %46 = vector.broadcast %cst_40 : f32 to vector<64x8xf32>
    %c0_41 = arith.constant 0 : index
    %c0_42 = arith.constant 0 : index
    %47 = vector.load %arg2[%c0_41, %c0_42] : memref<36x8xf32, #tpu.memory_space<vmem>>, vector<4x8xf32>
    %cst_43 = arith.constant dense<0.000000e+00> : vector<64x8xf32>
    %48 = tpu.matmul %8, %47, %cst_43 {dimension_numbers = #tpu.dot_dimension_numbers<[1], [0], [0], [1], [0, 0, 1, 1], [], []>} : vector<64x4xf32>, vector<4x8xf32>, vector<64x8xf32> -> vector<64x8xf32>
    %49 = arith.addf %46, %48 : vector<64x8xf32>
    %c4_44 = arith.constant 4 : index
    %c0_45 = arith.constant 0 : index
    %50 = vector.load %arg2[%c4_44, %c0_45] : memref<36x8xf32, #tpu.memory_space<vmem>>, vector<4x8xf32>
    %cst_46 = arith.constant dense<0.000000e+00> : vector<64x8xf32>
    %51 = tpu.matmul %13, %50, %cst_46 {dimension_numbers = #tpu.dot_dimension_numbers<[1], [0], [0], [1], [0, 0, 1, 1], [], []>} : vector<64x4xf32>, vector<4x8xf32>, vector<64x8xf32> -> vector<64x8xf32>
    %52 = arith.addf %49, %51 : vector<64x8xf32>
    %c8_47 = arith.constant 8 : index
    %c0_48 = arith.constant 0 : index
    %53 = vector.load %arg2[%c8_47, %c0_48] : memref<36x8xf32, #tpu.memory_space<vmem>>, vector<4x8xf32>
    %c9_49 = arith.constant 9 : index
    %c1_50 = arith.constant 1 : index
    %c0_51 = arith.constant 0 : index
    %54 = vector.load %arg1[%c9_49, %c1_50, %c0_51] : memref<36x9x4xf32, #tpu.memory_space<vmem>>, vector<8x8x4xf32>
    %55 = vector.shape_cast %54 : vector<8x8x4xf32> to vector<64x4xf32>
    %cst_52 = arith.constant dense<0.000000e+00> : vector<64x8xf32>
    %56 = tpu.matmul %55, %53, %cst_52 {dimension_numbers = #tpu.dot_dimension_numbers<[1], [0], [0], [1], [0, 0, 1, 1], [], []>} : vector<64x4xf32>, vector<4x8xf32>, vector<64x8xf32> -> vector<64x8xf32>
    %57 = arith.addf %52, %56 : vector<64x8xf32>
    %c12_53 = arith.constant 12 : index
    %c0_54 = arith.constant 0 : index
    %58 = vector.load %arg2[%c12_53, %c0_54] : memref<36x8xf32, #tpu.memory_space<vmem>>, vector<4x8xf32>
    %cst_55 = arith.constant dense<0.000000e+00> : vector<64x8xf32>
    %59 = tpu.matmul %23, %58, %cst_55 {dimension_numbers = #tpu.dot_dimension_numbers<[1], [0], [0], [1], [0, 0, 1, 1], [], []>} : vector<64x4xf32>, vector<4x8xf32>, vector<64x8xf32> -> vector<64x8xf32>
    %60 = arith.addf %57, %59 : vector<64x8xf32>
    %c16_56 = arith.constant 16 : index
    %c0_57 = arith.constant 0 : index
    %61 = vector.load %arg2[%c16_56, %c0_57] : memref<36x8xf32, #tpu.memory_space<vmem>>, vector<4x8xf32>
    %cst_58 = arith.constant dense<0.000000e+00> : vector<64x8xf32>
    %62 = tpu.matmul %28, %61, %cst_58 {dimension_numbers = #tpu.dot_dimension_numbers<[1], [0], [0], [1], [0, 0, 1, 1], [], []>} : vector<64x4xf32>, vector<4x8xf32>, vector<64x8xf32> -> vector<64x8xf32>
    %63 = arith.addf %60, %62 : vector<64x8xf32>
    %c20_59 = arith.constant 20 : index
    %c0_60 = arith.constant 0 : index
    %64 = vector.load %arg2[%c20_59, %c0_60] : memref<36x8xf32, #tpu.memory_space<vmem>>, vector<4x8xf32>
    %c27_61 = arith.constant 27 : index
    %c1_62 = arith.constant 1 : index
    %c0_63 = arith.constant 0 : index
    %65 = vector.load %arg1[%c27_61, %c1_62, %c0_63] : memref<36x9x4xf32, #tpu.memory_space<vmem>>, vector<8x8x4xf32>
    %66 = vector.shape_cast %65 : vector<8x8x4xf32> to vector<64x4xf32>
    %cst_64 = arith.constant dense<0.000000e+00> : vector<64x8xf32>
    %67 = tpu.matmul %66, %64, %cst_64 {dimension_numbers = #tpu.dot_dimension_numbers<[1], [0], [0], [1], [0, 0, 1, 1], [], []>} : vector<64x4xf32>, vector<4x8xf32>, vector<64x8xf32> -> vector<64x8xf32>
    %68 = arith.addf %63, %67 : vector<64x8xf32>
    %c24_65 = arith.constant 24 : index
    %c0_66 = arith.constant 0 : index
    %69 = vector.load %arg2[%c24_65, %c0_66] : memref<36x8xf32, #tpu.memory_space<vmem>>, vector<4x8xf32>
    %cst_67 = arith.constant dense<0.000000e+00> : vector<64x8xf32>
    %70 = tpu.matmul %38, %69, %cst_67 {dimension_numbers = #tpu.dot_dimension_numbers<[1], [0], [0], [1], [0, 0, 1, 1], [], []>} : vector<64x4xf32>, vector<4x8xf32>, vector<64x8xf32> -> vector<64x8xf32>
    %71 = arith.addf %68, %70 : vector<64x8xf32>
    %c28_68 = arith.constant 28 : index
    %c0_69 = arith.constant 0 : index
    %72 = vector.load %arg2[%c28_68, %c0_69] : memref<36x8xf32, #tpu.memory_space<vmem>>, vector<4x8xf32>
    %cst_70 = arith.constant dense<0.000000e+00> : vector<64x8xf32>
    %73 = tpu.matmul %43, %72, %cst_70 {dimension_numbers = #tpu.dot_dimension_numbers<[1], [0], [0], [1], [0, 0, 1, 1], [], []>} : vector<64x4xf32>, vector<4x8xf32>, vector<64x8xf32> -> vector<64x8xf32>
    %74 = arith.addf %71, %73 : vector<64x8xf32>
    %c32_71 = arith.constant 32 : index
    %c0_72 = arith.constant 0 : index
    %75 = vector.load %arg2[%c32_71, %c0_72] : memref<36x8xf32, #tpu.memory_space<vmem>>, vector<4x8xf32>
    %c10_73 = arith.constant 10 : index
    %c1_74 = arith.constant 1 : index
    %c0_75 = arith.constant 0 : index
    %76 = vector.load %arg1[%c10_73, %c1_74, %c0_75] : memref<36x9x4xf32, #tpu.memory_space<vmem>>, vector<8x8x4xf32>
    %77 = vector.shape_cast %76 : vector<8x8x4xf32> to vector<64x4xf32>
    %cst_76 = arith.constant dense<0.000000e+00> : vector<64x8xf32>
    %78 = tpu.matmul %77, %75, %cst_76 {dimension_numbers = #tpu.dot_dimension_numbers<[1], [0], [0], [1], [0, 0, 1, 1], [], []>} : vector<64x4xf32>, vector<4x8xf32>, vector<64x8xf32> -> vector<64x8xf32>
    %79 = arith.addf %74, %78 : vector<64x8xf32>
    %cst_77 = arith.constant 0.000000e+00 : f32
    %80 = vector.broadcast %cst_77 : f32 to vector<64x8xf32>
    %c0_78 = arith.constant 0 : index
    %c0_79 = arith.constant 0 : index
    %81 = vector.load %arg2[%c0_78, %c0_79] : memref<36x8xf32, #tpu.memory_space<vmem>>, vector<4x8xf32>
    %cst_80 = arith.constant dense<0.000000e+00> : vector<64x8xf32>
    %82 = tpu.matmul %18, %81, %cst_80 {dimension_numbers = #tpu.dot_dimension_numbers<[1], [0], [0], [1], [0, 0, 1, 1], [], []>} : vector<64x4xf32>, vector<4x8xf32>, vector<64x8xf32> -> vector<64x8xf32>
    %83 = arith.addf %80, %82 : vector<64x8xf32>
    %c4_81 = arith.constant 4 : index
    %c0_82 = arith.constant 0 : index
    %84 = vector.load %arg2[%c4_81, %c0_82] : memref<36x8xf32, #tpu.memory_space<vmem>>, vector<4x8xf32>
    %cst_83 = arith.constant dense<0.000000e+00> : vector<64x8xf32>
    %85 = tpu.matmul %23, %84, %cst_83 {dimension_numbers = #tpu.dot_dimension_numbers<[1], [0], [0], [1], [0, 0, 1, 1], [], []>} : vector<64x4xf32>, vector<4x8xf32>, vector<64x8xf32> -> vector<64x8xf32>
    %86 = arith.addf %83, %85 : vector<64x8xf32>
    %c8_84 = arith.constant 8 : index
    %c0_85 = arith.constant 0 : index
    %87 = vector.load %arg2[%c8_84, %c0_85] : memref<36x8xf32, #tpu.memory_space<vmem>>, vector<4x8xf32>
    %cst_86 = arith.constant dense<0.000000e+00> : vector<64x8xf32>
    %88 = tpu.matmul %28, %87, %cst_86 {dimension_numbers = #tpu.dot_dimension_numbers<[1], [0], [0], [1], [0, 0, 1, 1], [], []>} : vector<64x4xf32>, vector<4x8xf32>, vector<64x8xf32> -> vector<64x8xf32>
    %89 = arith.addf %86, %88 : vector<64x8xf32>
    %c12_87 = arith.constant 12 : index
    %c0_88 = arith.constant 0 : index
    %90 = vector.load %arg2[%c12_87, %c0_88] : memref<36x8xf32, #tpu.memory_space<vmem>>, vector<4x8xf32>
    %cst_89 = arith.constant dense<0.000000e+00> : vector<64x8xf32>
    %91 = tpu.matmul %33, %90, %cst_89 {dimension_numbers = #tpu.dot_dimension_numbers<[1], [0], [0], [1], [0, 0, 1, 1], [], []>} : vector<64x4xf32>, vector<4x8xf32>, vector<64x8xf32> -> vector<64x8xf32>
    %92 = arith.addf %89, %91 : vector<64x8xf32>
    %c16_90 = arith.constant 16 : index
    %c0_91 = arith.constant 0 : index
    %93 = vector.load %arg2[%c16_90, %c0_91] : memref<36x8xf32, #tpu.memory_space<vmem>>, vector<4x8xf32>
    %cst_92 = arith.constant dense<0.000000e+00> : vector<64x8xf32>
    %94 = tpu.matmul %38, %93, %cst_92 {dimension_numbers = #tpu.dot_dimension_numbers<[1], [0], [0], [1], [0, 0, 1, 1], [], []>} : vector<64x4xf32>, vector<4x8xf32>, vector<64x8xf32> -> vector<64x8xf32>
    %95 = arith.addf %92, %94 : vector<64x8xf32>
    %c20_93 = arith.constant 20 : index
    %c0_94 = arith.constant 0 : index
    %96 = vector.load %arg2[%c20_93, %c0_94] : memref<36x8xf32, #tpu.memory_space<vmem>>, vector<4x8xf32>
    %cst_95 = arith.constant dense<0.000000e+00> : vector<64x8xf32>
    %97 = tpu.matmul %43, %96, %cst_95 {dimension_numbers = #tpu.dot_dimension_numbers<[1], [0], [0], [1], [0, 0, 1, 1], [], []>} : vector<64x4xf32>, vector<4x8xf32>, vector<64x8xf32> -> vector<64x8xf32>
    %98 = arith.addf %95, %97 : vector<64x8xf32>
    %c24_96 = arith.constant 24 : index
    %c0_97 = arith.constant 0 : index
    %99 = vector.load %arg2[%c24_96, %c0_97] : memref<36x8xf32, #tpu.memory_space<vmem>>, vector<4x8xf32>
    %c19 = arith.constant 19 : index
    %c0_98 = arith.constant 0 : index
    %c0_99 = arith.constant 0 : index
    %100 = vector.load %arg1[%c19, %c0_98, %c0_99] : memref<36x9x4xf32, #tpu.memory_space<vmem>>, vector<8x8x4xf32>
    %101 = vector.shape_cast %100 : vector<8x8x4xf32> to vector<64x4xf32>
    %cst_100 = arith.constant dense<0.000000e+00> : vector<64x8xf32>
    %102 = tpu.matmul %101, %99, %cst_100 {dimension_numbers = #tpu.dot_dimension_numbers<[1], [0], [0], [1], [0, 0, 1, 1], [], []>} : vector<64x4xf32>, vector<4x8xf32>, vector<64x8xf32> -> vector<64x8xf32>
    %103 = arith.addf %98, %102 : vector<64x8xf32>
    %c28_101 = arith.constant 28 : index
    %c0_102 = arith.constant 0 : index
    %104 = vector.load %arg2[%c28_101, %c0_102] : memref<36x8xf32, #tpu.memory_space<vmem>>, vector<4x8xf32>
    %c28_103 = arith.constant 28 : index
    %c0_104 = arith.constant 0 : index
    %c0_105 = arith.constant 0 : index
    %105 = vector.load %arg1[%c28_103, %c0_104, %c0_105] : memref<36x9x4xf32, #tpu.memory_space<vmem>>, vector<8x8x4xf32>
    %106 = vector.shape_cast %105 : vector<8x8x4xf32> to vector<64x4xf32>
    %cst_106 = arith.constant dense<0.000000e+00> : vector<64x8xf32>
    %107 = tpu.matmul %106, %104, %cst_106 {dimension_numbers = #tpu.dot_dimension_numbers<[1], [0], [0], [1], [0, 0, 1, 1], [], []>} : vector<64x4xf32>, vector<4x8xf32>, vector<64x8xf32> -> vector<64x8xf32>
    %108 = arith.addf %103, %107 : vector<64x8xf32>
    %c32_107 = arith.constant 32 : index
    %c0_108 = arith.constant 0 : index
    %109 = vector.load %arg2[%c32_107, %c0_108] : memref<36x8xf32, #tpu.memory_space<vmem>>, vector<4x8xf32>
    %c19_109 = arith.constant 19 : index
    %c1_110 = arith.constant 1 : index
    %c0_111 = arith.constant 0 : index
    %110 = vector.load %arg1[%c19_109, %c1_110, %c0_111] : memref<36x9x4xf32, #tpu.memory_space<vmem>>, vector<8x8x4xf32>
    %111 = vector.shape_cast %110 : vector<8x8x4xf32> to vector<64x4xf32>
    %cst_112 = arith.constant dense<0.000000e+00> : vector<64x8xf32>
    %112 = tpu.matmul %111, %109, %cst_112 {dimension_numbers = #tpu.dot_dimension_numbers<[1], [0], [0], [1], [0, 0, 1, 1], [], []>} : vector<64x4xf32>, vector<4x8xf32>, vector<64x8xf32> -> vector<64x8xf32>
    %113 = arith.addf %108, %112 : vector<64x8xf32>
    %cst_113 = arith.constant 0.000000e+00 : f32
    %114 = vector.broadcast %cst_113 : f32 to vector<64x8xf32>
    %c0_114 = arith.constant 0 : index
    %c0_115 = arith.constant 0 : index
    %115 = vector.load %arg2[%c0_114, %c0_115] : memref<36x8xf32, #tpu.memory_space<vmem>>, vector<4x8xf32>
    %cst_116 = arith.constant dense<0.000000e+00> : vector<64x8xf32>
    %116 = tpu.matmul %23, %115, %cst_116 {dimension_numbers = #tpu.dot_dimension_numbers<[1], [0], [0], [1], [0, 0, 1, 1], [], []>} : vector<64x4xf32>, vector<4x8xf32>, vector<64x8xf32> -> vector<64x8xf32>
    %117 = arith.addf %114, %116 : vector<64x8xf32>
    %c4_117 = arith.constant 4 : index
    %c0_118 = arith.constant 0 : index
    %118 = vector.load %arg2[%c4_117, %c0_118] : memref<36x8xf32, #tpu.memory_space<vmem>>, vector<4x8xf32>
    %cst_119 = arith.constant dense<0.000000e+00> : vector<64x8xf32>
    %119 = tpu.matmul %28, %118, %cst_119 {dimension_numbers = #tpu.dot_dimension_numbers<[1], [0], [0], [1], [0, 0, 1, 1], [], []>} : vector<64x4xf32>, vector<4x8xf32>, vector<64x8xf32> -> vector<64x8xf32>
    %120 = arith.addf %117, %119 : vector<64x8xf32>
    %c8_120 = arith.constant 8 : index
    %c0_121 = arith.constant 0 : index
    %121 = vector.load %arg2[%c8_120, %c0_121] : memref<36x8xf32, #tpu.memory_space<vmem>>, vector<4x8xf32>
    %cst_122 = arith.constant dense<0.000000e+00> : vector<64x8xf32>
    %122 = tpu.matmul %66, %121, %cst_122 {dimension_numbers = #tpu.dot_dimension_numbers<[1], [0], [0], [1], [0, 0, 1, 1], [], []>} : vector<64x4xf32>, vector<4x8xf32>, vector<64x8xf32> -> vector<64x8xf32>
    %123 = arith.addf %120, %122 : vector<64x8xf32>
    %c12_123 = arith.constant 12 : index
    %c0_124 = arith.constant 0 : index
    %124 = vector.load %arg2[%c12_123, %c0_124] : memref<36x8xf32, #tpu.memory_space<vmem>>, vector<4x8xf32>
    %cst_125 = arith.constant dense<0.000000e+00> : vector<64x8xf32>
    %125 = tpu.matmul %38, %124, %cst_125 {dimension_numbers = #tpu.dot_dimension_numbers<[1], [0], [0], [1], [0, 0, 1, 1], [], []>} : vector<64x4xf32>, vector<4x8xf32>, vector<64x8xf32> -> vector<64x8xf32>
    %126 = arith.addf %123, %125 : vector<64x8xf32>
    %c16_126 = arith.constant 16 : index
    %c0_127 = arith.constant 0 : index
    %127 = vector.load %arg2[%c16_126, %c0_127] : memref<36x8xf32, #tpu.memory_space<vmem>>, vector<4x8xf32>
    %cst_128 = arith.constant dense<0.000000e+00> : vector<64x8xf32>
    %128 = tpu.matmul %43, %127, %cst_128 {dimension_numbers = #tpu.dot_dimension_numbers<[1], [0], [0], [1], [0, 0, 1, 1], [], []>} : vector<64x4xf32>, vector<4x8xf32>, vector<64x8xf32> -> vector<64x8xf32>
    %129 = arith.addf %126, %128 : vector<64x8xf32>
    %c20_129 = arith.constant 20 : index
    %c0_130 = arith.constant 0 : index
    %130 = vector.load %arg2[%c20_129, %c0_130] : memref<36x8xf32, #tpu.memory_space<vmem>>, vector<4x8xf32>
    %cst_131 = arith.constant dense<0.000000e+00> : vector<64x8xf32>
    %131 = tpu.matmul %77, %130, %cst_131 {dimension_numbers = #tpu.dot_dimension_numbers<[1], [0], [0], [1], [0, 0, 1, 1], [], []>} : vector<64x4xf32>, vector<4x8xf32>, vector<64x8xf32> -> vector<64x8xf32>
    %132 = arith.addf %129, %131 : vector<64x8xf32>
    %c24_132 = arith.constant 24 : index
    %c0_133 = arith.constant 0 : index
    %133 = vector.load %arg2[%c24_132, %c0_133] : memref<36x8xf32, #tpu.memory_space<vmem>>, vector<4x8xf32>
    %cst_134 = arith.constant dense<0.000000e+00> : vector<64x8xf32>
    %134 = tpu.matmul %106, %133, %cst_134 {dimension_numbers = #tpu.dot_dimension_numbers<[1], [0], [0], [1], [0, 0, 1, 1], [], []>} : vector<64x4xf32>, vector<4x8xf32>, vector<64x8xf32> -> vector<64x8xf32>
    %135 = arith.addf %132, %134 : vector<64x8xf32>
    %c28_135 = arith.constant 28 : index
    %c0_136 = arith.constant 0 : index
    %136 = vector.load %arg2[%c28_135, %c0_136] : memref<36x8xf32, #tpu.memory_space<vmem>>, vector<4x8xf32>
    %cst_137 = arith.constant dense<0.000000e+00> : vector<64x8xf32>
    %137 = tpu.matmul %111, %136, %cst_137 {dimension_numbers = #tpu.dot_dimension_numbers<[1], [0], [0], [1], [0, 0, 1, 1], [], []>} : vector<64x4xf32>, vector<4x8xf32>, vector<64x8xf32> -> vector<64x8xf32>
    %138 = arith.addf %135, %137 : vector<64x8xf32>
    %c32_138 = arith.constant 32 : index
    %c0_139 = arith.constant 0 : index
    %139 = vector.load %arg2[%c32_138, %c0_139] : memref<36x8xf32, #tpu.memory_space<vmem>>, vector<4x8xf32>
    %c28_140 = arith.constant 28 : index
    %c1_141 = arith.constant 1 : index
    %c0_142 = arith.constant 0 : index
    %140 = vector.load %arg1[%c28_140, %c1_141, %c0_142] : memref<36x9x4xf32, #tpu.memory_space<vmem>>, vector<8x8x4xf32>
    %141 = vector.shape_cast %140 : vector<8x8x4xf32> to vector<64x4xf32>
    %cst_143 = arith.constant dense<0.000000e+00> : vector<64x8xf32>
    %142 = tpu.matmul %141, %139, %cst_143 {dimension_numbers = #tpu.dot_dimension_numbers<[1], [0], [0], [1], [0, 0, 1, 1], [], []>} : vector<64x4xf32>, vector<4x8xf32>, vector<64x8xf32> -> vector<64x8xf32>
    %143 = arith.addf %138, %142 : vector<64x8xf32>
    %c0_144 = arith.constant 0 : index
    %c0_145 = arith.constant 0 : index
    %144 = vector.load %arg3[%c0_144, %c0_145] : memref<1x8xf32, #tpu.memory_space<vmem>>, vector<1x8xf32>
    %c0_146 = arith.constant 0 : index
    %c0_147 = arith.constant 0 : index
    %145 = vector.load %arg4[%c0_146, %c0_147] : memref<1x8xf32, #tpu.memory_space<vmem>>, vector<1x8xf32>
    %146 = vector.broadcast %144 : vector<1x8xf32> to vector<64x8xf32>
    %147 = arith.mulf %45, %146 : vector<64x8xf32>
    %148 = vector.broadcast %145 : vector<1x8xf32> to vector<64x8xf32>
    %149 = arith.addf %147, %148 : vector<64x8xf32>
    %150 = vector.broadcast %144 : vector<1x8xf32> to vector<64x8xf32>
    %151 = arith.mulf %79, %150 : vector<64x8xf32>
    %152 = vector.broadcast %145 : vector<1x8xf32> to vector<64x8xf32>
    %153 = arith.addf %151, %152 : vector<64x8xf32>
    %154 = arith.maximumf %149, %153 : vector<64x8xf32>
    %155 = vector.broadcast %144 : vector<1x8xf32> to vector<64x8xf32>
    %156 = arith.mulf %113, %155 : vector<64x8xf32>
    %157 = vector.broadcast %145 : vector<1x8xf32> to vector<64x8xf32>
    %158 = arith.addf %156, %157 : vector<64x8xf32>
    %159 = arith.maximumf %154, %158 : vector<64x8xf32>
    %160 = vector.broadcast %144 : vector<1x8xf32> to vector<64x8xf32>
    %161 = arith.mulf %143, %160 : vector<64x8xf32>
    %162 = vector.broadcast %145 : vector<1x8xf32> to vector<64x8xf32>
    %163 = arith.addf %161, %162 : vector<64x8xf32>
    %164 = arith.maximumf %159, %163 : vector<64x8xf32>
    %cst_148 = arith.constant 0.000000e+00 : f32
    %165 = vector.broadcast %cst_148 : f32 to vector<64x8xf32>
    %166 = arith.maximumf %164, %165 : vector<64x8xf32>
    %c0_149 = arith.constant 0 : index
    %c0_150 = arith.constant 0 : index
    %c0_151 = arith.constant 0 : index
    %167 = vector.load %arg5[%c0_149, %c0_150, %c0_151] : memref<1x64x8xf32, #tpu.memory_space<vmem>>, vector<1x64x8xf32>
    %168 = vector.shape_cast %167 : vector<1x64x8xf32> to vector<64x8xf32>
    %169 = vector.shape_cast %166 : vector<64x8xf32> to vector<1x64x8xf32>
    tpu.vector_store %arg5[%c0_149, %c0_150, %c0_151], %169 {strides = array<i32>} : memref<1x64x8xf32, #tpu.memory_space<vmem>>, vector<1x64x8xf32>,
    return
  }
  func.func @transform_0(%arg0: i32) -> (i32, i32, i32) {
    %c0_i32 = arith.constant 0 : i32
    %c0_i32_0 = arith.constant 0 : i32
    %c0_i32_1 = arith.constant 0 : i32
    return %arg0, %c0_i32, %c0_i32_0 : i32, i32, i32
  }
  func.func @transform_1(%arg0: i32) -> (i32, i32) {
    %c0_i32 = arith.constant 0 : i32
    %c0_i32_0 = arith.constant 0 : i32
    %c0_i32_1 = arith.constant 0 : i32
    return %c0_i32, %c0_i32_0 : i32, i32
  }
  func.func @transform_2(%arg0: i32) -> (i32, i32) {
    %c0_i32 = arith.constant 0 : i32
    %c0_i32_0 = arith.constant 0 : i32
    %c0_i32_1 = arith.constant 0 : i32
    return %c0_i32, %c0_i32_0 : i32, i32
  }
  func.func @transform_3(%arg0: i32) -> (i32, i32) {
    %c0_i32 = arith.constant 0 : i32
    %c0_i32_0 = arith.constant 0 : i32
    %c0_i32_1 = arith.constant 0 : i32
    return %c0_i32, %c0_i32_0 : i32, i32
  }
  func.func @transform_4(%arg0: i32) -> (i32, i32, i32) {
    %c0_i32 = arith.constant 0 : i32
    %c0_i32_0 = arith.constant 0 : i32
    %c0_i32_1 = arith.constant 0 : i32
    return %arg0, %c0_i32, %c0_i32_0 : i32, i32, i32
  }
}

</mosaic_0001>

<bundles_post_ra>
// kernel: conv2d_block_forward.3
= control target key start
LH: loop header
LB: loop body
LE: loop exit
PB: predicated region body
PF: predicated region fallthrough
CT: control target
= control target key end

     0   :  { %s6514_s15 = smov 0   ;;  %s7650_s0 = inlined_call_operand.vmem [shape: f32[72,9,4], index: 0, kind: input, shape index: {}]   ;;  %s7651_s1 = inlined_call_operand.vmem [shape: f32[36,8], index: 1, kind: input, shape index: {}]   ;;  %s7652_s2 = inlined_call_operand.vmem [shape: f32[1,8], index: 2, kind: input, shape index: {}]   ;;  %s7653_s3 = inlined_call_operand.vmem [shape: f32[1,8], index: 3, kind: input, shape index: {}]   ;;  %s7654_s4 = inlined_call_operand.vmem [shape: f32[2,64,8], index: 4, kind: output, shape index: {}]  }
   0x1 LB: > { %s6520_s16 = sadd.s32 4294967295, %s6487_s15   ;;  %p4942_p0 = scmp.ge.s32.totalorder %s6487_s15, 1  ;;  %s6487_s15 = sphi %s6514_s15, %s14_s15  }
   0x2   : > { %p164_p1 = scmp.lt.s32.totalorder %s6487_s15, 3 }
   0x4   : > { %p165_p2 = pnand %p4942_p0, %p164_p1 }
   0x6   : > { %168 = sbr.rel (%p165_p2) target bundleno = 530 (0x212), region = 36 }
   0xd   : > { %v6527_v0 = vld [vmem:[%s7651_s1 + $0x4] sm:$0xf]  ;;  %vm247_vm0 = vcmask 1043456   ;;  %s191_s19 = smul.u32 36, %s6520_s16  ;;  %v6537_v1 = vld [vmem:[%s7651_s1] sm:$0xf] }
   0xe   : > { %5713 = vmatprep.subr.msk.mxu0 %vm247_vm0, %v6527_v0  ;;  %5839 = vmatprep.subr.msk.mxu1 %vm247_vm0, %v6527_v0  ;;  %vm222_vm1 = vcmask 31744   ;;  %v6578_v8 = vld [vmem:[%s7651_s1 + $0x8] sm:$0xf]  ;;  %v6658_v22 = vld [vmem:[%s7651_s1 + $0xc] sm:$0xf]  ;;  %p198_p4 = scmp.lt.s32.totalorder %s6520_s16, 1 }
   0xf   : > { %5714 = vmatpush3.msk.msra.mxu0 %vm247_vm0, %v6527_v0  ;;  %p192_p3 = scmp.lt.s32.totalorder %s191_s19, 71  ;;  %5840 = vmatpush3.msk.msra.mxu1 %vm247_vm0, %v6527_v0  ;;  %v6724_v31 = vld [vmem:[%s7651_s1 + $0x10] sm:$0xf]  ;;  %v6802_v43 = vld [vmem:[%s7651_s1 + $0x14] sm:$0xf]  ;;  %vm4874_vm2 = vcmask 64512  }
  0x10   : > { %5727 = vmatprep.subr.msk.mxu0 %vm247_vm0, %v6537_v1  ;;  %5853 = vmatprep.subr.msk.mxu1 %vm247_vm0, %v6537_v1  ;;  %7671 = vst [vmem:[#allocation3_spill] sm:$0xff] %v6724_v31  ;;  %7672 = vst [vmem:[#allocation4_spill] sm:$0xff] %v6802_v43  ;;  %v6886_v57 = vld [vmem:[%s7651_s1 + $0x18] sm:$0xf]  ;;  %s7689_s16 = smov (!%p198_p4, %s6520_s16), 1 }
  0x11   : > { %s7687_s19 = smov (!%p192_p3, %s191_s19), 71  ;;  %7673 = vst [vmem:[#allocation5_spill] sm:$0xff] %v6886_v57  ;;  %s5388_s20 = sshll.u32 %s7689_s16, 6 }
  0x12   : > { %s5387_s22 = sshll.u32 %s7687_s19, 4 }
  0x13   : > { %s6550_s25 = scalar_lea.vmem %s7650_s0, %s5387_s22  ;;  %s7592_s22 = scalar_lea.vmem %s7654_s4, %s5388_s20 }
  0x14   : > { %v4947_v2 = vld [vmem:[%s6550_s25 + $0x90] sm:$0xff]  ;;  %v6554_v3 = vld [vmem:[%s6550_s25 + $0x1] sm:$0xff] }
  0x15   : > { %v6557_v4 = vld [vmem:[%s6550_s25 + $0xa0] sm:$0xff]  ;;  %5715 = vmatprep.mubr.msk.f32.mxu0 %vm222_vm1, %v4947_v2  ;;  %5841 = vmatprep.mubr.msk.f32.mxu1 %vm222_vm1, %v6554_v3  ;;  %v6563_v5 = vld [vmem:[%s6550_s25 + $0x11] sm:$0xff] }
  0x16   : > { %v6566_v6 = vld [vmem:[%s6550_s25 + $0xb0] sm:$0xff]  ;;  %v6569_v7 = vld [vmem:[%s6550_s25 + $0x21] sm:$0xff]  ;;  %5716 = vmatmul.mubr.msk.f32.vlgmr.msra.gmra.mrb[0].mxu0 %vm222_vm1, %v6557_v4  ;;  %5842 = vmatmul.mubr.msk.f32.vlgmr.msra.gmra.mrb[0].mxu1 %vm222_vm1, %v6563_v5 }
  0x17   : > { %5728 = vmatpush3.msk.msra.mxu0 %vm247_vm0, %v6537_v1  ;;  %5854 = vmatpush3.msk.msra.mxu1 %vm247_vm0, %v6537_v1  ;;  %v6585_v9 = vld [vmem:[%s6550_s25 + $0xc0] sm:$0xff]  ;;  %v6588_v10 = vld [vmem:[%s6550_s25 + $0x31] sm:$0xff] }
  0x18   : > { %5718 = vmatprep.mubr.msk.f32.mxu0 %vm222_vm1, %v6566_v6  ;;  %5844 = vmatprep.mubr.msk.f32.mxu1 %vm222_vm1, %v6569_v7  ;;  %v6595_v11 = vld [vmem:[%s6550_s25 + $0xd0] sm:$0xff]  ;;  %v6598_v12 = vld [vmem:[%s6550_s25 + $0x41] sm:$0xff] }
  0x19   : > { %5741 = vmatprep.subr.msk.mxu0 %vm247_vm0, %v6578_v8  ;;  %5867 = vmatprep.subr.msk.mxu1 %vm247_vm0, %v6578_v8  ;;  %v6613_v13 = vld [vmem:[%s6550_s25 + $0xe0] sm:$0xff]  ;;  %v6616_v14 = vld [vmem:[%s6550_s25 + $0x51] sm:$0xff] }
  0x1a   : > { %5719 = vmatmul.mubr.msk.f32.gmra.mrb[2].mxu0 %vm222_vm1, %v6585_v9  ;;  %5845 = vmatmul.mubr.msk.f32.gmra.mrb[2].mxu1 %vm222_vm1, %v6588_v10  ;;  %v6619_v15 = vld [vmem:[%s6550_s25 + $0xf0] sm:$0xff]  ;;  %v6622_v16 = vld [vmem:[%s6550_s25 + $0x61] sm:$0xff] }
  0x1b   : > { %5721 = vmatprep.mubr.msk.f32.mxu0 %vm222_vm1, %v6595_v11  ;;  %5847 = vmatprep.mubr.msk.f32.mxu1 %vm222_vm1, %v6598_v12  ;;  %v6633_v17 = vld [vmem:[%s6550_s25 + $0x100] sm:$0xff]  ;;  %v6636_v18 = vld [vmem:[%s6550_s25 + $0x71] sm:$0xff] }
  0x1c   : > { %v204_v19 = vld [vmem:[%s6550_s25] sm:$0xff]  ;;  %v6646_v20 = vld [vmem:[%s6550_s25 + $0x10] sm:$0xff] }
  0x1d   : > { %v6649_v21 = vld [vmem:[%s6550_s25 + $0x20] sm:$0xff]  ;;  %v6665_v23 = vld [vmem:[%s6550_s25 + $0x30] sm:$0xff] }
  0x1e   : > { %5722 = vmatmul.mubr.msk.f32.gmra.mrb[4].mxu0 %vm222_vm1, %v6613_v13  ;;  %5848 = vmatmul.mubr.msk.f32.gmra.mrb[4].mxu1 %vm222_vm1, %v6616_v14  ;;  %v6672_v24 = vld [vmem:[%s6550_s25 + $0x40] sm:$0xff]  ;;  %v6687_v25 = vld [vmem:[%s6550_s25 + $0x50] sm:$0xff] }
  0x1f   : > { %5724 = vmatprep.mubr.msk.f32.mxu0 %vm222_vm1, %v6619_v15  ;;  %5850 = vmatprep.mubr.msk.f32.mxu1 %vm222_vm1, %v6622_v16  ;;  %7670 = vst [vmem:[#allocation2_spill] sm:$0xff] %v6672_v24  ;;  %v6690_v26 = vld [vmem:[%s6550_s25 + $0x60] sm:$0xff]  ;;  %v6701_v27 = vld [vmem:[%s6550_s25 + $0x70] sm:$0xff] }
  0x20   : > { %v5102_v28 = vld [vmem:[%s6550_s25 + $0x91] sm:$0xff]  ;;  %v6712_v29 = vld [vmem:[%s6550_s25 + $0xa1] sm:$0xff] }
  0x21   : > { %v6715_v30 = vld [vmem:[%s6550_s25 + $0xb1] sm:$0xff]  ;;  %v6731_v32 = vld [vmem:[%s6550_s25 + $0xc1] sm:$0xff] }
  0x22   : > { %5725 = vmatmul.mubr.msk.f32.gmra.mrb[6].mxu0 %vm222_vm1, %v6633_v17  ;;  %5851 = vmatmul.mubr.msk.f32.gmra.mrb[6].mxu1 %vm222_vm1, %v6636_v18  ;;  %v6738_v33 = vld [vmem:[%s6550_s25 + $0xd1] sm:$0xff]  ;;  %v6753_v34 = vld [vmem:[%s6550_s25 + $0xe1] sm:$0xff] }
  0x23   : > { %5729 = vmatprep.mubr.msk.f32.mxu0 %vm222_vm1, %v204_v19  ;;  %5855 = vmatprep.mubr.msk.f32.mxu1 %vm222_vm1, %v4947_v2  ;;  %v6756_v35 = vld [vmem:[%s6550_s25 + $0xf1] sm:$0xff]  ;;  %v6767_v36 = vld [vmem:[%s6550_s25 + $0x101] sm:$0xff]  ;;  %v6955_v19 = vld [vmem:[%s7651_s1 + $0x1c] sm:$0xf] }
  0x24   : > { %v6770_v37 = vld [vmem:[%s6550_s25 + $0x120] sm:$0xff]  ;;  %v6773_v38 = vld [vmem:[%s6550_s25 + $0x1b0] sm:$0xff]  ;;  %7674 = vst [vmem:[#allocation6_spill] sm:$0xff] %v6955_v19 }
  0x25   : > { %v6784_v39 = vld [vmem:[%s6550_s25 + $0x130] sm:$0xff]  ;;  %v6787_v40 = vld [vmem:[%s6550_s25 + $0x1c0] sm:$0xff] }
  0x26   : > { %5730 = vmatmul.mubr.msk.f32.vlgmr.msra.gmra.mrb[0].mxu0 %vm222_vm1, %v6646_v20  ;;  %5856 = vmatmul.mubr.msk.f32.vlgmr.msra.gmra.mrb[0].mxu1 %vm222_vm1, %v6557_v4  ;;  %v6790_v41 = vld [vmem:[%s6550_s25 + $0x140] sm:$0xff]  ;;  %v6793_v42 = vld [vmem:[%s6550_s25 + $0x1d0] sm:$0xff] }
  0x27   : > { %5742 = vmatpush3.msk.msra.mxu0 %vm247_vm0, %v6578_v8  ;;  %5868 = vmatpush3.msk.msra.mxu1 %vm247_vm0, %v6578_v8  ;;  %v6809_v44 = vld [vmem:[%s6550_s25 + $0x150] sm:$0xff]  ;;  %v6812_v45 = vld [vmem:[%s6550_s25 + $0x1e0] sm:$0xff] }
  0x28   : > { %5732 = vmatprep.mubr.msk.f32.mxu0 %vm222_vm1, %v6649_v21  ;;  %5858 = vmatprep.mubr.msk.f32.mxu1 %vm222_vm1, %v6566_v6  ;;  %v6819_v46 = vld [vmem:[%s6550_s25 + $0x160] sm:$0xff]  ;;  %v6822_v47 = vld [vmem:[%s6550_s25 + $0x1f0] sm:$0xff] }
  0x29   : > { %5755 = vmatprep.subr.msk.mxu0 %vm247_vm0, %v6658_v22  ;;  %5881 = vmatprep.subr.msk.mxu1 %vm247_vm0, %v6658_v22  ;;  %v6837_v48 = vld [vmem:[%s6550_s25 + $0x170] sm:$0xff]  ;;  %v6840_v49 = vld [vmem:[%s6550_s25 + $0x200] sm:$0xff] }
  0x2a   : > { %5733 = vmatmul.mubr.msk.f32.gmra.mrb[2].mxu0 %vm222_vm1, %v6665_v23  ;;  %5859 = vmatmul.mubr.msk.f32.gmra.mrb[2].mxu1 %vm222_vm1, %v6585_v9  ;;  %v6843_v50 = vld [vmem:[%s6550_s25 + $0x180] sm:$0xff]  ;;  %v6846_v51 = vld [vmem:[%s6550_s25 + $0x210] sm:$0xff] }
  0x2b   : > { %5735 = vmatprep.mubr.msk.f32.mxu0 %vm222_vm1, %v6672_v24  ;;  %5861 = vmatprep.mubr.msk.f32.mxu1 %vm222_vm1, %v6595_v11  ;;  %v6857_v52 = vld [vmem:[%s6550_s25 + $0x190] sm:$0xff]  ;;  %v6860_v53 = vld [vmem:[%s6550_s25 + $0x220] sm:$0xff] }
  0x2c   : > { %v6863_v54 = vld [vmem:[%s6550_s25 + $0x121] sm:$0xff]  ;;  %v6874_v55 = vld [vmem:[%s6550_s25 + $0x131] sm:$0xff] }
  0x2d   : > { %v6877_v56 = vld [vmem:[%s6550_s25 + $0x141] sm:$0xff]  ;;  %v6893_v58 = vld [vmem:[%s6550_s25 + $0x151] sm:$0xff] }
  0x2e   : > { %5736 = vmatmul.mubr.msk.f32.gmra.mrb[4].mxu0 %vm222_vm1, %v6687_v25  ;;  %5862 = vmatmul.mubr.msk.f32.gmra.mrb[4].mxu1 %vm222_vm1, %v6613_v13  ;;  %v6900_v59 = vld [vmem:[%s6550_s25 + $0x161] sm:$0xff]  ;;  %v6915_v60 = vld [vmem:[%s6550_s25 + $0x171] sm:$0xff] }
  0x2f   : > { %5738 = vmatprep.mubr.msk.f32.mxu0 %vm222_vm1, %v6690_v26  ;;  %5864 = vmatprep.mubr.msk.f32.mxu1 %vm222_vm1, %v6619_v15  ;;  %v6918_v61 = vld [vmem:[%s6550_s25 + $0x181] sm:$0xff]  ;;  %v6929_v62 = vld [vmem:[%s6550_s25 + $0x191] sm:$0xff] }
  0x30   : > { %v6932_v63 = vld [vmem:[%s6550_s25 + $0x1b1] sm:$0xff]  ;;  %v6943_v2 = vld [vmem:[%s6550_s25 + $0x1c1] sm:$0xff] }
  0x32   : > { %5739 = vmatmul.mubr.msk.f32.gmra.mrb[6].mxu0 %vm222_vm1, %v6701_v27  ;;  %5865 = vmatmul.mubr.msk.f32.gmra.mrb[6].mxu1 %vm222_vm1, %v6633_v17 }
  0x33   : > { %5743 = vmatprep.mubr.msk.f32.mxu0 %vm222_vm1, %v6554_v3  ;;  %5869 = vmatprep.mubr.msk.f32.mxu1 %vm222_vm1, %v5102_v28  ;;  %v6946_v3 = vld [vmem:[%s6550_s25 + $0x1d1] sm:$0xff]  ;;  %v6962_v28 = vld [vmem:[%s6550_s25 + $0x1e1] sm:$0xff] }
  0x34   : > { %7675 = vst [vmem:[#allocation7_spill] sm:$0xff] %v6962_v28 }
  0x36   : > { %5744 = vmatmul.mubr.msk.f32.vlgmr.msra.gmra.mrb[0].mxu0 %vm222_vm1, %v6563_v5  ;;  %5870 = vmatmul.mubr.msk.f32.vlgmr.msra.gmra.mrb[0].mxu1 %vm222_vm1, %v6712_v29 }
  0x37   : > { %5756 = vmatpush3.msk.msra.mxu0 %vm247_vm0, %v6658_v22  ;;  %5882 = vmatpush3.msk.msra.mxu1 %vm247_vm0, %v6658_v22 }
  0x38   : > { %5746 = vmatprep.mubr.msk.f32.mxu0 %vm222_vm1, %v6569_v7  ;;  %5872 = vmatprep.mubr.msk.f32.mxu1 %vm222_vm1, %v6715_v30 }
  0x39   : > { %5769 = vmatprep.subr.msk.mxu0 %vm247_vm0, %v6724_v31  ;;  %5895 = vmatprep.subr.msk.mxu1 %vm247_vm0, %v6724_v31 }
  0x3a   : > { %5747 = vmatmul.mubr.msk.f32.gmra.mrb[2].mxu0 %vm222_vm1, %v6588_v10  ;;  %5873 = vmatmul.mubr.msk.f32.gmra.mrb[2].mxu1 %vm222_vm1, %v6731_v32 }
  0x3b   : > { %5749 = vmatprep.mubr.msk.f32.mxu0 %vm222_vm1, %v6598_v12  ;;  %5875 = vmatprep.mubr.msk.f32.mxu1 %vm222_vm1, %v6738_v33 }
  0x3e   : > { %5750 = vmatmul.mubr.msk.f32.gmra.mrb[4].mxu0 %vm222_vm1, %v6616_v14  ;;  %5876 = vmatmul.mubr.msk.f32.gmra.mrb[4].mxu1 %vm222_vm1, %v6753_v34 }
  0x3f   : > { %5752 = vmatprep.mubr.msk.f32.mxu0 %vm222_vm1, %v6622_v16  ;;  %5878 = vmatprep.mubr.msk.f32.mxu1 %vm222_vm1, %v6756_v35 }
  0x42   : > { %5753 = vmatmul.mubr.msk.f32.gmra.mrb[6].mxu0 %vm222_vm1, %v6636_v18  ;;  %5879 = vmatmul.mubr.msk.f32.gmra.mrb[6].mxu1 %vm222_vm1, %v6767_v36 }
  0x43   : > { %5757 = vmatprep.mubr.msk.f32.mxu0 %vm222_vm1, %v6770_v37  ;;  %5883 = vmatprep.mubr.msk.f32.mxu1 %vm222_vm1, %v6773_v38 }
  0x46   : > { %5758 = vmatmul.mubr.msk.f32.vlgmr.msra.gmra.mrb[0].mxu0 %vm222_vm1, %v6784_v39  ;;  %5884 = vmatmul.mubr.msk.f32.vlgmr.msra.gmra.mrb[0].mxu1 %vm222_vm1, %v6787_v40 }
  0x47   : > { %5770 = vmatpush3.msk.msra.mxu0 %vm247_vm0, %v6724_v31  ;;  %5896 = vmatpush3.msk.msra.mxu1 %vm247_vm0, %v6724_v31  ;;  %v6987_v31 = vld [vmem:[%s6550_s25 + $0x211] sm:$0xff] }
  0x48   : > { %5760 = vmatprep.mubr.msk.f32.mxu0 %vm222_vm1, %v6790_v41  ;;  %5886 = vmatprep.mubr.msk.f32.mxu1 %vm222_vm1, %v6793_v42  ;;  %7676 = vst [vmem:[#allocation8_spill] sm:$0xff] %v6987_v31 }
  0x49   : > { %5783 = vmatprep.subr.msk.mxu0 %vm247_vm0, %v6802_v43  ;;  %5909 = vmatprep.subr.msk.mxu1 %vm247_vm0, %v6802_v43 }
  0x4a   : > { %5761 = vmatmul.mubr.msk.f32.gmra.mrb[2].mxu0 %vm222_vm1, %v6809_v44  ;;  %5887 = vmatmul.mubr.msk.f32.gmra.mrb[2].mxu1 %vm222_vm1, %v6812_v45 }
  0x4b   : > { %5763 = vmatprep.mubr.msk.f32.mxu0 %vm222_vm1, %v6819_v46  ;;  %5889 = vmatprep.mubr.msk.f32.mxu1 %vm222_vm1, %v6822_v47 }
  0x4e   : > { %5764 = vmatmul.mubr.msk.f32.gmra.mrb[4].mxu0 %vm222_vm1, %v6837_v48  ;;  %5890 = vmatmul.mubr.msk.f32.gmra.mrb[4].mxu1 %vm222_vm1, %v6840_v49 }
  0x4f   : > { %5766 = vmatprep.mubr.msk.f32.mxu0 %vm222_vm1, %v6843_v50  ;;  %5892 = vmatprep.mubr.msk.f32.mxu1 %vm222_vm1, %v6846_v51 }
  0x52   : > { %5767 = vmatmul.mubr.msk.f32.gmra.mrb[6].mxu0 %vm222_vm1, %v6857_v52  ;;  %5893 = vmatmul.mubr.msk.f32.gmra.mrb[6].mxu1 %vm222_vm1, %v6860_v53 }
  0x53   : > { %5771 = vmatprep.mubr.msk.f32.mxu0 %vm222_vm1, %v6773_v38  ;;  %5897 = vmatprep.mubr.msk.f32.mxu1 %vm222_vm1, %v6863_v54 }
  0x56   : > { %5772 = vmatmul.mubr.msk.f32.vlgmr.msra.gmra.mrb[0].mxu0 %vm222_vm1, %v6787_v40  ;;  %5898 = vmatmul.mubr.msk.f32.vlgmr.msra.gmra.mrb[0].mxu1 %vm222_vm1, %v6874_v55 }
  0x57   : > { %5784 = vmatpush3.msk.msra.mxu0 %vm247_vm0, %v6802_v43  ;;  %5910 = vmatpush3.msk.msra.mxu1 %vm247_vm0, %v6802_v43  ;;  %v6969_v43 = vld [vmem:[%s6550_s25 + $0x1f1] sm:$0xff] }
  0x58   : > { %5774 = vmatprep.mubr.msk.f32.mxu0 %vm222_vm1, %v6793_v42  ;;  %5900 = vmatprep.mubr.msk.f32.mxu1 %vm222_vm1, %v6877_v56 }
  0x59   : > { %5797 = vmatprep.subr.msk.mxu0 %vm247_vm0, %v6886_v57  ;;  %5923 = vmatprep.subr.msk.mxu1 %vm247_vm0, %v6886_v57 }
  0x5a   : > { %5775 = vmatmul.mubr.msk.f32.gmra.mrb[2].mxu0 %vm222_vm1, %v6812_v45  ;;  %5901 = vmatmul.mubr.msk.f32.gmra.mrb[2].mxu1 %vm222_vm1, %v6893_v58 }
  0x5b   : > { %5777 = vmatprep.mubr.msk.f32.mxu0 %vm222_vm1, %v6822_v47  ;;  %5903 = vmatprep.mubr.msk.f32.mxu1 %vm222_vm1, %v6900_v59 }
  0x5e   : > { %5778 = vmatmul.mubr.msk.f32.gmra.mrb[4].mxu0 %vm222_vm1, %v6840_v49  ;;  %5904 = vmatmul.mubr.msk.f32.gmra.mrb[4].mxu1 %vm222_vm1, %v6915_v60 }
  0x5f   : > { %5780 = vmatprep.mubr.msk.f32.mxu0 %vm222_vm1, %v6846_v51  ;;  %5906 = vmatprep.mubr.msk.f32.mxu1 %vm222_vm1, %v6918_v61 }
  0x62   : > { %5781 = vmatmul.mubr.msk.f32.gmra.mrb[6].mxu0 %vm222_vm1, %v6860_v53  ;;  %5907 = vmatmul.mubr.msk.f32.gmra.mrb[6].mxu1 %vm222_vm1, %v6929_v62 }
  0x63   : > { %5785 = vmatprep.mubr.msk.f32.mxu0 %vm222_vm1, %v6863_v54  ;;  %5911 = vmatprep.mubr.msk.f32.mxu1 %vm222_vm1, %v6932_v63 }
  0x66   : > { %5786 = vmatmul.mubr.msk.f32.vlgmr.msra.gmra.mrb[0].mxu0 %vm222_vm1, %v6874_v55  ;;  %5912 = vmatmul.mubr.msk.f32.vlgmr.msra.gmra.mrb[0].mxu1 %vm222_vm1, %v6943_v2 }
  0x67   : > { %5798 = vmatpush3.msk.msra.mxu0 %vm247_vm0, %v6886_v57  ;;  %5924 = vmatpush3.msk.msra.mxu1 %vm247_vm0, %v6886_v57  ;;  %v6984_v57 = vld [vmem:[%s6550_s25 + $0x201] sm:$0xff] }
  0x68   : > { %5788 = vmatprep.mubr.msk.f32.mxu0 %vm222_vm1, %v6877_v56  ;;  %5914 = vmatprep.mubr.msk.f32.mxu1 %vm222_vm1, %v6946_v3 }
  0x69   : > { %5811 = vmatprep.subr.msk.mxu0 %vm247_vm0, %v6955_v19  ;;  %5937 = vmatprep.subr.msk.mxu1 %vm247_vm0, %v6955_v19 }
  0x6a   : > { %5789 = vmatmul.mubr.msk.f32.gmra.mrb[2].mxu0 %vm222_vm1, %v6893_v58  ;;  %5915 = vmatmul.mubr.msk.f32.gmra.mrb[2].mxu1 %vm222_vm1, %v6962_v28  ;;  %v6998_v28 = vld [vmem:[%s6550_s25 + $0x221] sm:$0xff] }
  0x6b   : > { %5791 = vmatprep.mubr.msk.f32.mxu0 %vm222_vm1, %v6900_v59  ;;  %5917 = vmatprep.mubr.msk.f32.mxu1 %vm222_vm1, %v6969_v43 }
  0x6e   : > { %5792 = vmatmul.mubr.msk.f32.gmra.mrb[4].mxu0 %vm222_vm1, %v6915_v60  ;;  %5918 = vmatmul.mubr.msk.f32.gmra.mrb[4].mxu1 %vm222_vm1, %v6984_v57 }
  0x6f   : > { %5794 = vmatprep.mubr.msk.f32.mxu0 %vm222_vm1, %v6918_v61  ;;  %5920 = vmatprep.mubr.msk.f32.mxu1 %vm222_vm1, %v6987_v31  ;;  %v7015_v31 = vld [vmem:[%s7651_s1 + $0x20] sm:$0xf] }
  0x70   : > { %7677 = vst [vmem:[#allocation9_spill] sm:$0xff] %v7015_v31 }
  0x72   : > { %5795 = vmatmul.mubr.msk.f32.gmra.mrb[6].mxu0 %vm222_vm1, %v6929_v62  ;;  %5921 = vmatmul.mubr.msk.f32.gmra.mrb[6].mxu1 %vm222_vm1, %v6998_v28 }
  0x73   : > { %5799 = vmatprep.mubr.msk.f32.mxu0 %vm222_vm1, %v6646_v20  ;;  %5925 = vmatprep.mubr.msk.f32.mxu1 %vm222_vm1, %v6557_v4 }
  0x76   : > { %5800 = vmatmul.mubr.msk.f32.vlgmr.msra.gmra.mrb[0].mxu0 %vm222_vm1, %v6649_v21  ;;  %5926 = vmatmul.mubr.msk.f32.vlgmr.msra.gmra.mrb[0].mxu1 %vm222_vm1, %v6566_v6 }
  0x77   : > { %5812 = vmatpush3.msk.msra.mxu0 %vm247_vm0, %v6955_v19  ;;  %5938 = vmatpush3.msk.msra.mxu1 %vm247_vm0, %v6955_v19  ;;  %v7046_v19 = vld [vmem:[%s6550_s25 + $0x80] sm:$0xff] }
  0x78   : > { %5802 = vmatprep.mubr.msk.f32.mxu0 %vm222_vm1, %v6665_v23  ;;  %5928 = vmatprep.mubr.msk.f32.mxu1 %vm222_vm1, %v6585_v9 }
  0x79   : > { %5825 = vmatprep.subr.msk.mxu0 %vm247_vm0, %v7015_v31  ;;  %5951 = vmatprep.subr.msk.mxu1 %vm247_vm0, %v7015_v31 }
  0x7a   : > { %5803 = vmatmul.mubr.msk.f32.gmra.mrb[2].mxu0 %vm222_vm1, %v6672_v24  ;;  %5929 = vmatmul.mubr.msk.f32.gmra.mrb[2].mxu1 %vm222_vm1, %v6595_v11  ;;  %v7049_v24 = vld [vmem:[%s6550_s25 + $0x110] sm:$0xff] }
  0x7b   : > { %5805 = vmatprep.mubr.msk.f32.mxu0 %vm222_vm1, %v6687_v25  ;;  %5931 = vmatprep.mubr.msk.f32.mxu1 %vm222_vm1, %v6613_v13 }
  0x7e   : > { %5806 = vmatmul.mubr.msk.f32.gmra.mrb[4].mxu0 %vm222_vm1, %v6690_v26  ;;  %5932 = vmatmul.mubr.msk.f32.gmra.mrb[4].mxu1 %vm222_vm1, %v6619_v15 }
  0x7f   : > { %5808 = vmatprep.mubr.msk.f32.mxu0 %vm222_vm1, %v6701_v27  ;;  %5934 = vmatprep.mubr.msk.f32.mxu1 %vm222_vm1, %v6633_v17 }
  0x82   : > { %5809 = vmatmul.mubr.msk.f32.gmra.mrb[6].mxu0 %vm222_vm1, %v7046_v19  ;;  %5935 = vmatmul.mubr.msk.f32.gmra.mrb[6].mxu1 %vm222_vm1, %v7049_v24 }
  0x83   : > { %5813 = vmatprep.mubr.msk.f32.mxu0 %vm222_vm1, %v6557_v4  ;;  %5939 = vmatprep.mubr.msk.f32.mxu1 %vm222_vm1, %v6563_v5 }
  0x86   : > { %5814 = vmatmul.mubr.msk.f32.vlgmr.msra.gmra.mrb[0].mxu0 %vm222_vm1, %v6566_v6  ;;  %5940 = vmatmul.mubr.msk.f32.vlgmr.msra.gmra.mrb[0].mxu1 %vm222_vm1, %v6569_v7 }
  0x87   : > { %5826 = vmatpush3.msk.msra.mxu0 %vm247_vm0, %v7015_v31  ;;  %5952 = vmatpush3.msk.msra.mxu1 %vm247_vm0, %v7015_v31  ;;  %v7092_v31 = vld [vmem:[%s6550_s25 + $0x81] sm:$0xff] }
  0x88   : > { %5816 = vmatprep.mubr.msk.f32.mxu0 %vm222_vm1, %v6585_v9  ;;  %5942 = vmatprep.mubr.msk.f32.mxu1 %vm222_vm1, %v6588_v10 }
  0x89   : > { %5965 = vmatprep.subr.msk.mxu0 %vm247_vm0, %v6527_v0  ;;  %6091 = vmatprep.subr.msk.mxu1 %vm247_vm0, %v6527_v0 }
  0x8a   : > { %5817 = vmatmul.mubr.msk.f32.gmra.mrb[2].mxu0 %vm222_vm1, %v6595_v11  ;;  %5943 = vmatmul.mubr.msk.f32.gmra.mrb[2].mxu1 %vm222_vm1, %v6598_v12 }
  0x8b   : > { %5819 = vmatprep.mubr.msk.f32.mxu0 %vm222_vm1, %v6613_v13  ;;  %5945 = vmatprep.mubr.msk.f32.mxu1 %vm222_vm1, %v6616_v14 }
  0x8e   : > { %5820 = vmatmul.mubr.msk.f32.gmra.mrb[4].mxu0 %vm222_vm1, %v6619_v15  ;;  %5946 = vmatmul.mubr.msk.f32.gmra.mrb[4].mxu1 %vm222_vm1, %v6622_v16 }
  0x8f   : > { %5822 = vmatprep.mubr.msk.f32.mxu0 %vm222_vm1, %v6633_v17  ;;  %5948 = vmatprep.mubr.msk.f32.mxu1 %vm222_vm1, %v6636_v18 }
  0x92   : > { %5823 = vmatmul.mubr.msk.f32.gmra.mrb[6].mxu0 %vm222_vm1, %v7049_v24  ;;  %5949 = vmatmul.mubr.msk.f32.gmra.mrb[6].mxu1 %vm222_vm1, %v7092_v31 }
  0x93   : > { %5827 = vmatprep.mubr.msk.f32.mxu0 %vm222_vm1, %v6563_v5  ;;  %5953 = vmatprep.mubr.msk.f32.mxu1 %vm222_vm1, %v6712_v29 }
  0x96   : > { %5828 = vmatmul.mubr.msk.f32.vlgmr.msra.gmra.mrb[0].mxu0 %vm222_vm1, %v6569_v7  ;;  %5954 = vmatmul.mubr.msk.f32.vlgmr.msra.gmra.mrb[0].mxu1 %vm222_vm1, %v6715_v30 }
  0x97   : > { %5966 = vmatpush3.msk.msra.mxu0 %vm247_vm0, %v6527_v0  ;;  %6092 = vmatpush3.msk.msra.mxu1 %vm247_vm0, %v6527_v0  ;;  %v7135_v0 = vld [vmem:[%s6550_s25 + $0x111] sm:$0xff] }
  0x98   : > { %5830 = vmatprep.mubr.msk.f32.mxu0 %vm222_vm1, %v6588_v10  ;;  %5956 = vmatprep.mubr.msk.f32.mxu1 %vm222_vm1, %v6731_v32 }
  0x99   : > { %5979 = vmatprep.subr.msk.mxu0 %vm247_vm0, %v6537_v1  ;;  %6105 = vmatprep.subr.msk.mxu1 %vm247_vm0, %v6537_v1 }
  0x9a   : > { %5831 = vmatmul.mubr.msk.f32.gmra.mrb[2].mxu0 %vm222_vm1, %v6598_v12  ;;  %5957 = vmatmul.mubr.msk.f32.gmra.mrb[2].mxu1 %vm222_vm1, %v6738_v33 }
  0x9b   : > { %5833 = vmatprep.mubr.msk.f32.mxu0 %vm222_vm1, %v6616_v14  ;;  %5959 = vmatprep.mubr.msk.f32.mxu1 %vm222_vm1, %v6753_v34 }
  0x9e   : > { %5834 = vmatmul.mubr.msk.f32.gmra.mrb[4].mxu0 %vm222_vm1, %v6622_v16  ;;  %5960 = vmatmul.mubr.msk.f32.gmra.mrb[4].mxu1 %vm222_vm1, %v6756_v35 }
  0x9f   : > { %5836 = vmatprep.mubr.msk.f32.mxu0 %vm222_vm1, %v6636_v18  ;;  %5962 = vmatprep.mubr.msk.f32.mxu1 %vm222_vm1, %v6767_v36 }
  0xa2   : > { %5837 = vmatmul.mubr.msk.f32.gmra.mrb[6].mxu0 %vm222_vm1, %v7092_v31  ;;  %5963 = vmatmul.mubr.msk.f32.gmra.mrb[6].mxu1 %vm222_vm1, %v7135_v0 }
  0xa3   : > { %5967 = vmatprep.mubr.msk.f32.mxu0 %vm222_vm1, %v6773_v38  ;;  %6093 = vmatprep.mubr.msk.f32.mxu1 %vm222_vm1, %v6863_v54 }
  0xa6   : > { %5968 = vmatmul.mubr.msk.f32.vlgmr.msra.gmra.mrb[8].mxu0 %vm222_vm1, %v6787_v40  ;;  %6094 = vmatmul.mubr.msk.f32.vlgmr.msra.gmra.mrb[8].mxu1 %vm222_vm1, %v6874_v55 }
  0xa7   : > { %5980 = vmatpush3.msk.msra.mxu0 %vm247_vm0, %v6537_v1  ;;  %6106 = vmatpush3.msk.msra.mxu1 %vm247_vm0, %v6537_v1  ;;  %v7678_v1 = vld [vmem:[#allocation3_spill] sm:$0xff] }
  0xa8   : > { %5970 = vmatprep.mubr.msk.f32.mxu0 %vm222_vm1, %v6793_v42  ;;  %6096 = vmatprep.mubr.msk.f32.mxu1 %vm222_vm1, %v6877_v56 }
  0xa9   : > { %5993 = vmatprep.subr.msk.mxu0 %vm247_vm0, %v6578_v8  ;;  %6119 = vmatprep.subr.msk.mxu1 %vm247_vm0, %v6578_v8 }
  0xaa   : > { %5971 = vmatmul.mubr.msk.f32.gmra.mrb[10].mxu0 %vm222_vm1, %v6812_v45  ;;  %6097 = vmatmul.mubr.msk.f32.gmra.mrb[10].mxu1 %vm222_vm1, %v6893_v58 }
  0xab   : > { %5973 = vmatprep.mubr.msk.f32.mxu0 %vm222_vm1, %v6822_v47  ;;  %6099 = vmatprep.mubr.msk.f32.mxu1 %vm222_vm1, %v6900_v59 }
  0xae   : > { %5974 = vmatmul.mubr.msk.f32.gmra.mrb[12].mxu0 %vm222_vm1, %v6840_v49  ;;  %6100 = vmatmul.mubr.msk.f32.gmra.mrb[12].mxu1 %vm222_vm1, %v6915_v60 }
  0xaf   : > { %5976 = vmatprep.mubr.msk.f32.mxu0 %vm222_vm1, %v6846_v51  ;;  %6102 = vmatprep.mubr.msk.f32.mxu1 %vm222_vm1, %v6918_v61 }
  0xb2   : > { %5977 = vmatmul.mubr.msk.f32.gmra.mrb[14].mxu0 %vm222_vm1, %v6860_v53  ;;  %6103 = vmatmul.mubr.msk.f32.gmra.mrb[14].mxu1 %vm222_vm1, %v6929_v62 }
  0xb3   : > { %5981 = vmatprep.mubr.msk.f32.mxu0 %vm222_vm1, %v6770_v37  ;;  %6107 = vmatprep.mubr.msk.f32.mxu1 %vm222_vm1, %v6773_v38 }
  0xb6   : > { %5982 = vmatmul.mubr.msk.f32.vlgmr.msra.gmra.mrb[8].mxu0 %vm222_vm1, %v6784_v39  ;;  %6108 = vmatmul.mubr.msk.f32.vlgmr.msra.gmra.mrb[8].mxu1 %vm222_vm1, %v6787_v40 }
  0xb7   : > { %5994 = vmatpush3.msk.msra.mxu0 %vm247_vm0, %v6578_v8  ;;  %6120 = vmatpush3.msk.msra.mxu1 %vm247_vm0, %v6578_v8  ;;  %v7679_v8 = vld [vmem:[#allocation7_spill] sm:$0xff] }
  0xb8   : > { %5984 = vmatprep.mubr.msk.f32.mxu0 %vm222_vm1, %v6790_v41  ;;  %6110 = vmatprep.mubr.msk.f32.mxu1 %vm222_vm1, %v6793_v42 }
  0xb9   : > { %6007 = vmatprep.subr.msk.mxu0 %vm247_vm0, %v6658_v22  ;;  %6133 = vmatprep.subr.msk.mxu1 %vm247_vm0, %v6658_v22 }
  0xba   : > { %5985 = vmatmul.mubr.msk.f32.gmra.mrb[10].mxu0 %vm222_vm1, %v6809_v44  ;;  %6111 = vmatmul.mubr.msk.f32.gmra.mrb[10].mxu1 %vm222_vm1, %v6812_v45 }
  0xbb   : > { %5987 = vmatprep.mubr.msk.f32.mxu0 %vm222_vm1, %v6819_v46  ;;  %6113 = vmatprep.mubr.msk.f32.mxu1 %vm222_vm1, %v6822_v47 }
  0xbe   : > { %5988 = vmatmul.mubr.msk.f32.gmra.mrb[12].mxu0 %vm222_vm1, %v6837_v48  ;;  %6114 = vmatmul.mubr.msk.f32.gmra.mrb[12].mxu1 %vm222_vm1, %v6840_v49 }
  0xbf   : > { %5990 = vmatprep.mubr.msk.f32.mxu0 %vm222_vm1, %v6843_v50  ;;  %6116 = vmatprep.mubr.msk.f32.mxu1 %vm222_vm1, %v6846_v51 }
  0xc2   : > { %5991 = vmatmul.mubr.msk.f32.gmra.mrb[14].mxu0 %vm222_vm1, %v6857_v52  ;;  %6117 = vmatmul.mubr.msk.f32.gmra.mrb[14].mxu1 %vm222_vm1, %v6860_v53 }
  0xc3   : > { %5995 = vmatprep.mubr.msk.f32.mxu0 %vm222_vm1, %v6863_v54  ;;  %6121 = vmatprep.mubr.msk.f32.mxu1 %vm222_vm1, %v6932_v63 }
  0xc6   : > { %5996 = vmatmul.mubr.msk.f32.vlgmr.msra.gmra.mrb[8].mxu0 %vm222_vm1, %v6874_v55  ;;  %6122 = vmatmul.mubr.msk.f32.vlgmr.msra.gmra.mrb[8].mxu1 %vm222_vm1, %v6943_v2 }
  0xc7   : > { %6008 = vmatpush3.msk.msra.mxu0 %vm247_vm0, %v6658_v22  ;;  %6134 = vmatpush3.msk.msra.mxu1 %vm247_vm0, %v6658_v22  ;;  %v7680_v22 = vld [vmem:[#allocation8_spill] sm:$0xff] }
  0xc8   : > { %5998 = vmatprep.mubr.msk.f32.mxu0 %vm222_vm1, %v6877_v56  ;;  %6124 = vmatprep.mubr.msk.f32.mxu1 %vm222_vm1, %v6946_v3 }
  0xc9   : > { %6021 = vmatprep.subr.msk.mxu0 %vm247_vm0, %v7678_v1  ;;  %6147 = vmatprep.subr.msk.mxu1 %vm247_vm0, %v7678_v1 }
  0xca   : > { %5999 = vmatmul.mubr.msk.f32.gmra.mrb[10].mxu0 %vm222_vm1, %v6893_v58  ;;  %6125 = vmatmul.mubr.msk.f32.gmra.mrb[10].mxu1 %vm222_vm1, %v7679_v8 }
  0xcb   : > { %6001 = vmatprep.mubr.msk.f32.mxu0 %vm222_vm1, %v6900_v59  ;;  %6127 = vmatprep.mubr.msk.f32.mxu1 %vm222_vm1, %v6969_v43 }
  0xce   : > { %6002 = vmatmul.mubr.msk.f32.gmra.mrb[12].mxu0 %vm222_vm1, %v6915_v60  ;;  %6128 = vmatmul.mubr.msk.f32.gmra.mrb[12].mxu1 %vm222_vm1, %v6984_v57 }
  0xcf   : > { %6004 = vmatprep.mubr.msk.f32.mxu0 %vm222_vm1, %v6918_v61  ;;  %6130 = vmatprep.mubr.msk.f32.mxu1 %vm222_vm1, %v7680_v22 }
  0xd2   : > { %6005 = vmatmul.mubr.msk.f32.gmra.mrb[14].mxu0 %vm222_vm1, %v6929_v62  ;;  %6131 = vmatmul.mubr.msk.f32.gmra.mrb[14].mxu1 %vm222_vm1, %v6998_v28 }
  0xd3   : > { %6009 = vmatprep.mubr.msk.f32.mxu0 %vm222_vm1, %v6646_v20  ;;  %6135 = vmatprep.mubr.msk.f32.mxu1 %vm222_vm1, %v6557_v4  ;;  %v7681_v20 = vld [vmem:[#allocation4_spill] sm:$0xff] }
  0xd6   : > { %6010 = vmatmul.mubr.msk.f32.vlgmr.msra.gmra.mrb[8].mxu0 %vm222_vm1, %v6649_v21  ;;  %6136 = vmatmul.mubr.msk.f32.vlgmr.msra.gmra.mrb[8].mxu1 %vm222_vm1, %v6566_v6  ;;  %v7682_v21 = vld [vmem:[#allocation2_spill] sm:$0xff] }
  0xd7   : > { %6022 = vmatpush3.msk.msra.mxu0 %vm247_vm0, %v7678_v1  ;;  %6148 = vmatpush3.msk.msra.mxu1 %vm247_vm0, %v7678_v1 }
  0xd8   : > { %6012 = vmatprep.mubr.msk.f32.mxu0 %vm222_vm1, %v6665_v23  ;;  %6138 = vmatprep.mubr.msk.f32.mxu1 %vm222_vm1, %v6585_v9 }
  0xd9   : > { %6035 = vmatprep.subr.msk.mxu0 %vm247_vm0, %v7681_v20  ;;  %6161 = vmatprep.subr.msk.mxu1 %vm247_vm0, %v7681_v20 }
  0xda   : > { %6013 = vmatmul.mubr.msk.f32.gmra.mrb[10].mxu0 %vm222_vm1, %v7682_v21  ;;  %6139 = vmatmul.mubr.msk.f32.gmra.mrb[10].mxu1 %vm222_vm1, %v6595_v11 }
  0xdb   : > { %6015 = vmatprep.mubr.msk.f32.mxu0 %vm222_vm1, %v6687_v25  ;;  %6141 = vmatprep.mubr.msk.f32.mxu1 %vm222_vm1, %v6613_v13 }
  0xde   : > { %6016 = vmatmul.mubr.msk.f32.gmra.mrb[12].mxu0 %vm222_vm1, %v6690_v26  ;;  %6142 = vmatmul.mubr.msk.f32.gmra.mrb[12].mxu1 %vm222_vm1, %v6619_v15 }
  0xdf   : > { %6018 = vmatprep.mubr.msk.f32.mxu0 %vm222_vm1, %v6701_v27  ;;  %6144 = vmatprep.mubr.msk.f32.mxu1 %vm222_vm1, %v6633_v17 }
  0xe2   : > { %6019 = vmatmul.mubr.msk.f32.gmra.mrb[14].mxu0 %vm222_vm1, %v7046_v19  ;;  %6145 = vmatmul.mubr.msk.f32.gmra.mrb[14].mxu1 %vm222_vm1, %v7049_v24 }
  0xe3   : > { %6023 = vmatprep.mubr.msk.f32.mxu0 %vm222_vm1, %v6557_v4  ;;  %6149 = vmatprep.mubr.msk.f32.mxu1 %vm222_vm1, %v6563_v5  ;;  %v7683_v4 = vld [vmem:[#allocation5_spill] sm:$0xff] }
  0xe6   : > { %6024 = vmatmul.mubr.msk.f32.vlgmr.msra.gmra.mrb[8].mxu0 %vm222_vm1, %v6566_v6  ;;  %6150 = vmatmul.mubr.msk.f32.vlgmr.msra.gmra.mrb[8].mxu1 %vm222_vm1, %v6569_v7  ;;  %v7685_v6 = vld [vmem:[#allocation9_spill] sm:$0xff] }
  0xe7   : > { %6036 = vmatpush3.msk.msra.mxu0 %vm247_vm0, %v7681_v20  ;;  %6162 = vmatpush3.msk.msra.mxu1 %vm247_vm0, %v7681_v20 }
  0xe8   : > { %6026 = vmatprep.mubr.msk.f32.mxu0 %vm222_vm1, %v6585_v9  ;;  %6152 = vmatprep.mubr.msk.f32.mxu1 %vm222_vm1, %v6588_v10  ;;  %v5267_v9 = vld [vmem:[%s6550_s25 + $0x230] sm:$0xff] }
  0xe9   : > { %6049 = vmatprep.subr.msk.mxu0 %vm247_vm0, %v7683_v4  ;;  %6175 = vmatprep.subr.msk.mxu1 %vm247_vm0, %v7683_v4 }
  0xea   : > { %6027 = vmatmul.mubr.msk.f32.gmra.mrb[10].mxu0 %vm222_vm1, %v6595_v11  ;;  %6153 = vmatmul.mubr.msk.f32.gmra.mrb[10].mxu1 %vm222_vm1, %v6598_v12  ;;  %v5373_v11 = vld [vmem:[%s6550_s25 + $0x231] sm:$0xff] }
  0xeb   : > { %6029 = vmatprep.mubr.msk.f32.mxu0 %vm222_vm1, %v6613_v13  ;;  %6155 = vmatprep.mubr.msk.f32.mxu1 %vm222_vm1, %v6616_v14 }
  0xee   : > { %6030 = vmatmul.mubr.msk.f32.gmra.mrb[12].mxu0 %vm222_vm1, %v6619_v15  ;;  %6156 = vmatmul.mubr.msk.f32.gmra.mrb[12].mxu1 %vm222_vm1, %v6622_v16 }
  0xef   : > { %6032 = vmatprep.mubr.msk.f32.mxu0 %vm222_vm1, %v6633_v17  ;;  %6158 = vmatprep.mubr.msk.f32.mxu1 %vm222_vm1, %v6636_v18 }
  0xf2   : > { %6033 = vmatmul.mubr.msk.f32.gmra.mrb[14].mxu0 %vm222_vm1, %v7049_v24  ;;  %6159 = vmatmul.mubr.msk.f32.gmra.mrb[14].mxu1 %vm222_vm1, %v7092_v31 }
  0xf3   : > { %6037 = vmatprep.mubr.msk.f32.mxu0 %vm222_vm1, %v6563_v5  ;;  %6163 = vmatprep.mubr.msk.f32.mxu1 %vm222_vm1, %v6712_v29  ;;  %v7684_v5 = vld [vmem:[#allocation6_spill] sm:$0xff] }
  0xf6   : > { %6038 = vmatmul.mubr.msk.f32.vlgmr.msra.gmra.mrb[8].mxu0 %vm222_vm1, %v6569_v7  ;;  %6164 = vmatmul.mubr.msk.f32.vlgmr.msra.gmra.mrb[8].mxu1 %vm222_vm1, %v6715_v30  ;;  %v5250_v7 = vld [vmem:[%s6550_s25 + $0x1a0] sm:$0xff] }
  0xf7   : > { %6050 = vmatpush3.msk.msra.mxu0 %vm247_vm0, %v7683_v4  ;;  %6176 = vmatpush3.msk.msra.mxu1 %vm247_vm0, %v7683_v4 }
  0xf8   : > { %6040 = vmatprep.mubr.msk.f32.mxu0 %vm222_vm1, %v6588_v10  ;;  %6166 = vmatprep.mubr.msk.f32.mxu1 %vm222_vm1, %v6731_v32  ;;  %v5284_v10 = vld [vmem:[%s6550_s25 + $0x1a1] sm:$0xff] }
  0xf9   : > { %6063 = vmatprep.subr.msk.mxu0 %vm247_vm0, %v7684_v5  ;;  %6189 = vmatprep.subr.msk.mxu1 %vm247_vm0, %v7684_v5 }
  0xfa   : > { %6041 = vmatmul.mubr.msk.f32.gmra.mrb[10].mxu0 %vm222_vm1, %v6598_v12  ;;  %6167 = vmatmul.mubr.msk.f32.gmra.mrb[10].mxu1 %vm222_vm1, %v6738_v33  ;;  %v7490_v12 = vld [vmem:[%s7652_s2] ss:$0 sm:$0xff] }
  0xfb   : > { %6043 = vmatprep.mubr.msk.f32.mxu0 %vm222_vm1, %v6616_v14  ;;  %6169 = vmatprep.mubr.msk.f32.mxu1 %vm222_vm1, %v6753_v34  ;;  %v7495_v14 = vld [vmem:[%s7653_s3] ss:$0 sm:$0xff] }
  0xfe   : > { %6044 = vmatmul.mubr.msk.f32.gmra.mrb[12].mxu0 %vm222_vm1, %v6622_v16  ;;  %6170 = vmatmul.mubr.msk.f32.gmra.mrb[12].mxu1 %vm222_vm1, %v6756_v35 }
  0xff   : > { %6046 = vmatprep.mubr.msk.f32.mxu0 %vm222_vm1, %v6636_v18  ;;  %6172 = vmatprep.mubr.msk.f32.mxu1 %vm222_vm1, %v6767_v36 }
 0x102   : > { %6047 = vmatmul.mubr.msk.f32.gmra.mrb[14].mxu0 %vm222_vm1, %v7092_v31  ;;  %6173 = vmatmul.mubr.msk.f32.gmra.mrb[14].mxu1 %vm222_vm1, %v7135_v0 }
 0x103   : > { %6051 = vmatprep.mubr.msk.f32.mxu0 %vm222_vm1, %v6784_v39  ;;  %6177 = vmatprep.mubr.msk.f32.mxu1 %vm222_vm1, %v6787_v40 }
 0x106   : > { %6052 = vmatmul.mubr.msk.f32.vlgmr.msra.gmra.mrb[8].mxu0 %vm222_vm1, %v6790_v41  ;;  %6178 = vmatmul.mubr.msk.f32.vlgmr.msra.gmra.mrb[8].mxu1 %vm222_vm1, %v6793_v42 }
 0x107   : > { %6064 = vmatpush3.msk.msra.mxu0 %vm247_vm0, %v7684_v5  ;;  %6190 = vmatpush3.msk.msra.mxu1 %vm247_vm0, %v7684_v5 }
 0x108   : > { %6054 = vmatprep.mubr.msk.f32.mxu0 %vm222_vm1, %v6809_v44  ;;  %6180 = vmatprep.mubr.msk.f32.mxu1 %vm222_vm1, %v6812_v45 }
 0x109   : > { %6077 = vmatprep.subr.msk.mxu0 %vm247_vm0, %v7685_v6  ;;  %6203 = vmatprep.subr.msk.mxu1 %vm247_vm0, %v7685_v6 }
 0x10a   : > { %6055 = vmatmul.mubr.msk.f32.gmra.mrb[10].mxu0 %vm222_vm1, %v6819_v46  ;;  %6181 = vmatmul.mubr.msk.f32.gmra.mrb[10].mxu1 %vm222_vm1, %v6822_v47 }
 0x10b   : > { %6057 = vmatprep.mubr.msk.f32.mxu0 %vm222_vm1, %v6837_v48  ;;  %6183 = vmatprep.mubr.msk.f32.mxu1 %vm222_vm1, %v6840_v49 }
 0x10e   : > { %6058 = vmatmul.mubr.msk.f32.gmra.mrb[12].mxu0 %vm222_vm1, %v6843_v50  ;;  %6184 = vmatmul.mubr.msk.f32.gmra.mrb[12].mxu1 %vm222_vm1, %v6846_v51 }
 0x10f   : > { %6060 = vmatprep.mubr.msk.f32.mxu0 %vm222_vm1, %v6857_v52  ;;  %6186 = vmatprep.mubr.msk.f32.mxu1 %vm222_vm1, %v6860_v53 }
 0x112   : > { %6061 = vmatmul.mubr.msk.f32.gmra.mrb[14].mxu0 %vm222_vm1, %v5250_v7  ;;  %6187 = vmatmul.mubr.msk.f32.gmra.mrb[14].mxu1 %vm222_vm1, %v5267_v9 }
 0x113   : > { %6065 = vmatprep.mubr.msk.f32.mxu0 %vm222_vm1, %v6787_v40  ;;  %6191 = vmatprep.mubr.msk.f32.mxu1 %vm222_vm1, %v6874_v55 }
 0x116   : > { %6066 = vmatmul.mubr.msk.f32.vlgmr.msra.gmra.mrb[8].mxu0 %vm222_vm1, %v6793_v42  ;;  %6192 = vmatmul.mubr.msk.f32.vlgmr.msra.gmra.mrb[8].mxu1 %vm222_vm1, %v6877_v56 }
 0x117   : > { %6078 = vmatpush3.msk.msra.mxu0 %vm247_vm0, %v7685_v6  ;;  %6204 = vmatpush3.msk.msra.mxu1 %vm247_vm0, %v7685_v6 }
 0x118   : > { %6068 = vmatprep.mubr.msk.f32.mxu0 %vm222_vm1, %v6812_v45  ;;  %6194 = vmatprep.mubr.msk.f32.mxu1 %vm222_vm1, %v6893_v58 }
 0x11a   : > { %6069 = vmatmul.mubr.msk.f32.gmra.mrb[10].mxu0 %vm222_vm1, %v6822_v47  ;;  %6195 = vmatmul.mubr.msk.f32.gmra.mrb[10].mxu1 %vm222_vm1, %v6900_v59 }
 0x11b   : > { %6071 = vmatprep.mubr.msk.f32.mxu0 %vm222_vm1, %v6840_v49  ;;  %6197 = vmatprep.mubr.msk.f32.mxu1 %vm222_vm1, %v6915_v60 }
 0x11e   : > { %6072 = vmatmul.mubr.msk.f32.gmra.mrb[12].mxu0 %vm222_vm1, %v6846_v51  ;;  %6198 = vmatmul.mubr.msk.f32.gmra.mrb[12].mxu1 %vm222_vm1, %v6918_v61 }
 0x11f   : > { %6074 = vmatprep.mubr.msk.f32.mxu0 %vm222_vm1, %v6860_v53  ;;  %6200 = vmatprep.mubr.msk.f32.mxu1 %vm222_vm1, %v6929_v62 }
 0x122   : > { %6075 = vmatmul.mubr.msk.f32.gmra.mrb[14].mxu0 %vm222_vm1, %v5267_v9  ;;  %6201 = vmatmul.mubr.msk.f32.gmra.mrb[14].mxu1 %vm222_vm1, %v5284_v10 }
 0x123   : > { %6079 = vmatprep.mubr.msk.f32.mxu0 %vm222_vm1, %v6874_v55  ;;  %6205 = vmatprep.mubr.msk.f32.mxu1 %vm222_vm1, %v6943_v2 }
 0x126   : > { %6080 = vmatmul.mubr.msk.f32.vlgmr.msra.gmra.mrb[8].mxu0 %vm222_vm1, %v6877_v56  ;;  %6206 = vmatmul.mubr.msk.f32.vlgmr.msra.gmra.mrb[8].mxu1 %vm222_vm1, %v6946_v3 }
 0x127   : > { %6082 = vmatprep.mubr.msk.f32.mxu0 %vm222_vm1, %v6893_v58  ;;  %6208 = vmatprep.mubr.msk.f32.mxu1 %vm222_vm1, %v7679_v8 }
 0x12a   : > { %6083 = vmatmul.mubr.msk.f32.gmra.mrb[10].mxu0 %vm222_vm1, %v6900_v59  ;;  %6209 = vmatmul.mubr.msk.f32.gmra.mrb[10].mxu1 %vm222_vm1, %v6969_v43 }
 0x12b   : > { %6085 = vmatprep.mubr.msk.f32.mxu0 %vm222_vm1, %v6915_v60  ;;  %6211 = vmatprep.mubr.msk.f32.mxu1 %vm222_vm1, %v6984_v57 }
 0x12e   : > { %6086 = vmatmul.mubr.msk.f32.gmra.mrb[12].mxu0 %vm222_vm1, %v6918_v61  ;;  %6212 = vmatmul.mubr.msk.f32.gmra.mrb[12].mxu1 %vm222_vm1, %v7680_v22 }
 0x12f   : > { %6088 = vmatprep.mubr.msk.f32.mxu0 %vm222_vm1, %v6929_v62  ;;  %6214 = vmatprep.mubr.msk.f32.mxu1 %vm222_vm1, %v6998_v28 }
 0x132   : > { %6089 = vmatmul.mubr.msk.f32.gmra.mrb[14].mxu0 %vm222_vm1, %v5284_v10  ;;  %6215 = vmatmul.mubr.msk.f32.gmra.mrb[14].mxu1 %vm222_vm1, %v5373_v11 }
 0x169   : > { %v5829_v13 = vpop.f32.mrb[0].mxu0  ;;  %v5955_v15 = vpop.f32.mrb[0].mxu1 }
 0x16a   : > { %v4773_v16 = vmul.f32 %v5829_v13, %v7490_v12  ;;  %v4795_v17 = vmul.f32 %v5955_v15, %v7490_v12  ;;  %v1488_v18 = vpop.f32.mrb[1].mxu0  ;;  %v2585_v23 = vpop.f32.mrb[1].mxu1 }
 0x16b   : > { %v4772_v24 = vmul.f32 %v7490_v12, %v1488_v18  ;;  %v4794_v25 = vmul.f32 %v7490_v12, %v2585_v23 }
 0x16c   : > { %v7502_v26 = vadd.f32 %v7495_v14, %v4773_v16  ;;  %v4803_v27 = vadd.f32 %v7495_v14, %v4795_v17 }
 0x16d   : > { %v7506_v29 = vadd.f32 %v7495_v14, %v4772_v24  ;;  %v7509_v30 = vadd.f32 %v7495_v14, %v4794_v25  ;;  %v5832_v31 = vpop.f32.mrb[2].mxu0  ;;  %v5958_v32 = vpop.f32.mrb[2].mxu1 }
 0x16e   : > { %v4811_v33 = vmax.f32 %v7502_v26, %v4803_v27  ;;  %v4775_v34 = vmul.f32 %v5832_v31, %v7490_v12  ;;  %v4797_v35 = vmul.f32 %v5958_v32, %v7490_v12  ;;  %v1498_v36 = vpop.f32.mrb[3].mxu0  ;;  %v2595_v37 = vpop.f32.mrb[3].mxu1 }
 0x16f   : > { %v4810_v38 = vmax.f32 %v7506_v29, %v7509_v30  ;;  %v4774_v39 = vmul.f32 %v7490_v12, %v1498_v36  ;;  %v4796_v40 = vmul.f32 %v7490_v12, %v2595_v37 }
 0x170   : > { %v7519_v41 = vadd.f32 %v7495_v14, %v4775_v34  ;;  %v7522_v42 = vadd.f32 %v7495_v14, %v4797_v35 }
 0x171   : > { %v7525_v43 = vadd.f32 %v7495_v14, %v4774_v39  ;;  %v7528_v44 = vadd.f32 %v7495_v14, %v4796_v40  ;;  %v5835_v45 = vpop.f32.mrb[4].mxu0  ;;  %v5961_v46 = vpop.f32.mrb[4].mxu1 }
 0x172   : > { %v4813_v47 = vmax.f32 %v7519_v41, %v7522_v42  ;;  %v4777_v48 = vmul.f32 %v5835_v45, %v7490_v12  ;;  %v4799_v49 = vmul.f32 %v5961_v46, %v7490_v12  ;;  %v1508_v50 = vpop.f32.mrb[5].mxu0  ;;  %v2605_v51 = vpop.f32.mrb[5].mxu1 }
 0x173   : > { %v4812_v52 = vmax.f32 %v7525_v43, %v7528_v44  ;;  %v4776_v53 = vmul.f32 %v7490_v12, %v1508_v50  ;;  %v4798_v54 = vmul.f32 %v7490_v12, %v2605_v51 }
 0x174   : > { %v7539_v55 = vadd.f32 %v7495_v14, %v4777_v48  ;;  %v7542_v56 = vadd.f32 %v7495_v14, %v4799_v49 }
 0x175   : > { %v7545_v57 = vadd.f32 %v7495_v14, %v4776_v53  ;;  %v7548_v58 = vadd.f32 %v7495_v14, %v4798_v54  ;;  %v5838_v59 = vpop.f32.mrb[6].mxu0  ;;  %v5964_v60 = vpop.f32.mrb[6].mxu1 }
 0x176   : > { %v4815_v61 = vmax.f32 %v7539_v55, %v7542_v56  ;;  %v4779_v62 = vmul.f32 %v5838_v59, %v7490_v12  ;;  %v4801_v63 = vmul.f32 %v5964_v60, %v7490_v12  ;;  %v1518_v2 = vpop.f32.mrb[7].mxu0  ;;  %v2615_v3 = vpop.f32.mrb[7].mxu1 }
 0x177   : > { %v4814_v19 = vmax.f32 %v7545_v57, %v7548_v58  ;;  %v4778_v28 = vmul.f32 %v7490_v12, %v1518_v2  ;;  %v4800_v0 = vmul.f32 %v7490_v12, %v2615_v3 }
 0x178   : > { %v7559_v1 = vadd.f32 %v7495_v14, %v4779_v62  ;;  %v7562_v8 = vadd.f32 %v7495_v14, %v4801_v63 }
 0x179   : > { %v7565_v22 = vadd.f32 %v7495_v14, %v4778_v28  ;;  %v7568_v20 = vadd.f32 %v7495_v14, %v4800_v0 }
 0x17a   : > { %v4817_v21 = vmax.f32 %v7559_v1, %v7562_v8 }
 0x17b   : > { %v4816_v4 = vmax.f32 %v7565_v22, %v7568_v20 }
 0x1f9   : > { %v6081_v5 = vpop.f32.mrb[8].mxu0  ;;  %v6207_v6 = vpop.f32.mrb[8].mxu1 }
 0x1fa   : > { %v4819_v7 = vmul.f32 %v6081_v5, %v7490_v12  ;;  %v4843_v9 = vmul.f32 %v6207_v6, %v7490_v12  ;;  %v3684_v10 = vpop.f32.mrb[9].mxu0  ;;  %v4717_v11 = vpop.f32.mrb[9].mxu1 }
 0x1fb   : > { %v4818_v13 = vmul.f32 %v7490_v12, %v3684_v10  ;;  %v4842_v15 = vmul.f32 %v7490_v12, %v4717_v11 }
 0x1fc   : > { %v4827_v16 = vadd.f32 %v7495_v14, %v4819_v7  ;;  %v4851_v25 = vadd.f32 %v7495_v14, %v4843_v9 }
 0x1fd   : > { %v4826_v17 = vadd.f32 %v7495_v14, %v4818_v13  ;;  %v6084_v18 = vpop.f32.mrb[10].mxu0  ;;  %v6210_v23 = vpop.f32.mrb[10].mxu1  ;;  %v4850_v32 = vadd.f32 %v7495_v14, %v4842_v15 }
 0x1fe   : > { %v4835_v24 = vmax.f32 %v4811_v33, %v4827_v16  ;;  %v4821_v26 = vmul.f32 %v6084_v18, %v7490_v12  ;;  %v4845_v27 = vmul.f32 %v6210_v23, %v7490_v12  ;;  %v3694_v29 = vpop.f32.mrb[11].mxu0  ;;  %v4727_v30 = vpop.f32.mrb[11].mxu1 }
 0x1ff   : > { %v4834_v31 = vmax.f32 %v4810_v38, %v4826_v17  ;;  %v4820_v34 = vmul.f32 %v7490_v12, %v3694_v29  ;;  %v4844_v35 = vmul.f32 %v7490_v12, %v4727_v30 }
 0x200   : > { %v4859_v36 = vmax.f32 %v4835_v24, %v4851_v25  ;;  %v4829_v33 = vadd.f32 %v7495_v14, %v4821_v26  ;;  %v4853_v39 = vadd.f32 %v7495_v14, %v4845_v27 }
 0x201   : > { %v4858_v37 = vmax.f32 %v4834_v31, %v4850_v32  ;;  %v4828_v38 = vadd.f32 %v7495_v14, %v4820_v34  ;;  %v4852_v40 = vadd.f32 %v7495_v14, %v4844_v35  ;;  %v6087_v45 = vpop.f32.mrb[12].mxu0  ;;  %v6213_v46 = vpop.f32.mrb[12].mxu1 }
 0x202   : > { %v4867_v48 = vmax.f32 %v4859_v36, 0.0  ;;  %v4837_v49 = vmax.f32 %v4813_v47, %v4829_v33  ;;  %v4823_v50 = vmul.f32 %v6087_v45, %v7490_v12  ;;  %v4847_v51 = vmul.f32 %v6213_v46, %v7490_v12  ;;  %v3704_v53 = vpop.f32.mrb[13].mxu0  ;;  %v4737_v54 = vpop.f32.mrb[13].mxu1 }
 0x203   : > { %v4866_v59 = vmax.f32 %v4858_v37, 0.0  ;;  %v4836_v60 = vmax.f32 %v4812_v52, %v4828_v38  ;;  %v4822_v62 = vmul.f32 %v7490_v12, %v3704_v53  ;;  %v4846_v63 = vmul.f32 %v7490_v12, %v4737_v54 }
 0x204   : > { %4876 = vst.msk [vmem:[%s7592_s22 + $0x8] sm:$0xff] %vm4874_vm2, %v4867_v48  ;;  %v4861_v2 = vmax.f32 %v4837_v49, %v4853_v39  ;;  %v4831_v41 = vadd.f32 %v7495_v14, %v4823_v50  ;;  %v4855_v47 = vadd.f32 %v7495_v14, %v4847_v51 }
 0x205   : > { %4875 = vst.msk [vmem:[%s7592_s22] sm:$0xff] %vm4874_vm2, %v4866_v59  ;;  %v4860_v42 = vmax.f32 %v4836_v60, %v4852_v40  ;;  %v4830_v3 = vadd.f32 %v7495_v14, %v4822_v62  ;;  %v4854_v43 = vadd.f32 %v7495_v14, %v4846_v63  ;;  %v6090_v44 = vpop.f32.mrb[14].mxu0  ;;  %v6216_v52 = vpop.f32.mrb[14].mxu1 }
 0x206   : > { %v4869_v28 = vmax.f32 %v4861_v2, 0.0  ;;  %v4839_v0 = vmax.f32 %v4815_v61, %v4831_v41  ;;  %v4825_v5 = vmul.f32 %v6090_v44, %v7490_v12  ;;  %v4849_v6 = vmul.f32 %v6216_v52, %v7490_v12  ;;  %v3714_v7 = vpop.f32.mrb[15].mxu0  ;;  %v4747_v9 = vpop.f32.mrb[15].mxu1 }
 0x207   : > { %v4868_v10 = vmax.f32 %v4860_v42, 0.0  ;;  %v4838_v11 = vmax.f32 %v4814_v19, %v4830_v3  ;;  %v4824_v13 = vmul.f32 %v7490_v12, %v3714_v7  ;;  %v4848_v15 = vmul.f32 %v7490_v12, %v4747_v9 }
 0x208   : > { %4878 = vst.msk [vmem:[%s7592_s22 + $0x18] sm:$0xff] %vm4874_vm2, %v4869_v28  ;;  %v4863_v55 = vmax.f32 %v4839_v0, %v4855_v47  ;;  %v4833_v56 = vadd.f32 %v7495_v14, %v4825_v5  ;;  %v4857_v19 = vadd.f32 %v7495_v14, %v4849_v6 }
 0x209   : > { %4877 = vst.msk [vmem:[%s7592_s22 + $0x10] sm:$0xff] %vm4874_vm2, %v4868_v10  ;;  %v4862_v61 = vmax.f32 %v4838_v11, %v4854_v43  ;;  %v4832_v16 = vadd.f32 %v7495_v14, %v4824_v13  ;;  %v4856_v18 = vadd.f32 %v7495_v14, %v4848_v15 }
 0x20a   : > { %v4871_v57 = vmax.f32 %v4863_v55, 0.0  ;;  %v4841_v58 = vmax.f32 %v4817_v21, %v4833_v56 }
 0x20b   : > { %v4870_v12 = vmax.f32 %v4862_v61, 0.0  ;;  %v4840_v17 = vmax.f32 %v4816_v4, %v4832_v16 }
 0x20c   : > { %4880 = vst.msk [vmem:[%s7592_s22 + $0x28] sm:$0xff] %vm4874_vm2, %v4871_v57  ;;  %v4865_v23 = vmax.f32 %v4841_v58, %v4857_v19 }
 0x20d   : > { %4879 = vst.msk [vmem:[%s7592_s22 + $0x20] sm:$0xff] %vm4874_vm2, %v4870_v12  ;;  %v4864_v24 = vmax.f32 %v4840_v17, %v4856_v18 }
 0x20e   : > { %v4873_v25 = vmax.f32 %v4865_v23, 0.0 }
 0x20f   : > { %v4872_v26 = vmax.f32 %v4864_v24, 0.0 }
 0x210   : > { %4882 = vst.msk [vmem:[%s7592_s22 + $0x38] sm:$0xff] %vm4874_vm2, %v4873_v25 }
 0x211   : > { %4881 = vst.msk [vmem:[%s7592_s22 + $0x30] sm:$0xff] %vm4874_vm2, %v4872_v26 }
 0x212 PF: > { %s14_s15 = sadd.s32 1, %s6487_s15  }
 0x213   : > { %p11_p5 = scmp.ge.s32.totalorder %s14_s15, 4  }
 0x215   :  { %13 = sbr.rel (!%p11_p5) target bundleno = 1 (0x1), region = 73 }

// kernel: conv2d_block_forward.2
= control target key start
LH: loop header
LB: loop body
LE: loop exit
PB: predicated region body
PF: predicated region fallthrough
CT: control target
= control target key end

     0   :  { %s6643_s9 = smov 0   ;;  %s6645_s10 = smov 0   ;;  %s7884_s0 = inlined_call_operand.vmem [shape: f32[72,9,4], index: 0, kind: input, shape index: {}]   ;;  %s7885_s1 = inlined_call_operand.vmem [shape: f32[36,8], index: 1, kind: input, shape index: {}]   ;;  %s7886_s2 = inlined_call_operand.vmem [shape: f32[16,8], index: 2, kind: output, shape index: {}]  }
   0x1   :  { %s6647_s11 = smov 0  }
   0x2 LB: > { %s24_s12 = sadd.s32 1, %s6621_s10  ;;  %p5051_p0 = scmp.ge.s32.totalorder %s6625_s11, 1  ;;  %s6625_s11 = sphi %s6647_s11, %s12_s11   ;;  %s6621_s10 = sphi %s6645_s10, %s7919_s10   ;;  %s6617_s9 = sphi %s6643_s9, %s7918_s9  }
   0x3   : > { %p26_p1 = scmp.ge.s32.totalorder %s24_s12, 2  ;;  %p130_p2 = scmp.lt.s32.totalorder %s6625_s11, 3 }
   0x5   : > { %s7921_s12 = smov (%p26_p1, %s24_s12), 0  ;;  %p131_p3 = pnand %p5051_p0, %p130_p2 }
   0x7   : > { %134 = sbr.rel (%p131_p3) target bundleno = 601 (0x259), region = 28 }
   0xe   : > { %v6666_v0 = vld [vmem:[%s7885_s1 + $0x4] sm:$0xf]  ;;  %vm216_vm0 = vcmask 1043456   ;;  %s154_s15 = smul.u32 36, %s6617_s9  ;;  %v6676_v1 = vld [vmem:[%s7885_s1] sm:$0xf] }
   0xf   : > { %5818 = vmatprep.subr.msk.mxu0 %vm216_vm0, %v6666_v0  ;;  %5944 = vmatprep.subr.msk.mxu1 %vm216_vm0, %v6666_v0  ;;  %vm191_vm1 = vcmask 31744   ;;  %v6717_v8 = vld [vmem:[%s7885_s1 + $0x8] sm:$0xf]  ;;  %v6797_v22 = vld [vmem:[%s7885_s1 + $0xc] sm:$0xf]  ;;  %vm170_vm2 = vcmask 64512  }
  0x10   : > { %5819 = vmatpush3.msk.msra.mxu0 %vm216_vm0, %v6666_v0  ;;  %p155_p4 = scmp.lt.s32.totalorder %s154_s15, 71  ;;  %5945 = vmatpush3.msk.msra.mxu1 %vm216_vm0, %v6666_v0  ;;  %v6863_v31 = vld [vmem:[%s7885_s1 + $0x10] sm:$0xf]  ;;  %v6941_v43 = vld [vmem:[%s7885_s1 + $0x14] sm:$0xf]  ;;  %p162_p5 = scmp.lt.s32.totalorder %s6617_s9, 1 }
  0x11   : > { %5832 = vmatprep.subr.msk.mxu0 %vm216_vm0, %v6676_v1  ;;  %5958 = vmatprep.subr.msk.mxu1 %vm216_vm0, %v6676_v1  ;;  %7903 = vst [vmem:[#allocation3_spill] sm:$0xff] %v6863_v31  ;;  %7904 = vst [vmem:[#allocation4_spill] sm:$0xff] %v6941_v43  ;;  %v7025_v57 = vld [vmem:[%s7885_s1 + $0x18] sm:$0xf]  ;;  %vm4976_vm3 = vcmask 57344  }
  0x12   : > { %s7923_s15 = smov (!%p155_p4, %s154_s15), 71  ;;  %7905 = vst [vmem:[#allocation5_spill] sm:$0xff] %v7025_v57  ;;  %s7925_s9 = smov (!%p162_p5, %s6617_s9), 1 }
  0x13   : > { %s5493_s18 = sshll.u32 %s7923_s15, 4  ;;  %s5054_s8 = sshll.u32 %s7925_s9, 3 }
  0x14   : > { %s6689_s21 = scalar_lea.vmem %s7884_s0, %s5493_s18  ;;  %s7697_s15 = scalar_lea.vmem %s7886_s2, %s5054_s8 }
  0x15   : > { %v5055_v2 = vld [vmem:[%s6689_s21 + $0x90] sm:$0xff]  ;;  %v6693_v3 = vld [vmem:[%s6689_s21 + $0x1] sm:$0xff] }
  0x16   : > { %v6696_v4 = vld [vmem:[%s6689_s21 + $0xa0] sm:$0xff]  ;;  %5820 = vmatprep.mubr.msk.f32.mxu0 %vm191_vm1, %v5055_v2  ;;  %5946 = vmatprep.mubr.msk.f32.mxu1 %vm191_vm1, %v6693_v3  ;;  %v6702_v5 = vld [vmem:[%s6689_s21 + $0x11] sm:$0xff] }
  0x17   : > { %v6705_v6 = vld [vmem:[%s6689_s21 + $0xb0] sm:$0xff]  ;;  %v6708_v7 = vld [vmem:[%s6689_s21 + $0x21] sm:$0xff]  ;;  %5821 = vmatmul.mubr.msk.f32.vlgmr.msra.gmra.mrb[0].mxu0 %vm191_vm1, %v6696_v4  ;;  %5947 = vmatmul.mubr.msk.f32.vlgmr.msra.gmra.mrb[0].mxu1 %vm191_vm1, %v6702_v5 }
  0x18   : > { %5833 = vmatpush3.msk.msra.mxu0 %vm216_vm0, %v6676_v1  ;;  %5959 = vmatpush3.msk.msra.mxu1 %vm216_vm0, %v6676_v1  ;;  %v6724_v9 = vld [vmem:[%s6689_s21 + $0xc0] sm:$0xff]  ;;  %v6727_v10 = vld [vmem:[%s6689_s21 + $0x31] sm:$0xff] }
  0x19   : > { %5823 = vmatprep.mubr.msk.f32.mxu0 %vm191_vm1, %v6705_v6  ;;  %5949 = vmatprep.mubr.msk.f32.mxu1 %vm191_vm1, %v6708_v7  ;;  %v6734_v11 = vld [vmem:[%s6689_s21 + $0xd0] sm:$0xff]  ;;  %v6737_v12 = vld [vmem:[%s6689_s21 + $0x41] sm:$0xff] }
  0x1a   : > { %5846 = vmatprep.subr.msk.mxu0 %vm216_vm0, %v6717_v8  ;;  %5972 = vmatprep.subr.msk.mxu1 %vm216_vm0, %v6717_v8  ;;  %v6752_v13 = vld [vmem:[%s6689_s21 + $0xe0] sm:$0xff]  ;;  %v6755_v14 = vld [vmem:[%s6689_s21 + $0x51] sm:$0xff] }
  0x1b   : > { %5824 = vmatmul.mubr.msk.f32.gmra.mrb[2].mxu0 %vm191_vm1, %v6724_v9  ;;  %5950 = vmatmul.mubr.msk.f32.gmra.mrb[2].mxu1 %vm191_vm1, %v6727_v10  ;;  %v6758_v15 = vld [vmem:[%s6689_s21 + $0xf0] sm:$0xff]  ;;  %v6761_v16 = vld [vmem:[%s6689_s21 + $0x61] sm:$0xff] }
  0x1c   : > { %5826 = vmatprep.mubr.msk.f32.mxu0 %vm191_vm1, %v6734_v11  ;;  %5952 = vmatprep.mubr.msk.f32.mxu1 %vm191_vm1, %v6737_v12  ;;  %v6772_v17 = vld [vmem:[%s6689_s21 + $0x100] sm:$0xff]  ;;  %v6775_v18 = vld [vmem:[%s6689_s21 + $0x71] sm:$0xff] }
  0x1d   : > { %v173_v19 = vld [vmem:[%s6689_s21] sm:$0xff]  ;;  %v6785_v20 = vld [vmem:[%s6689_s21 + $0x10] sm:$0xff] }
  0x1e   : > { %v6788_v21 = vld [vmem:[%s6689_s21 + $0x20] sm:$0xff]  ;;  %v6804_v23 = vld [vmem:[%s6689_s21 + $0x30] sm:$0xff] }
  0x1f   : > { %5827 = vmatmul.mubr.msk.f32.gmra.mrb[4].mxu0 %vm191_vm1, %v6752_v13  ;;  %5953 = vmatmul.mubr.msk.f32.gmra.mrb[4].mxu1 %vm191_vm1, %v6755_v14  ;;  %v6811_v24 = vld [vmem:[%s6689_s21 + $0x40] sm:$0xff]  ;;  %v6826_v25 = vld [vmem:[%s6689_s21 + $0x50] sm:$0xff] }
  0x20   : > { %5829 = vmatprep.mubr.msk.f32.mxu0 %vm191_vm1, %v6758_v15  ;;  %5955 = vmatprep.mubr.msk.f32.mxu1 %vm191_vm1, %v6761_v16  ;;  %7902 = vst [vmem:[#allocation2_spill] sm:$0xff] %v6811_v24  ;;  %v6829_v26 = vld [vmem:[%s6689_s21 + $0x60] sm:$0xff]  ;;  %v6840_v27 = vld [vmem:[%s6689_s21 + $0x70] sm:$0xff] }
  0x21   : > { %v5210_v28 = vld [vmem:[%s6689_s21 + $0x91] sm:$0xff]  ;;  %v6851_v29 = vld [vmem:[%s6689_s21 + $0xa1] sm:$0xff] }
  0x22   : > { %v6854_v30 = vld [vmem:[%s6689_s21 + $0xb1] sm:$0xff]  ;;  %v6870_v32 = vld [vmem:[%s6689_s21 + $0xc1] sm:$0xff] }
  0x23   : > { %5830 = vmatmul.mubr.msk.f32.gmra.mrb[6].mxu0 %vm191_vm1, %v6772_v17  ;;  %5956 = vmatmul.mubr.msk.f32.gmra.mrb[6].mxu1 %vm191_vm1, %v6775_v18  ;;  %v6877_v33 = vld [vmem:[%s6689_s21 + $0xd1] sm:$0xff]  ;;  %v6892_v34 = vld [vmem:[%s6689_s21 + $0xe1] sm:$0xff] }
  0x24   : > { %5834 = vmatprep.mubr.msk.f32.mxu0 %vm191_vm1, %v173_v19  ;;  %5960 = vmatprep.mubr.msk.f32.mxu1 %vm191_vm1, %v5055_v2  ;;  %v6895_v35 = vld [vmem:[%s6689_s21 + $0xf1] sm:$0xff]  ;;  %v6906_v36 = vld [vmem:[%s6689_s21 + $0x101] sm:$0xff]  ;;  %v7094_v19 = vld [vmem:[%s7885_s1 + $0x1c] sm:$0xf] }
  0x25   : > { %v6909_v37 = vld [vmem:[%s6689_s21 + $0x120] sm:$0xff]  ;;  %v6912_v38 = vld [vmem:[%s6689_s21 + $0x1b0] sm:$0xff]  ;;  %7906 = vst [vmem:[#allocation6_spill] sm:$0xff] %v7094_v19 }
  0x26   : > { %v6923_v39 = vld [vmem:[%s6689_s21 + $0x130] sm:$0xff]  ;;  %v6926_v40 = vld [vmem:[%s6689_s21 + $0x1c0] sm:$0xff] }
  0x27   : > { %5835 = vmatmul.mubr.msk.f32.vlgmr.msra.gmra.mrb[0].mxu0 %vm191_vm1, %v6785_v20  ;;  %5961 = vmatmul.mubr.msk.f32.vlgmr.msra.gmra.mrb[0].mxu1 %vm191_vm1, %v6696_v4  ;;  %v6929_v41 = vld [vmem:[%s6689_s21 + $0x140] sm:$0xff]  ;;  %v6932_v42 = vld [vmem:[%s6689_s21 + $0x1d0] sm:$0xff] }
  0x28   : > { %5847 = vmatpush3.msk.msra.mxu0 %vm216_vm0, %v6717_v8  ;;  %5973 = vmatpush3.msk.msra.mxu1 %vm216_vm0, %v6717_v8  ;;  %v6948_v44 = vld [vmem:[%s6689_s21 + $0x150] sm:$0xff]  ;;  %v6951_v45 = vld [vmem:[%s6689_s21 + $0x1e0] sm:$0xff] }
  0x29   : > { %5837 = vmatprep.mubr.msk.f32.mxu0 %vm191_vm1, %v6788_v21  ;;  %5963 = vmatprep.mubr.msk.f32.mxu1 %vm191_vm1, %v6705_v6  ;;  %v6958_v46 = vld [vmem:[%s6689_s21 + $0x160] sm:$0xff]  ;;  %v6961_v47 = vld [vmem:[%s6689_s21 + $0x1f0] sm:$0xff] }
  0x2a   : > { %5860 = vmatprep.subr.msk.mxu0 %vm216_vm0, %v6797_v22  ;;  %5986 = vmatprep.subr.msk.mxu1 %vm216_vm0, %v6797_v22  ;;  %v6976_v48 = vld [vmem:[%s6689_s21 + $0x170] sm:$0xff]  ;;  %v6979_v49 = vld [vmem:[%s6689_s21 + $0x200] sm:$0xff] }
  0x2b   : > { %5838 = vmatmul.mubr.msk.f32.gmra.mrb[2].mxu0 %vm191_vm1, %v6804_v23  ;;  %5964 = vmatmul.mubr.msk.f32.gmra.mrb[2].mxu1 %vm191_vm1, %v6724_v9  ;;  %v6982_v50 = vld [vmem:[%s6689_s21 + $0x180] sm:$0xff]  ;;  %v6985_v51 = vld [vmem:[%s6689_s21 + $0x210] sm:$0xff] }
  0x2c   : > { %5840 = vmatprep.mubr.msk.f32.mxu0 %vm191_vm1, %v6811_v24  ;;  %5966 = vmatprep.mubr.msk.f32.mxu1 %vm191_vm1, %v6734_v11  ;;  %v6996_v52 = vld [vmem:[%s6689_s21 + $0x190] sm:$0xff]  ;;  %v6999_v53 = vld [vmem:[%s6689_s21 + $0x220] sm:$0xff] }
  0x2d   : > { %v7002_v54 = vld [vmem:[%s6689_s21 + $0x121] sm:$0xff]  ;;  %v7013_v55 = vld [vmem:[%s6689_s21 + $0x131] sm:$0xff] }
  0x2e   : > { %v7016_v56 = vld [vmem:[%s6689_s21 + $0x141] sm:$0xff]  ;;  %v7032_v58 = vld [vmem:[%s6689_s21 + $0x151] sm:$0xff] }
  0x2f   : > { %5841 = vmatmul.mubr.msk.f32.gmra.mrb[4].mxu0 %vm191_vm1, %v6826_v25  ;;  %5967 = vmatmul.mubr.msk.f32.gmra.mrb[4].mxu1 %vm191_vm1, %v6752_v13  ;;  %v7039_v59 = vld [vmem:[%s6689_s21 + $0x161] sm:$0xff]  ;;  %v7054_v60 = vld [vmem:[%s6689_s21 + $0x171] sm:$0xff] }
  0x30   : > { %5843 = vmatprep.mubr.msk.f32.mxu0 %vm191_vm1, %v6829_v26  ;;  %5969 = vmatprep.mubr.msk.f32.mxu1 %vm191_vm1, %v6758_v15  ;;  %v7057_v61 = vld [vmem:[%s6689_s21 + $0x181] sm:$0xff]  ;;  %v7068_v62 = vld [vmem:[%s6689_s21 + $0x191] sm:$0xff] }
  0x31   : > { %v7071_v63 = vld [vmem:[%s6689_s21 + $0x1b1] sm:$0xff]  ;;  %v7082_v2 = vld [vmem:[%s6689_s21 + $0x1c1] sm:$0xff] }
  0x33   : > { %5844 = vmatmul.mubr.msk.f32.gmra.mrb[6].mxu0 %vm191_vm1, %v6840_v27  ;;  %5970 = vmatmul.mubr.msk.f32.gmra.mrb[6].mxu1 %vm191_vm1, %v6772_v17 }
  0x34   : > { %5848 = vmatprep.mubr.msk.f32.mxu0 %vm191_vm1, %v6693_v3  ;;  %5974 = vmatprep.mubr.msk.f32.mxu1 %vm191_vm1, %v5210_v28  ;;  %v7085_v3 = vld [vmem:[%s6689_s21 + $0x1d1] sm:$0xff]  ;;  %v7101_v28 = vld [vmem:[%s6689_s21 + $0x1e1] sm:$0xff] }
  0x35   : > { %7907 = vst [vmem:[#allocation7_spill] sm:$0xff] %v7101_v28 }
  0x37   : > { %5849 = vmatmul.mubr.msk.f32.vlgmr.msra.gmra.mrb[0].mxu0 %vm191_vm1, %v6702_v5  ;;  %5975 = vmatmul.mubr.msk.f32.vlgmr.msra.gmra.mrb[0].mxu1 %vm191_vm1, %v6851_v29 }
  0x38   : > { %5861 = vmatpush3.msk.msra.mxu0 %vm216_vm0, %v6797_v22  ;;  %5987 = vmatpush3.msk.msra.mxu1 %vm216_vm0, %v6797_v22 }
  0x39   : > { %5851 = vmatprep.mubr.msk.f32.mxu0 %vm191_vm1, %v6708_v7  ;;  %5977 = vmatprep.mubr.msk.f32.mxu1 %vm191_vm1, %v6854_v30 }
  0x3a   : > { %5874 = vmatprep.subr.msk.mxu0 %vm216_vm0, %v6863_v31  ;;  %6000 = vmatprep.subr.msk.mxu1 %vm216_vm0, %v6863_v31 }
  0x3b   : > { %5852 = vmatmul.mubr.msk.f32.gmra.mrb[2].mxu0 %vm191_vm1, %v6727_v10  ;;  %5978 = vmatmul.mubr.msk.f32.gmra.mrb[2].mxu1 %vm191_vm1, %v6870_v32 }
  0x3c   : > { %5854 = vmatprep.mubr.msk.f32.mxu0 %vm191_vm1, %v6737_v12  ;;  %5980 = vmatprep.mubr.msk.f32.mxu1 %vm191_vm1, %v6877_v33 }
  0x3f   : > { %5855 = vmatmul.mubr.msk.f32.gmra.mrb[4].mxu0 %vm191_vm1, %v6755_v14  ;;  %5981 = vmatmul.mubr.msk.f32.gmra.mrb[4].mxu1 %vm191_vm1, %v6892_v34 }
  0x40   : > { %5857 = vmatprep.mubr.msk.f32.mxu0 %vm191_vm1, %v6761_v16  ;;  %5983 = vmatprep.mubr.msk.f32.mxu1 %vm191_vm1, %v6895_v35 }
  0x43   : > { %5858 = vmatmul.mubr.msk.f32.gmra.mrb[6].mxu0 %vm191_vm1, %v6775_v18  ;;  %5984 = vmatmul.mubr.msk.f32.gmra.mrb[6].mxu1 %vm191_vm1, %v6906_v36 }
  0x44   : > { %5862 = vmatprep.mubr.msk.f32.mxu0 %vm191_vm1, %v6909_v37  ;;  %5988 = vmatprep.mubr.msk.f32.mxu1 %vm191_vm1, %v6912_v38 }
  0x47   : > { %5863 = vmatmul.mubr.msk.f32.vlgmr.msra.gmra.mrb[0].mxu0 %vm191_vm1, %v6923_v39  ;;  %5989 = vmatmul.mubr.msk.f32.vlgmr.msra.gmra.mrb[0].mxu1 %vm191_vm1, %v6926_v40 }
  0x48   : > { %5875 = vmatpush3.msk.msra.mxu0 %vm216_vm0, %v6863_v31  ;;  %6001 = vmatpush3.msk.msra.mxu1 %vm216_vm0, %v6863_v31  ;;  %v7126_v31 = vld [vmem:[%s6689_s21 + $0x211] sm:$0xff] }
  0x49   : > { %5865 = vmatprep.mubr.msk.f32.mxu0 %vm191_vm1, %v6929_v41  ;;  %5991 = vmatprep.mubr.msk.f32.mxu1 %vm191_vm1, %v6932_v42  ;;  %7908 = vst [vmem:[#allocation8_spill] sm:$0xff] %v7126_v31 }
  0x4a   : > { %5888 = vmatprep.subr.msk.mxu0 %vm216_vm0, %v6941_v43  ;;  %6014 = vmatprep.subr.msk.mxu1 %vm216_vm0, %v6941_v43 }
  0x4b   : > { %5866 = vmatmul.mubr.msk.f32.gmra.mrb[2].mxu0 %vm191_vm1, %v6948_v44  ;;  %5992 = vmatmul.mubr.msk.f32.gmra.mrb[2].mxu1 %vm191_vm1, %v6951_v45 }
  0x4c   : > { %5868 = vmatprep.mubr.msk.f32.mxu0 %vm191_vm1, %v6958_v46  ;;  %5994 = vmatprep.mubr.msk.f32.mxu1 %vm191_vm1, %v6961_v47 }
  0x4f   : > { %5869 = vmatmul.mubr.msk.f32.gmra.mrb[4].mxu0 %vm191_vm1, %v6976_v48  ;;  %5995 = vmatmul.mubr.msk.f32.gmra.mrb[4].mxu1 %vm191_vm1, %v6979_v49 }
  0x50   : > { %5871 = vmatprep.mubr.msk.f32.mxu0 %vm191_vm1, %v6982_v50  ;;  %5997 = vmatprep.mubr.msk.f32.mxu1 %vm191_vm1, %v6985_v51 }
  0x53   : > { %5872 = vmatmul.mubr.msk.f32.gmra.mrb[6].mxu0 %vm191_vm1, %v6996_v52  ;;  %5998 = vmatmul.mubr.msk.f32.gmra.mrb[6].mxu1 %vm191_vm1, %v6999_v53 }
  0x54   : > { %5876 = vmatprep.mubr.msk.f32.mxu0 %vm191_vm1, %v6912_v38  ;;  %6002 = vmatprep.mubr.msk.f32.mxu1 %vm191_vm1, %v7002_v54 }
  0x57   : > { %5877 = vmatmul.mubr.msk.f32.vlgmr.msra.gmra.mrb[0].mxu0 %vm191_vm1, %v6926_v40  ;;  %6003 = vmatmul.mubr.msk.f32.vlgmr.msra.gmra.mrb[0].mxu1 %vm191_vm1, %v7013_v55 }
  0x58   : > { %5889 = vmatpush3.msk.msra.mxu0 %vm216_vm0, %v6941_v43  ;;  %6015 = vmatpush3.msk.msra.mxu1 %vm216_vm0, %v6941_v43  ;;  %v7108_v43 = vld [vmem:[%s6689_s21 + $0x1f1] sm:$0xff] }
  0x59   : > { %5879 = vmatprep.mubr.msk.f32.mxu0 %vm191_vm1, %v6932_v42  ;;  %6005 = vmatprep.mubr.msk.f32.mxu1 %vm191_vm1, %v7016_v56 }
  0x5a   : > { %5902 = vmatprep.subr.msk.mxu0 %vm216_vm0, %v7025_v57  ;;  %6028 = vmatprep.subr.msk.mxu1 %vm216_vm0, %v7025_v57 }
  0x5b   : > { %5880 = vmatmul.mubr.msk.f32.gmra.mrb[2].mxu0 %vm191_vm1, %v6951_v45  ;;  %6006 = vmatmul.mubr.msk.f32.gmra.mrb[2].mxu1 %vm191_vm1, %v7032_v58 }
  0x5c   : > { %5882 = vmatprep.mubr.msk.f32.mxu0 %vm191_vm1, %v6961_v47  ;;  %6008 = vmatprep.mubr.msk.f32.mxu1 %vm191_vm1, %v7039_v59 }
  0x5f   : > { %5883 = vmatmul.mubr.msk.f32.gmra.mrb[4].mxu0 %vm191_vm1, %v6979_v49  ;;  %6009 = vmatmul.mubr.msk.f32.gmra.mrb[4].mxu1 %vm191_vm1, %v7054_v60 }
  0x60   : > { %5885 = vmatprep.mubr.msk.f32.mxu0 %vm191_vm1, %v6985_v51  ;;  %6011 = vmatprep.mubr.msk.f32.mxu1 %vm191_vm1, %v7057_v61 }
  0x63   : > { %5886 = vmatmul.mubr.msk.f32.gmra.mrb[6].mxu0 %vm191_vm1, %v6999_v53  ;;  %6012 = vmatmul.mubr.msk.f32.gmra.mrb[6].mxu1 %vm191_vm1, %v7068_v62 }
  0x64   : > { %5890 = vmatprep.mubr.msk.f32.mxu0 %vm191_vm1, %v7002_v54  ;;  %6016 = vmatprep.mubr.msk.f32.mxu1 %vm191_vm1, %v7071_v63 }
  0x67   : > { %5891 = vmatmul.mubr.msk.f32.vlgmr.msra.gmra.mrb[0].mxu0 %vm191_vm1, %v7013_v55  ;;  %6017 = vmatmul.mubr.msk.f32.vlgmr.msra.gmra.mrb[0].mxu1 %vm191_vm1, %v7082_v2 }
  0x68   : > { %5903 = vmatpush3.msk.msra.mxu0 %vm216_vm0, %v7025_v57  ;;  %6029 = vmatpush3.msk.msra.mxu1 %vm216_vm0, %v7025_v57  ;;  %v7123_v57 = vld [vmem:[%s6689_s21 + $0x201] sm:$0xff] }
  0x69   : > { %5893 = vmatprep.mubr.msk.f32.mxu0 %vm191_vm1, %v7016_v56  ;;  %6019 = vmatprep.mubr.msk.f32.mxu1 %vm191_vm1, %v7085_v3 }
  0x6a   : > { %5916 = vmatprep.subr.msk.mxu0 %vm216_vm0, %v7094_v19  ;;  %6042 = vmatprep.subr.msk.mxu1 %vm216_vm0, %v7094_v19 }
  0x6b   : > { %5894 = vmatmul.mubr.msk.f32.gmra.mrb[2].mxu0 %vm191_vm1, %v7032_v58  ;;  %6020 = vmatmul.mubr.msk.f32.gmra.mrb[2].mxu1 %vm191_vm1, %v7101_v28  ;;  %v7137_v28 = vld [vmem:[%s6689_s21 + $0x221] sm:$0xff] }
  0x6c   : > { %5896 = vmatprep.mubr.msk.f32.mxu0 %vm191_vm1, %v7039_v59  ;;  %6022 = vmatprep.mubr.msk.f32.mxu1 %vm191_vm1, %v7108_v43 }
  0x6f   : > { %5897 = vmatmul.mubr.msk.f32.gmra.mrb[4].mxu0 %vm191_vm1, %v7054_v60  ;;  %6023 = vmatmul.mubr.msk.f32.gmra.mrb[4].mxu1 %vm191_vm1, %v7123_v57 }
  0x70   : > { %5899 = vmatprep.mubr.msk.f32.mxu0 %vm191_vm1, %v7057_v61  ;;  %6025 = vmatprep.mubr.msk.f32.mxu1 %vm191_vm1, %v7126_v31  ;;  %v7154_v31 = vld [vmem:[%s7885_s1 + $0x20] sm:$0xf] }
  0x71   : > { %7909 = vst [vmem:[#allocation9_spill] sm:$0xff] %v7154_v31 }
  0x73   : > { %5900 = vmatmul.mubr.msk.f32.gmra.mrb[6].mxu0 %vm191_vm1, %v7068_v62  ;;  %6026 = vmatmul.mubr.msk.f32.gmra.mrb[6].mxu1 %vm191_vm1, %v7137_v28 }
  0x74   : > { %5904 = vmatprep.mubr.msk.f32.mxu0 %vm191_vm1, %v6785_v20  ;;  %6030 = vmatprep.mubr.msk.f32.mxu1 %vm191_vm1, %v6696_v4 }
  0x77   : > { %5905 = vmatmul.mubr.msk.f32.vlgmr.msra.gmra.mrb[0].mxu0 %vm191_vm1, %v6788_v21  ;;  %6031 = vmatmul.mubr.msk.f32.vlgmr.msra.gmra.mrb[0].mxu1 %vm191_vm1, %v6705_v6 }
  0x78   : > { %5917 = vmatpush3.msk.msra.mxu0 %vm216_vm0, %v7094_v19  ;;  %6043 = vmatpush3.msk.msra.mxu1 %vm216_vm0, %v7094_v19  ;;  %v7185_v19 = vld [vmem:[%s6689_s21 + $0x80] sm:$0xff] }
  0x79   : > { %5907 = vmatprep.mubr.msk.f32.mxu0 %vm191_vm1, %v6804_v23  ;;  %6033 = vmatprep.mubr.msk.f32.mxu1 %vm191_vm1, %v6724_v9 }
  0x7a   : > { %5930 = vmatprep.subr.msk.mxu0 %vm216_vm0, %v7154_v31  ;;  %6056 = vmatprep.subr.msk.mxu1 %vm216_vm0, %v7154_v31 }
  0x7b   : > { %5908 = vmatmul.mubr.msk.f32.gmra.mrb[2].mxu0 %vm191_vm1, %v6811_v24  ;;  %6034 = vmatmul.mubr.msk.f32.gmra.mrb[2].mxu1 %vm191_vm1, %v6734_v11  ;;  %v7188_v24 = vld [vmem:[%s6689_s21 + $0x110] sm:$0xff] }
  0x7c   : > { %5910 = vmatprep.mubr.msk.f32.mxu0 %vm191_vm1, %v6826_v25  ;;  %6036 = vmatprep.mubr.msk.f32.mxu1 %vm191_vm1, %v6752_v13 }
  0x7f   : > { %5911 = vmatmul.mubr.msk.f32.gmra.mrb[4].mxu0 %vm191_vm1, %v6829_v26  ;;  %6037 = vmatmul.mubr.msk.f32.gmra.mrb[4].mxu1 %vm191_vm1, %v6758_v15 }
  0x80   : > { %5913 = vmatprep.mubr.msk.f32.mxu0 %vm191_vm1, %v6840_v27  ;;  %6039 = vmatprep.mubr.msk.f32.mxu1 %vm191_vm1, %v6772_v17 }
  0x83   : > { %5914 = vmatmul.mubr.msk.f32.gmra.mrb[6].mxu0 %vm191_vm1, %v7185_v19  ;;  %6040 = vmatmul.mubr.msk.f32.gmra.mrb[6].mxu1 %vm191_vm1, %v7188_v24 }
  0x84   : > { %5918 = vmatprep.mubr.msk.f32.mxu0 %vm191_vm1, %v6696_v4  ;;  %6044 = vmatprep.mubr.msk.f32.mxu1 %vm191_vm1, %v6702_v5 }
  0x87   : > { %5919 = vmatmul.mubr.msk.f32.vlgmr.msra.gmra.mrb[0].mxu0 %vm191_vm1, %v6705_v6  ;;  %6045 = vmatmul.mubr.msk.f32.vlgmr.msra.gmra.mrb[0].mxu1 %vm191_vm1, %v6708_v7 }
  0x88   : > { %5931 = vmatpush3.msk.msra.mxu0 %vm216_vm0, %v7154_v31  ;;  %6057 = vmatpush3.msk.msra.mxu1 %vm216_vm0, %v7154_v31  ;;  %v7231_v31 = vld [vmem:[%s6689_s21 + $0x81] sm:$0xff] }
  0x89   : > { %5921 = vmatprep.mubr.msk.f32.mxu0 %vm191_vm1, %v6724_v9  ;;  %6047 = vmatprep.mubr.msk.f32.mxu1 %vm191_vm1, %v6727_v10 }
  0x8a   : > { %6070 = vmatprep.subr.msk.mxu0 %vm216_vm0, %v6666_v0  ;;  %6196 = vmatprep.subr.msk.mxu1 %vm216_vm0, %v6666_v0 }
  0x8b   : > { %5922 = vmatmul.mubr.msk.f32.gmra.mrb[2].mxu0 %vm191_vm1, %v6734_v11  ;;  %6048 = vmatmul.mubr.msk.f32.gmra.mrb[2].mxu1 %vm191_vm1, %v6737_v12 }
  0x8c   : > { %5924 = vmatprep.mubr.msk.f32.mxu0 %vm191_vm1, %v6752_v13  ;;  %6050 = vmatprep.mubr.msk.f32.mxu1 %vm191_vm1, %v6755_v14 }
  0x8f   : > { %5925 = vmatmul.mubr.msk.f32.gmra.mrb[4].mxu0 %vm191_vm1, %v6758_v15  ;;  %6051 = vmatmul.mubr.msk.f32.gmra.mrb[4].mxu1 %vm191_vm1, %v6761_v16 }
  0x90   : > { %5927 = vmatprep.mubr.msk.f32.mxu0 %vm191_vm1, %v6772_v17  ;;  %6053 = vmatprep.mubr.msk.f32.mxu1 %vm191_vm1, %v6775_v18 }
  0x93   : > { %5928 = vmatmul.mubr.msk.f32.gmra.mrb[6].mxu0 %vm191_vm1, %v7188_v24  ;;  %6054 = vmatmul.mubr.msk.f32.gmra.mrb[6].mxu1 %vm191_vm1, %v7231_v31 }
  0x94   : > { %5932 = vmatprep.mubr.msk.f32.mxu0 %vm191_vm1, %v6702_v5  ;;  %6058 = vmatprep.mubr.msk.f32.mxu1 %vm191_vm1, %v6851_v29 }
  0x97   : > { %5933 = vmatmul.mubr.msk.f32.vlgmr.msra.gmra.mrb[0].mxu0 %vm191_vm1, %v6708_v7  ;;  %6059 = vmatmul.mubr.msk.f32.vlgmr.msra.gmra.mrb[0].mxu1 %vm191_vm1, %v6854_v30 }
  0x98   : > { %6071 = vmatpush3.msk.msra.mxu0 %vm216_vm0, %v6666_v0  ;;  %6197 = vmatpush3.msk.msra.mxu1 %vm216_vm0, %v6666_v0  ;;  %v7274_v0 = vld [vmem:[%s6689_s21 + $0x111] sm:$0xff] }
  0x99   : > { %5935 = vmatprep.mubr.msk.f32.mxu0 %vm191_vm1, %v6727_v10  ;;  %6061 = vmatprep.mubr.msk.f32.mxu1 %vm191_vm1, %v6870_v32 }
  0x9a   : > { %6084 = vmatprep.subr.msk.mxu0 %vm216_vm0, %v6676_v1  ;;  %6210 = vmatprep.subr.msk.mxu1 %vm216_vm0, %v6676_v1 }
  0x9b   : > { %5936 = vmatmul.mubr.msk.f32.gmra.mrb[2].mxu0 %vm191_vm1, %v6737_v12  ;;  %6062 = vmatmul.mubr.msk.f32.gmra.mrb[2].mxu1 %vm191_vm1, %v6877_v33 }
  0x9c   : > { %5938 = vmatprep.mubr.msk.f32.mxu0 %vm191_vm1, %v6755_v14  ;;  %6064 = vmatprep.mubr.msk.f32.mxu1 %vm191_vm1, %v6892_v34 }
  0x9f   : > { %5939 = vmatmul.mubr.msk.f32.gmra.mrb[4].mxu0 %vm191_vm1, %v6761_v16  ;;  %6065 = vmatmul.mubr.msk.f32.gmra.mrb[4].mxu1 %vm191_vm1, %v6895_v35 }
  0xa0   : > { %5941 = vmatprep.mubr.msk.f32.mxu0 %vm191_vm1, %v6775_v18  ;;  %6067 = vmatprep.mubr.msk.f32.mxu1 %vm191_vm1, %v6906_v36 }
  0xa3   : > { %5942 = vmatmul.mubr.msk.f32.gmra.mrb[6].mxu0 %vm191_vm1, %v7231_v31  ;;  %6068 = vmatmul.mubr.msk.f32.gmra.mrb[6].mxu1 %vm191_vm1, %v7274_v0 }
  0xa4   : > { %6072 = vmatprep.mubr.msk.f32.mxu0 %vm191_vm1, %v6912_v38  ;;  %6198 = vmatprep.mubr.msk.f32.mxu1 %vm191_vm1, %v7002_v54 }
  0xa7   : > { %6073 = vmatmul.mubr.msk.f32.vlgmr.msra.gmra.mrb[8].mxu0 %vm191_vm1, %v6926_v40  ;;  %6199 = vmatmul.mubr.msk.f32.vlgmr.msra.gmra.mrb[8].mxu1 %vm191_vm1, %v7013_v55 }
  0xa8   : > { %6085 = vmatpush3.msk.msra.mxu0 %vm216_vm0, %v6676_v1  ;;  %6211 = vmatpush3.msk.msra.mxu1 %vm216_vm0, %v6676_v1  ;;  %v7910_v1 = vld [vmem:[#allocation3_spill] sm:$0xff] }
  0xa9   : > { %6075 = vmatprep.mubr.msk.f32.mxu0 %vm191_vm1, %v6932_v42  ;;  %6201 = vmatprep.mubr.msk.f32.mxu1 %vm191_vm1, %v7016_v56 }
  0xaa   : > { %6098 = vmatprep.subr.msk.mxu0 %vm216_vm0, %v6717_v8  ;;  %6224 = vmatprep.subr.msk.mxu1 %vm216_vm0, %v6717_v8 }
  0xab   : > { %6076 = vmatmul.mubr.msk.f32.gmra.mrb[10].mxu0 %vm191_vm1, %v6951_v45  ;;  %6202 = vmatmul.mubr.msk.f32.gmra.mrb[10].mxu1 %vm191_vm1, %v7032_v58 }
  0xac   : > { %6078 = vmatprep.mubr.msk.f32.mxu0 %vm191_vm1, %v6961_v47  ;;  %6204 = vmatprep.mubr.msk.f32.mxu1 %vm191_vm1, %v7039_v59 }
  0xaf   : > { %6079 = vmatmul.mubr.msk.f32.gmra.mrb[12].mxu0 %vm191_vm1, %v6979_v49  ;;  %6205 = vmatmul.mubr.msk.f32.gmra.mrb[12].mxu1 %vm191_vm1, %v7054_v60 }
  0xb0   : > { %6081 = vmatprep.mubr.msk.f32.mxu0 %vm191_vm1, %v6985_v51  ;;  %6207 = vmatprep.mubr.msk.f32.mxu1 %vm191_vm1, %v7057_v61 }
  0xb3   : > { %6082 = vmatmul.mubr.msk.f32.gmra.mrb[14].mxu0 %vm191_vm1, %v6999_v53  ;;  %6208 = vmatmul.mubr.msk.f32.gmra.mrb[14].mxu1 %vm191_vm1, %v7068_v62 }
  0xb4   : > { %6086 = vmatprep.mubr.msk.f32.mxu0 %vm191_vm1, %v6909_v37  ;;  %6212 = vmatprep.mubr.msk.f32.mxu1 %vm191_vm1, %v6912_v38 }
  0xb7   : > { %6087 = vmatmul.mubr.msk.f32.vlgmr.msra.gmra.mrb[8].mxu0 %vm191_vm1, %v6923_v39  ;;  %6213 = vmatmul.mubr.msk.f32.vlgmr.msra.gmra.mrb[8].mxu1 %vm191_vm1, %v6926_v40 }
  0xb8   : > { %6099 = vmatpush3.msk.msra.mxu0 %vm216_vm0, %v6717_v8  ;;  %6225 = vmatpush3.msk.msra.mxu1 %vm216_vm0, %v6717_v8  ;;  %v7911_v8 = vld [vmem:[#allocation7_spill] sm:$0xff] }
  0xb9   : > { %6089 = vmatprep.mubr.msk.f32.mxu0 %vm191_vm1, %v6929_v41  ;;  %6215 = vmatprep.mubr.msk.f32.mxu1 %vm191_vm1, %v6932_v42 }
  0xba   : > { %6112 = vmatprep.subr.msk.mxu0 %vm216_vm0, %v6797_v22  ;;  %6238 = vmatprep.subr.msk.mxu1 %vm216_vm0, %v6797_v22 }
  0xbb   : > { %6090 = vmatmul.mubr.msk.f32.gmra.mrb[10].mxu0 %vm191_vm1, %v6948_v44  ;;  %6216 = vmatmul.mubr.msk.f32.gmra.mrb[10].mxu1 %vm191_vm1, %v6951_v45 }
  0xbc   : > { %6092 = vmatprep.mubr.msk.f32.mxu0 %vm191_vm1, %v6958_v46  ;;  %6218 = vmatprep.mubr.msk.f32.mxu1 %vm191_vm1, %v6961_v47 }
  0xbf   : > { %6093 = vmatmul.mubr.msk.f32.gmra.mrb[12].mxu0 %vm191_vm1, %v6976_v48  ;;  %6219 = vmatmul.mubr.msk.f32.gmra.mrb[12].mxu1 %vm191_vm1, %v6979_v49 }
  0xc0   : > { %6095 = vmatprep.mubr.msk.f32.mxu0 %vm191_vm1, %v6982_v50  ;;  %6221 = vmatprep.mubr.msk.f32.mxu1 %vm191_vm1, %v6985_v51 }
  0xc3   : > { %6096 = vmatmul.mubr.msk.f32.gmra.mrb[14].mxu0 %vm191_vm1, %v6996_v52  ;;  %6222 = vmatmul.mubr.msk.f32.gmra.mrb[14].mxu1 %vm191_vm1, %v6999_v53 }
  0xc4   : > { %6100 = vmatprep.mubr.msk.f32.mxu0 %vm191_vm1, %v7002_v54  ;;  %6226 = vmatprep.mubr.msk.f32.mxu1 %vm191_vm1, %v7071_v63 }
  0xc7   : > { %6101 = vmatmul.mubr.msk.f32.vlgmr.msra.gmra.mrb[8].mxu0 %vm191_vm1, %v7013_v55  ;;  %6227 = vmatmul.mubr.msk.f32.vlgmr.msra.gmra.mrb[8].mxu1 %vm191_vm1, %v7082_v2 }
  0xc8   : > { %6113 = vmatpush3.msk.msra.mxu0 %vm216_vm0, %v6797_v22  ;;  %6239 = vmatpush3.msk.msra.mxu1 %vm216_vm0, %v6797_v22  ;;  %v7912_v22 = vld [vmem:[#allocation8_spill] sm:$0xff] }
  0xc9   : > { %6103 = vmatprep.mubr.msk.f32.mxu0 %vm191_vm1, %v7016_v56  ;;  %6229 = vmatprep.mubr.msk.f32.mxu1 %vm191_vm1, %v7085_v3 }
  0xca   : > { %6126 = vmatprep.subr.msk.mxu0 %vm216_vm0, %v7910_v1  ;;  %6252 = vmatprep.subr.msk.mxu1 %vm216_vm0, %v7910_v1 }
  0xcb   : > { %6104 = vmatmul.mubr.msk.f32.gmra.mrb[10].mxu0 %vm191_vm1, %v7032_v58  ;;  %6230 = vmatmul.mubr.msk.f32.gmra.mrb[10].mxu1 %vm191_vm1, %v7911_v8 }
  0xcc   : > { %6106 = vmatprep.mubr.msk.f32.mxu0 %vm191_vm1, %v7039_v59  ;;  %6232 = vmatprep.mubr.msk.f32.mxu1 %vm191_vm1, %v7108_v43 }
  0xcf   : > { %6107 = vmatmul.mubr.msk.f32.gmra.mrb[12].mxu0 %vm191_vm1, %v7054_v60  ;;  %6233 = vmatmul.mubr.msk.f32.gmra.mrb[12].mxu1 %vm191_vm1, %v7123_v57 }
  0xd0   : > { %6109 = vmatprep.mubr.msk.f32.mxu0 %vm191_vm1, %v7057_v61  ;;  %6235 = vmatprep.mubr.msk.f32.mxu1 %vm191_vm1, %v7912_v22 }
  0xd3   : > { %6110 = vmatmul.mubr.msk.f32.gmra.mrb[14].mxu0 %vm191_vm1, %v7068_v62  ;;  %6236 = vmatmul.mubr.msk.f32.gmra.mrb[14].mxu1 %vm191_vm1, %v7137_v28 }
  0xd4   : > { %6114 = vmatprep.mubr.msk.f32.mxu0 %vm191_vm1, %v6785_v20  ;;  %6240 = vmatprep.mubr.msk.f32.mxu1 %vm191_vm1, %v6696_v4  ;;  %v7913_v20 = vld [vmem:[#allocation4_spill] sm:$0xff] }
  0xd7   : > { %6115 = vmatmul.mubr.msk.f32.vlgmr.msra.gmra.mrb[8].mxu0 %vm191_vm1, %v6788_v21  ;;  %6241 = vmatmul.mubr.msk.f32.vlgmr.msra.gmra.mrb[8].mxu1 %vm191_vm1, %v6705_v6  ;;  %v7914_v21 = vld [vmem:[#allocation2_spill] sm:$0xff] }
  0xd8   : > { %6127 = vmatpush3.msk.msra.mxu0 %vm216_vm0, %v7910_v1  ;;  %6253 = vmatpush3.msk.msra.mxu1 %vm216_vm0, %v7910_v1 }
  0xd9   : > { %6117 = vmatprep.mubr.msk.f32.mxu0 %vm191_vm1, %v6804_v23  ;;  %6243 = vmatprep.mubr.msk.f32.mxu1 %vm191_vm1, %v6724_v9 }
  0xda   : > { %6140 = vmatprep.subr.msk.mxu0 %vm216_vm0, %v7913_v20  ;;  %6266 = vmatprep.subr.msk.mxu1 %vm216_vm0, %v7913_v20 }
  0xdb   : > { %6118 = vmatmul.mubr.msk.f32.gmra.mrb[10].mxu0 %vm191_vm1, %v7914_v21  ;;  %6244 = vmatmul.mubr.msk.f32.gmra.mrb[10].mxu1 %vm191_vm1, %v6734_v11 }
  0xdc   : > { %6120 = vmatprep.mubr.msk.f32.mxu0 %vm191_vm1, %v6826_v25  ;;  %6246 = vmatprep.mubr.msk.f32.mxu1 %vm191_vm1, %v6752_v13 }
  0xdf   : > { %6121 = vmatmul.mubr.msk.f32.gmra.mrb[12].mxu0 %vm191_vm1, %v6829_v26  ;;  %6247 = vmatmul.mubr.msk.f32.gmra.mrb[12].mxu1 %vm191_vm1, %v6758_v15 }
  0xe0   : > { %6123 = vmatprep.mubr.msk.f32.mxu0 %vm191_vm1, %v6840_v27  ;;  %6249 = vmatprep.mubr.msk.f32.mxu1 %vm191_vm1, %v6772_v17 }
  0xe3   : > { %6124 = vmatmul.mubr.msk.f32.gmra.mrb[14].mxu0 %vm191_vm1, %v7185_v19  ;;  %6250 = vmatmul.mubr.msk.f32.gmra.mrb[14].mxu1 %vm191_vm1, %v7188_v24 }
  0xe4   : > { %6128 = vmatprep.mubr.msk.f32.mxu0 %vm191_vm1, %v6696_v4  ;;  %6254 = vmatprep.mubr.msk.f32.mxu1 %vm191_vm1, %v6702_v5  ;;  %v7915_v4 = vld [vmem:[#allocation5_spill] sm:$0xff] }
  0xe7   : > { %6129 = vmatmul.mubr.msk.f32.vlgmr.msra.gmra.mrb[8].mxu0 %vm191_vm1, %v6705_v6  ;;  %6255 = vmatmul.mubr.msk.f32.vlgmr.msra.gmra.mrb[8].mxu1 %vm191_vm1, %v6708_v7  ;;  %v7917_v6 = vld [vmem:[#allocation9_spill] sm:$0xff] }
  0xe8   : > { %6141 = vmatpush3.msk.msra.mxu0 %vm216_vm0, %v7913_v20  ;;  %6267 = vmatpush3.msk.msra.mxu1 %vm216_vm0, %v7913_v20 }
  0xe9   : > { %6131 = vmatprep.mubr.msk.f32.mxu0 %vm191_vm1, %v6724_v9  ;;  %6257 = vmatprep.mubr.msk.f32.mxu1 %vm191_vm1, %v6727_v10  ;;  %v5375_v9 = vld [vmem:[%s6689_s21 + $0x230] sm:$0xff] }
  0xea   : > { %6154 = vmatprep.subr.msk.mxu0 %vm216_vm0, %v7915_v4  ;;  %6280 = vmatprep.subr.msk.mxu1 %vm216_vm0, %v7915_v4 }
  0xeb   : > { %6132 = vmatmul.mubr.msk.f32.gmra.mrb[10].mxu0 %vm191_vm1, %v6734_v11  ;;  %6258 = vmatmul.mubr.msk.f32.gmra.mrb[10].mxu1 %vm191_vm1, %v6737_v12  ;;  %v5481_v11 = vld [vmem:[%s6689_s21 + $0x231] sm:$0xff] }
  0xec   : > { %6134 = vmatprep.mubr.msk.f32.mxu0 %vm191_vm1, %v6752_v13  ;;  %6260 = vmatprep.mubr.msk.f32.mxu1 %vm191_vm1, %v6755_v14 }
  0xef   : > { %6135 = vmatmul.mubr.msk.f32.gmra.mrb[12].mxu0 %vm191_vm1, %v6758_v15  ;;  %6261 = vmatmul.mubr.msk.f32.gmra.mrb[12].mxu1 %vm191_vm1, %v6761_v16 }
  0xf0   : > { %6137 = vmatprep.mubr.msk.f32.mxu0 %vm191_vm1, %v6772_v17  ;;  %6263 = vmatprep.mubr.msk.f32.mxu1 %vm191_vm1, %v6775_v18 }
  0xf3   : > { %6138 = vmatmul.mubr.msk.f32.gmra.mrb[14].mxu0 %vm191_vm1, %v7188_v24  ;;  %6264 = vmatmul.mubr.msk.f32.gmra.mrb[14].mxu1 %vm191_vm1, %v7231_v31 }
  0xf4   : > { %6142 = vmatprep.mubr.msk.f32.mxu0 %vm191_vm1, %v6702_v5  ;;  %6268 = vmatprep.mubr.msk.f32.mxu1 %vm191_vm1, %v6851_v29  ;;  %v7916_v5 = vld [vmem:[#allocation6_spill] sm:$0xff] }
  0xf7   : > { %6143 = vmatmul.mubr.msk.f32.vlgmr.msra.gmra.mrb[8].mxu0 %vm191_vm1, %v6708_v7  ;;  %6269 = vmatmul.mubr.msk.f32.vlgmr.msra.gmra.mrb[8].mxu1 %vm191_vm1, %v6854_v30  ;;  %v5358_v7 = vld [vmem:[%s6689_s21 + $0x1a0] sm:$0xff] }
  0xf8   : > { %6155 = vmatpush3.msk.msra.mxu0 %vm216_vm0, %v7915_v4  ;;  %6281 = vmatpush3.msk.msra.mxu1 %vm216_vm0, %v7915_v4 }
  0xf9   : > { %6145 = vmatprep.mubr.msk.f32.mxu0 %vm191_vm1, %v6727_v10  ;;  %6271 = vmatprep.mubr.msk.f32.mxu1 %vm191_vm1, %v6870_v32  ;;  %v5392_v10 = vld [vmem:[%s6689_s21 + $0x1a1] sm:$0xff] }
  0xfa   : > { %6168 = vmatprep.subr.msk.mxu0 %vm216_vm0, %v7916_v5  ;;  %6294 = vmatprep.subr.msk.mxu1 %vm216_vm0, %v7916_v5 }
  0xfb   : > { %6146 = vmatmul.mubr.msk.f32.gmra.mrb[10].mxu0 %vm191_vm1, %v6737_v12  ;;  %6272 = vmatmul.mubr.msk.f32.gmra.mrb[10].mxu1 %vm191_vm1, %v6877_v33 }
  0xfc   : > { %6148 = vmatprep.mubr.msk.f32.mxu0 %vm191_vm1, %v6755_v14  ;;  %6274 = vmatprep.mubr.msk.f32.mxu1 %vm191_vm1, %v6892_v34 }
  0xff   : > { %6149 = vmatmul.mubr.msk.f32.gmra.mrb[12].mxu0 %vm191_vm1, %v6761_v16  ;;  %6275 = vmatmul.mubr.msk.f32.gmra.mrb[12].mxu1 %vm191_vm1, %v6895_v35 }
 0x100   : > { %6151 = vmatprep.mubr.msk.f32.mxu0 %vm191_vm1, %v6775_v18  ;;  %6277 = vmatprep.mubr.msk.f32.mxu1 %vm191_vm1, %v6906_v36 }
 0x103   : > { %6152 = vmatmul.mubr.msk.f32.gmra.mrb[14].mxu0 %vm191_vm1, %v7231_v31  ;;  %6278 = vmatmul.mubr.msk.f32.gmra.mrb[14].mxu1 %vm191_vm1, %v7274_v0 }
 0x104   : > { %6156 = vmatprep.mubr.msk.f32.mxu0 %vm191_vm1, %v6923_v39  ;;  %6282 = vmatprep.mubr.msk.f32.mxu1 %vm191_vm1, %v6926_v40 }
 0x107   : > { %6157 = vmatmul.mubr.msk.f32.vlgmr.msra.gmra.mrb[8].mxu0 %vm191_vm1, %v6929_v41  ;;  %6283 = vmatmul.mubr.msk.f32.vlgmr.msra.gmra.mrb[8].mxu1 %vm191_vm1, %v6932_v42 }
 0x108   : > { %6169 = vmatpush3.msk.msra.mxu0 %vm216_vm0, %v7916_v5  ;;  %6295 = vmatpush3.msk.msra.mxu1 %vm216_vm0, %v7916_v5 }
 0x109   : > { %6159 = vmatprep.mubr.msk.f32.mxu0 %vm191_vm1, %v6948_v44  ;;  %6285 = vmatprep.mubr.msk.f32.mxu1 %vm191_vm1, %v6951_v45 }
 0x10a   : > { %6182 = vmatprep.subr.msk.mxu0 %vm216_vm0, %v7917_v6  ;;  %6308 = vmatprep.subr.msk.mxu1 %vm216_vm0, %v7917_v6 }
 0x10b   : > { %6160 = vmatmul.mubr.msk.f32.gmra.mrb[10].mxu0 %vm191_vm1, %v6958_v46  ;;  %6286 = vmatmul.mubr.msk.f32.gmra.mrb[10].mxu1 %vm191_vm1, %v6961_v47 }
 0x10c   : > { %6162 = vmatprep.mubr.msk.f32.mxu0 %vm191_vm1, %v6976_v48  ;;  %6288 = vmatprep.mubr.msk.f32.mxu1 %vm191_vm1, %v6979_v49 }
 0x10f   : > { %6163 = vmatmul.mubr.msk.f32.gmra.mrb[12].mxu0 %vm191_vm1, %v6982_v50  ;;  %6289 = vmatmul.mubr.msk.f32.gmra.mrb[12].mxu1 %vm191_vm1, %v6985_v51 }
 0x110   : > { %6165 = vmatprep.mubr.msk.f32.mxu0 %vm191_vm1, %v6996_v52  ;;  %6291 = vmatprep.mubr.msk.f32.mxu1 %vm191_vm1, %v6999_v53 }
 0x113   : > { %6166 = vmatmul.mubr.msk.f32.gmra.mrb[14].mxu0 %vm191_vm1, %v5358_v7  ;;  %6292 = vmatmul.mubr.msk.f32.gmra.mrb[14].mxu1 %vm191_vm1, %v5375_v9 }
 0x114   : > { %6170 = vmatprep.mubr.msk.f32.mxu0 %vm191_vm1, %v6926_v40  ;;  %6296 = vmatprep.mubr.msk.f32.mxu1 %vm191_vm1, %v7013_v55 }
 0x117   : > { %6171 = vmatmul.mubr.msk.f32.vlgmr.msra.gmra.mrb[8].mxu0 %vm191_vm1, %v6932_v42  ;;  %6297 = vmatmul.mubr.msk.f32.vlgmr.msra.gmra.mrb[8].mxu1 %vm191_vm1, %v7016_v56 }
 0x118   : > { %6183 = vmatpush3.msk.msra.mxu0 %vm216_vm0, %v7917_v6  ;;  %6309 = vmatpush3.msk.msra.mxu1 %vm216_vm0, %v7917_v6  ;;  %v6627_v6 = vmov 0.0  }
 0x119   : > { %6173 = vmatprep.mubr.msk.f32.mxu0 %vm191_vm1, %v6951_v45  ;;  %6299 = vmatprep.mubr.msk.f32.mxu1 %vm191_vm1, %v7032_v58  ;;  %171 = vst.msk [vmem:[%s7697_s15] sm:$0xff] %vm170_vm2, %v6627_v6 }
 0x11b   : > { %6174 = vmatmul.mubr.msk.f32.gmra.mrb[10].mxu0 %vm191_vm1, %v6961_v47  ;;  %6300 = vmatmul.mubr.msk.f32.gmra.mrb[10].mxu1 %vm191_vm1, %v7039_v59 }
 0x11c   : > { %6176 = vmatprep.mubr.msk.f32.mxu0 %vm191_vm1, %v6979_v49  ;;  %6302 = vmatprep.mubr.msk.f32.mxu1 %vm191_vm1, %v7054_v60 }
 0x11f   : > { %6177 = vmatmul.mubr.msk.f32.gmra.mrb[12].mxu0 %vm191_vm1, %v6985_v51  ;;  %6303 = vmatmul.mubr.msk.f32.gmra.mrb[12].mxu1 %vm191_vm1, %v7057_v61 }
 0x120   : > { %6179 = vmatprep.mubr.msk.f32.mxu0 %vm191_vm1, %v6999_v53  ;;  %6305 = vmatprep.mubr.msk.f32.mxu1 %vm191_vm1, %v7068_v62 }
 0x123   : > { %6180 = vmatmul.mubr.msk.f32.gmra.mrb[14].mxu0 %vm191_vm1, %v5375_v9  ;;  %6306 = vmatmul.mubr.msk.f32.gmra.mrb[14].mxu1 %vm191_vm1, %v5392_v10 }
 0x124   : > { %6184 = vmatprep.mubr.msk.f32.mxu0 %vm191_vm1, %v7013_v55  ;;  %6310 = vmatprep.mubr.msk.f32.mxu1 %vm191_vm1, %v7082_v2 }
 0x127   : > { %6185 = vmatmul.mubr.msk.f32.vlgmr.msra.gmra.mrb[8].mxu0 %vm191_vm1, %v7016_v56  ;;  %6311 = vmatmul.mubr.msk.f32.vlgmr.msra.gmra.mrb[8].mxu1 %vm191_vm1, %v7085_v3 }
 0x128   : > { %6187 = vmatprep.mubr.msk.f32.mxu0 %vm191_vm1, %v7032_v58  ;;  %6313 = vmatprep.mubr.msk.f32.mxu1 %vm191_vm1, %v7911_v8 }
 0x12b   : > { %6188 = vmatmul.mubr.msk.f32.gmra.mrb[10].mxu0 %vm191_vm1, %v7039_v59  ;;  %6314 = vmatmul.mubr.msk.f32.gmra.mrb[10].mxu1 %vm191_vm1, %v7108_v43 }
 0x12c   : > { %6190 = vmatprep.mubr.msk.f32.mxu0 %vm191_vm1, %v7054_v60  ;;  %6316 = vmatprep.mubr.msk.f32.mxu1 %vm191_vm1, %v7123_v57 }
 0x12f   : > { %6191 = vmatmul.mubr.msk.f32.gmra.mrb[12].mxu0 %vm191_vm1, %v7057_v61  ;;  %6317 = vmatmul.mubr.msk.f32.gmra.mrb[12].mxu1 %vm191_vm1, %v7912_v22 }
 0x130   : > { %6193 = vmatprep.mubr.msk.f32.mxu0 %vm191_vm1, %v7068_v62  ;;  %6319 = vmatprep.mubr.msk.f32.mxu1 %vm191_vm1, %v7137_v28 }
 0x133   : > { %6194 = vmatmul.mubr.msk.f32.gmra.mrb[14].mxu0 %vm191_vm1, %v5392_v10  ;;  %6320 = vmatmul.mubr.msk.f32.gmra.mrb[14].mxu1 %vm191_vm1, %v5481_v11 }
 0x16a   : > { %v7626_v12 = vpop.f32.mrb[0].mxu0  ;;  %v7628_v13 = vpop.f32.mrb[0].mxu1 }
 0x16b   : > { %v4735_v14 = vsel %vm170_vm2, %v7626_v12, 0.0  ;;  %v4756_v15 = vsel %vm170_vm2, %v7628_v13, 0.0  ;;  %v7634_v16 = vpop.f32.mrb[1].mxu0  ;;  %v7636_v17 = vpop.f32.mrb[1].mxu1 }
 0x16c   : > { %v4734_v18 = vsel %vm170_vm2, %v7634_v16, 0.0  ;;  %v4755_v23 = vsel %vm170_vm2, %v7636_v17, 0.0 }
 0x16d   : > { %v4736_v24 = vadd.f32 %v4735_v14, %v4734_v18  ;;  %v4757_v25 = vadd.f32 %v4756_v15, %v4755_v23 }
 0x16e   : > { %v7642_v26 = vpop.f32.mrb[2].mxu0  ;;  %v7644_v27 = vpop.f32.mrb[2].mxu1 }
 0x16f   : > { %v7646_v29 = vpop.f32.mrb[3].mxu0  ;;  %v7648_v30 = vpop.f32.mrb[3].mxu1  ;;  %v4739_v35 = vsel %vm170_vm2, %v7642_v26, 0.0  ;;  %v4760_v36 = vsel %vm170_vm2, %v7644_v27, 0.0 }
 0x170   : > { %v4737_v31 = vsel %vm170_vm2, %v7646_v29, 0.0  ;;  %v4758_v32 = vsel %vm170_vm2, %v7648_v30, 0.0 }
 0x171   : > { %v4738_v33 = vadd.f32 %v4737_v31, %v4736_v24  ;;  %v4759_v34 = vadd.f32 %v4758_v32, %v4757_v25 }
 0x172   : > { %v7658_v37 = vpop.f32.mrb[4].mxu0  ;;  %v7660_v38 = vpop.f32.mrb[4].mxu1 }
 0x173   : > { %v7662_v39 = vpop.f32.mrb[5].mxu0  ;;  %v4740_v40 = vadd.f32 %v4739_v35, %v4738_v33  ;;  %v7664_v41 = vpop.f32.mrb[5].mxu1  ;;  %v4761_v42 = vadd.f32 %v4760_v36, %v4759_v34  ;;  %v4743_v47 = vsel %vm170_vm2, %v7658_v37, 0.0  ;;  %v4764_v48 = vsel %vm170_vm2, %v7660_v38, 0.0 }
 0x174   : > { %v4741_v43 = vsel %vm170_vm2, %v7662_v39, 0.0  ;;  %v4762_v44 = vsel %vm170_vm2, %v7664_v41, 0.0 }
 0x175   : > { %v4742_v45 = vadd.f32 %v4741_v43, %v4740_v40  ;;  %v4763_v46 = vadd.f32 %v4762_v44, %v4761_v42 }
 0x176   : > { %v7674_v49 = vpop.f32.mrb[6].mxu0  ;;  %v7676_v50 = vpop.f32.mrb[6].mxu1 }
 0x177   : > { %v7678_v51 = vpop.f32.mrb[7].mxu0  ;;  %v4744_v52 = vadd.f32 %v4743_v47, %v4742_v45  ;;  %v7680_v53 = vpop.f32.mrb[7].mxu1  ;;  %v4765_v54 = vadd.f32 %v4764_v48, %v4763_v46  ;;  %v4747_v59 = vsel %vm170_vm2, %v7674_v49, 0.0  ;;  %v4768_v60 = vsel %vm170_vm2, %v7676_v50, 0.0 }
 0x178   : > { %v4745_v55 = vsel %vm170_vm2, %v7678_v51, 0.0  ;;  %v4766_v56 = vsel %vm170_vm2, %v7680_v53, 0.0 }
 0x179   : > { %v4746_v57 = vadd.f32 %v4745_v55, %v4744_v52  ;;  %v4767_v58 = vadd.f32 %v4766_v56, %v4765_v54 }
 0x17b   : > { %v4748_v61 = vadd.f32 %v4747_v59, %v4746_v57  ;;  %v4769_v62 = vadd.f32 %v4768_v60, %v4767_v58 }
 0x17d   : > { %v4749_v63 = vrot.slane %v4748_v61, 4  ;;  %v4770_v2 = vrot.slane %v4769_v62, 4 }
 0x17f   : > { %v4750_v3 = vadd.f32 %v4749_v63, %v4748_v61  ;;  %v4771_v19 = vadd.f32 %v4770_v2, %v4769_v62 }
 0x181   : > { %v4751_v28 = vrot.slane %v4750_v3, 2  ;;  %v4772_v0 = vrot.slane %v4771_v19, 2 }
 0x183   : > { %v4752_v1 = vadd.f32 %v4751_v28, %v4750_v3  ;;  %v4773_v8 = vadd.f32 %v4772_v0, %v4771_v19 }
 0x185   : > { %v4753_v22 = vrot.slane %v4752_v1, 1  ;;  %v4774_v20 = vrot.slane %v4773_v8, 1 }
 0x187   : > { %v4754_v21 = vadd.f32 %v4753_v22, %v4752_v1  ;;  %v4775_v4 = vadd.f32 %v4774_v20, %v4773_v8 }
 0x189   : > { %v7690_v5 = vadd.f32 %v4775_v4, %v4754_v21 }
 0x1fa   : > { %v7701_v7 = vpop.f32.mrb[8].mxu0  ;;  %v7703_v9 = vpop.f32.mrb[8].mxu1 }
 0x1fb   : > { %v4778_v10 = vsel %vm170_vm2, %v7701_v7, 0.0  ;;  %v4800_v11 = vsel %vm170_vm2, %v7703_v9, 0.0  ;;  %v7709_v14 = vpop.f32.mrb[9].mxu0  ;;  %v7711_v15 = vpop.f32.mrb[9].mxu1 }
 0x1fc   : > { %v4777_v18 = vsel %vm170_vm2, %v7709_v14, 0.0  ;;  %v4799_v23 = vsel %vm170_vm2, %v7711_v15, 0.0 }
 0x1fd   : > { %v4779_v24 = vadd.f32 %v4778_v10, %v4777_v18  ;;  %v4801_v25 = vadd.f32 %v4800_v11, %v4799_v23 }
 0x1fe   : > { %v7717_v31 = vpop.f32.mrb[10].mxu0  ;;  %v7719_v32 = vpop.f32.mrb[10].mxu1 }
 0x1ff   : > { %v7721_v33 = vpop.f32.mrb[11].mxu0  ;;  %v7723_v34 = vpop.f32.mrb[11].mxu1  ;;  %v4782_v43 = vsel %vm170_vm2, %v7717_v31, 0.0  ;;  %v4804_v44 = vsel %vm170_vm2, %v7719_v32, 0.0 }
 0x200   : > { %v4780_v35 = vsel %vm170_vm2, %v7721_v33, 0.0  ;;  %v4802_v36 = vsel %vm170_vm2, %v7723_v34, 0.0 }
 0x201   : > { %v4781_v40 = vadd.f32 %v4780_v35, %v4779_v24  ;;  %v4803_v42 = vadd.f32 %v4802_v36, %v4801_v25 }
 0x202   : > { %v7733_v45 = vpop.f32.mrb[12].mxu0  ;;  %v7735_v46 = vpop.f32.mrb[12].mxu1 }
 0x203   : > { %v7737_v47 = vpop.f32.mrb[13].mxu0  ;;  %v4783_v48 = vadd.f32 %v4782_v43, %v4781_v40  ;;  %v7739_v52 = vpop.f32.mrb[13].mxu1  ;;  %v4805_v54 = vadd.f32 %v4804_v44, %v4803_v42  ;;  %v4786_v59 = vsel %vm170_vm2, %v7733_v45, 0.0  ;;  %v4808_v60 = vsel %vm170_vm2, %v7735_v46, 0.0 }
 0x204   : > { %v4784_v55 = vsel %vm170_vm2, %v7737_v47, 0.0  ;;  %v4806_v56 = vsel %vm170_vm2, %v7739_v52, 0.0 }
 0x205   : > { %v4785_v57 = vadd.f32 %v4784_v55, %v4783_v48  ;;  %v4807_v58 = vadd.f32 %v4806_v56, %v4805_v54  ;;  %v4974_v48 = vld [vmem:[%s7697_s15] sm:$0x1] }
 0x206   : > { %v7749_v61 = vpop.f32.mrb[14].mxu0  ;;  %v7751_v62 = vpop.f32.mrb[14].mxu1 }
 0x207   : > { %v7753_v63 = vpop.f32.mrb[15].mxu0  ;;  %v4787_v2 = vadd.f32 %v4786_v59, %v4785_v57  ;;  %v7755_v3 = vpop.f32.mrb[15].mxu1  ;;  %v4809_v19 = vadd.f32 %v4808_v60, %v4807_v58  ;;  %v4790_v22 = vsel %vm170_vm2, %v7749_v61, 0.0  ;;  %v4812_v20 = vsel %vm170_vm2, %v7751_v62, 0.0 }
 0x208   : > { %v4788_v28 = vsel %vm170_vm2, %v7753_v63, 0.0  ;;  %v4810_v0 = vsel %vm170_vm2, %v7755_v3, 0.0 }
 0x209   : > { %v4789_v1 = vadd.f32 %v4788_v28, %v4787_v2  ;;  %v4811_v8 = vadd.f32 %v4810_v0, %v4809_v19 }
 0x20b   : > { %v4791_v21 = vadd.f32 %v4790_v22, %v4789_v1  ;;  %v4813_v4 = vadd.f32 %v4812_v20, %v4811_v8 }
 0x20d   : > { %v4792_v6 = vrot.slane %v4791_v21, 4  ;;  %v4814_v10 = vrot.slane %v4813_v4, 4 }
 0x20f   : > { %v4793_v11 = vadd.f32 %v4792_v6, %v4791_v21  ;;  %v4815_v18 = vadd.f32 %v4814_v10, %v4813_v4 }
 0x211   : > { %v4794_v23 = vrot.slane %v4793_v11, 2  ;;  %v4816_v24 = vrot.slane %v4815_v18, 2 }
 0x213   : > { %v4795_v25 = vadd.f32 %v4794_v23, %v4793_v11  ;;  %v4817_v35 = vadd.f32 %v4816_v24, %v4815_v18 }
 0x215   : > { %v4796_v36 = vrot.slane %v4795_v25, 1  ;;  %v4818_v40 = vrot.slane %v4817_v35, 1 }
 0x217   : > { %v4797_v42 = vadd.f32 %v4796_v36, %v4795_v25  ;;  %v4819_v44 = vadd.f32 %v4818_v40, %v4817_v35 }
 0x219   : > { %v4798_v43 = vadd.f32 %v4797_v42, %v7690_v5 }
 0x21b   : > { %v4820_v54 = vadd.f32 %v4819_v44, %v4798_v43 }
 0x21d   : > { %v7767_v55 = vmul.f32 0.00390625, %v4820_v54  ;;  %v4975_v56 = vadd.f32 %v4974_v48, %v4820_v54 }
 0x21f   : > { %v4822_v57 = vsub.f32 %v7634_v16, %v7767_v55  ;;  %v4823_v58 = vsub.f32 %v7626_v12, %v7767_v55  ;;  %v4824_v59 = vsub.f32 %v7646_v29, %v7767_v55  ;;  %v4825_v60 = vsub.f32 %v7642_v26, %v7767_v55  ;;  %4977 = vst.msk [vmem:[%s7697_s15] sm:$0x1] %vm4976_vm3, %v4975_v56 }
 0x220   : > { %v4826_v5 = vsub.f32 %v7662_v39, %v7767_v55  ;;  %v4827_v2 = vsub.f32 %v7658_v37, %v7767_v55  ;;  %v4828_v16 = vsub.f32 %v7678_v51, %v7767_v55  ;;  %v4829_v12 = vsub.f32 %v7674_v49, %v7767_v55 }
 0x221   : > { %v4830_v19 = vmul.f32 %v4822_v57, %v4822_v57  ;;  %v4831_v28 = vmul.f32 %v4823_v58, %v4823_v58  ;;  %v4832_v29 = vmul.f32 %v4824_v59, %v4824_v59  ;;  %v4833_v0 = vmul.f32 %v4825_v60, %v4825_v60 }
 0x222   : > { %v4834_v1 = vmul.f32 %v4826_v5, %v4826_v5  ;;  %v4835_v22 = vmul.f32 %v4827_v2, %v4827_v2  ;;  %v4836_v39 = vmul.f32 %v4828_v16, %v4828_v16  ;;  %v4860_v51 = vsub.f32 %v7636_v17, %v7767_v55 }
 0x223   : > { %v4838_v26 = vsel %vm170_vm2, %v4830_v19, 0.0  ;;  %v4839_v8 = vsel %vm170_vm2, %v4831_v28, 0.0  ;;  %v4841_v37 = vsel %vm170_vm2, %v4832_v29, 0.0  ;;  %v4843_v21 = vsel %vm170_vm2, %v4833_v0, 0.0 }
 0x224   : > { %v4840_v20 = vadd.f32 %v4839_v8, %v4838_v26  ;;  %v4861_v49 = vsub.f32 %v7628_v13, %v7767_v55  ;;  %v4862_v4 = vsub.f32 %v7648_v30, %v7767_v55  ;;  %v4863_v10 = vsub.f32 %v7644_v27, %v7767_v55 }
 0x225   : > { %v4864_v11 = vsub.f32 %v7664_v41, %v7767_v55  ;;  %v4865_v18 = vsub.f32 %v7660_v38, %v7767_v55  ;;  %v4866_v23 = vsub.f32 %v7680_v53, %v7767_v55  ;;  %v4867_v17 = vsub.f32 %v7676_v50, %v7767_v55 }
 0x226   : > { %v4842_v6 = vadd.f32 %v4841_v37, %v4840_v20  ;;  %v4868_v13 = vmul.f32 %v4860_v51, %v4860_v51  ;;  %v4869_v24 = vmul.f32 %v4861_v49, %v4861_v49  ;;  %v4837_v25 = vmul.f32 %v4829_v12, %v4829_v12 }
 0x227   : > { %v4870_v35 = vmul.f32 %v4862_v4, %v4862_v4  ;;  %v4871_v36 = vmul.f32 %v4863_v10, %v4863_v10  ;;  %v4845_v27 = vsel %vm170_vm2, %v4834_v1, 0.0  ;;  %v4847_v40 = vsel %vm170_vm2, %v4835_v22, 0.0 }
 0x228   : > { %v4844_v30 = vadd.f32 %v4843_v21, %v4842_v6  ;;  %v4849_v41 = vsel %vm170_vm2, %v4836_v39, 0.0  ;;  %v4876_v38 = vsel %vm170_vm2, %v4868_v13, 0.0  ;;  %v4872_v43 = vmul.f32 %v4864_v11, %v4864_v11 }
 0x229   : > { %v4873_v53 = vmul.f32 %v4865_v18, %v4865_v18  ;;  %v4877_v44 = vsel %vm170_vm2, %v4869_v24, 0.0  ;;  %v4874_v50 = vmul.f32 %v4866_v23, %v4866_v23  ;;  %v4875_v48 = vmul.f32 %v4867_v17, %v4867_v17 }
 0x22a   : > { %v4846_v42 = vadd.f32 %v4845_v27, %v4844_v30  ;;  %v4878_v54 = vadd.f32 %v4877_v44, %v4876_v38  ;;  %v4879_v56 = vsel %vm170_vm2, %v4870_v35, 0.0  ;;  %v4881_v58 = vsel %vm170_vm2, %v4871_v36, 0.0 }
 0x22b   : > { %v4898_v59 = vsub.f32 %v7709_v14, %v7767_v55  ;;  %v4899_v60 = vsub.f32 %v7701_v7, %v7767_v55  ;;  %v4900_v2 = vsub.f32 %v7721_v33, %v7767_v55  ;;  %v4901_v16 = vsub.f32 %v7717_v31, %v7767_v55 }
 0x22c   : > { %v4848_v57 = vadd.f32 %v4847_v40, %v4846_v42  ;;  %v4880_v5 = vadd.f32 %v4879_v56, %v4878_v54  ;;  %v4902_v12 = vsub.f32 %v7737_v47, %v7767_v55  ;;  %v4903_v28 = vsub.f32 %v7733_v45, %v7767_v55 }
 0x22d   : > { %v4904_v14 = vsub.f32 %v7753_v63, %v7767_v55  ;;  %v4905_v7 = vsub.f32 %v7749_v61, %v7767_v55  ;;  %v4851_v29 = vsel %vm170_vm2, %v4837_v25, 0.0  ;;  %v4906_v33 = vmul.f32 %v4898_v59, %v4898_v59 }
 0x22e   : > { %v4850_v19 = vadd.f32 %v4849_v41, %v4848_v57  ;;  %v4882_v0 = vadd.f32 %v4881_v58, %v4880_v5  ;;  %v4907_v1 = vmul.f32 %v4899_v60, %v4899_v60  ;;  %v4883_v31 = vsel %vm170_vm2, %v4872_v43, 0.0 }
 0x22f   : > { %v4908_v8 = vmul.f32 %v4900_v2, %v4900_v2  ;;  %v4909_v47 = vmul.f32 %v4901_v16, %v4901_v16  ;;  %v4885_v39 = vsel %vm170_vm2, %v4873_v53, 0.0  ;;  %v4914_v45 = vsel %vm170_vm2, %v4906_v33, 0.0 }
 0x230   : > { %v4852_v26 = vadd.f32 %v4851_v29, %v4850_v19  ;;  %v4884_v22 = vadd.f32 %v4883_v31, %v4882_v0  ;;  %v4887_v63 = vsel %vm170_vm2, %v4874_v50, 0.0  ;;  %v4889_v61 = vsel %vm170_vm2, %v4875_v48, 0.0  ;;  %v4981_v0 = vld [vmem:[%s7697_s15 + $0x2] sm:$0x1] }
 0x231   : > { %v4915_v37 = vsel %vm170_vm2, %v4907_v1, 0.0  ;;  %v4910_v51 = vmul.f32 %v4902_v12, %v4902_v12  ;;  %v4911_v49 = vmul.f32 %v4903_v28, %v4903_v28  ;;  %v4917_v10 = vsel %vm170_vm2, %v4908_v8, 0.0 }
 0x232   : > { %v4853_v20 = vrot.slane %v4852_v26, 4  ;;  %v4886_v21 = vadd.f32 %v4885_v39, %v4884_v22  ;;  %v4916_v4 = vadd.f32 %v4915_v37, %v4914_v45  ;;  %v4919_v11 = vsel %vm170_vm2, %v4909_v47, 0.0 }
 0x233   : > { %v4936_v18 = vsub.f32 %v7711_v15, %v7767_v55  ;;  %v4937_v13 = vsub.f32 %v7703_v9, %v7767_v55  ;;  %v4938_v24 = vsub.f32 %v7723_v34, %v7767_v55  ;;  %v4939_v30 = vsub.f32 %v7719_v32, %v7767_v55 }
 0x234   : > { %v4854_v6 = vadd.f32 %v4853_v20, %v4852_v26  ;;  %v4888_v23 = vadd.f32 %v4887_v63, %v4886_v21  ;;  %v4918_v17 = vadd.f32 %v4917_v10, %v4916_v4  ;;  %v4940_v35 = vsub.f32 %v7739_v52, %v7767_v55 }
 0x235   : > { %v4941_v36 = vsub.f32 %v7735_v46, %v7767_v55  ;;  %v4942_v40 = vsub.f32 %v7755_v3, %v7767_v55  ;;  %v4943_v9 = vsub.f32 %v7751_v62, %v7767_v55  ;;  %v4912_v41 = vmul.f32 %v4904_v14, %v4904_v14 }
 0x236   : > { %v4855_v25 = vrot.slane %v4854_v6, 2  ;;  %v4890_v27 = vadd.f32 %v4889_v61, %v4888_v23  ;;  %v4920_v15 = vadd.f32 %v4919_v11, %v4918_v17  ;;  %v4921_v34 = vsel %vm170_vm2, %v4910_v51, 0.0 }
 0x237   : > { %v4944_v38 = vmul.f32 %v4936_v18, %v4936_v18  ;;  %v4945_v42 = vmul.f32 %v4937_v13, %v4937_v13  ;;  %v4946_v52 = vmul.f32 %v4938_v24, %v4938_v24  ;;  %v4913_v44 = vmul.f32 %v4905_v7, %v4905_v7 }
 0x238   : > { %v4856_v32 = vadd.f32 %v4855_v25, %v4854_v6  ;;  %v4891_v43 = vrot.slane %v4890_v27, 4  ;;  %v4922_v53 = vadd.f32 %v4921_v34, %v4920_v15  ;;  %v4923_v46 = vsel %vm170_vm2, %v4911_v49, 0.0 }
 0x239   : > { %v4947_v50 = vmul.f32 %v4939_v30, %v4939_v30  ;;  %v4952_v3 = vsel %vm170_vm2, %v4944_v38, 0.0  ;;  %v4953_v62 = vsel %vm170_vm2, %v4945_v42, 0.0  ;;  %v4925_v56 = vsel %vm170_vm2, %v4912_v41, 0.0 }
 0x23a   : > { %v4892_v48 = vadd.f32 %v4891_v43, %v4890_v27  ;;  %v4924_v54 = vadd.f32 %v4923_v46, %v4922_v53  ;;  %v4948_v57 = vmul.f32 %v4940_v35, %v4940_v35  ;;  %v4954_v58 = vadd.f32 %v4953_v62, %v4952_v3  ;;  %v4978_v27 = vld [vmem:[%s7697_s15 + $0x1] sm:$0x1] }
 0x23b   : > { %v4857_v59 = vrot.slane %v4856_v32, 1  ;;  %v4955_v2 = vsel %vm170_vm2, %v4946_v52, 0.0  ;;  %v4927_v16 = vsel %vm170_vm2, %v4913_v44, 0.0  ;;  %v4982_v19 = vmul.f32 256.0, %v7767_v55 }
 0x23c   : > { %v4893_v60 = vrot.slane %v4892_v48, 2  ;;  %v4926_v5 = vadd.f32 %v4925_v56, %v4924_v54  ;;  %v4956_v12 = vadd.f32 %v4955_v2, %v4954_v58  ;;  %v4949_v7 = vmul.f32 %v4941_v36, %v4941_v36 }
 0x23d   : > { %v4957_v29 = vsel %vm170_vm2, %v4947_v50, 0.0  ;;  %v4950_v33 = vmul.f32 %v4942_v40, %v4942_v40  ;;  %v4983_v26 = vmul.f32 %v4982_v19, %v7767_v55  ;;  %v4858_v31 = vadd.f32 %v4857_v59, %v4856_v32 }
 0x23e   : > { %v4894_v28 = vadd.f32 %v4893_v60, %v4892_v48  ;;  %v4928_v14 = vadd.f32 %v4927_v16, %v4926_v5  ;;  %v4958_v1 = vadd.f32 %v4957_v29, %v4956_v12  ;;  %v4959_v22 = vsel %vm170_vm2, %v4948_v57, 0.0 }
 0x23f   : > { %v4984_v45 = vadd.f32 %v4983_v26, %v4981_v0  ;;  %v4951_v61 = vmul.f32 %v4943_v9, %v4943_v9  ;;  %v4961_v37 = vsel %vm170_vm2, %v4949_v7, 0.0  ;;  %v4963_v55 = vsel %vm170_vm2, %v4950_v33, 0.0 }
 0x240   : > { %v4895_v8 = vrot.slane %v4894_v28, 1  ;;  %v4929_v47 = vrot.slane %v4928_v14, 4  ;;  %v4960_v39 = vadd.f32 %v4959_v22, %v4958_v1 }
 0x241   : > { %4985 = vst.msk [vmem:[%s7697_s15 + $0x2] sm:$0x1] %vm4976_vm3, %v4984_v45  ;;  %v4965_v10 = vsel %vm170_vm2, %v4951_v61, 0.0 }
 0x242   : > { %v4896_v20 = vadd.f32 %v4895_v8, %v4894_v28  ;;  %v4930_v63 = vadd.f32 %v4929_v47, %v4928_v14  ;;  %v4962_v21 = vadd.f32 %v4961_v37, %v4960_v39 }
 0x244   : > { %v4897_v51 = vadd.f32 %v4896_v20, %v4858_v31  ;;  %v4931_v49 = vrot.slane %v4930_v63, 2  ;;  %v4964_v4 = vadd.f32 %v4963_v55, %v4962_v21 }
 0x246   : > { %v4932_v6 = vadd.f32 %v4931_v49, %v4930_v63  ;;  %v4966_v11 = vadd.f32 %v4965_v10, %v4964_v4 }
 0x248   : > { %v4933_v18 = vrot.slane %v4932_v6, 1  ;;  %v4967_v23 = vrot.slane %v4966_v11, 4 }
 0x24a   : > { %v4934_v17 = vadd.f32 %v4933_v18, %v4932_v6  ;;  %v4968_v13 = vadd.f32 %v4967_v23, %v4966_v11 }
 0x24c   : > { %v4935_v24 = vadd.f32 %v4934_v17, %v4897_v51  ;;  %v4969_v25 = vrot.slane %v4968_v13, 2 }
 0x24e   : > { %v4970_v30 = vadd.f32 %v4969_v25, %v4968_v13 }
 0x250   : > { %v4971_v35 = vrot.slane %v4970_v30, 1 }
 0x252   : > { %v4972_v36 = vadd.f32 %v4971_v35, %v4970_v30 }
 0x254   : > { %v4973_v15 = vadd.f32 %v4972_v36, %v4935_v24 }
 0x256   : > { %v4979_v40 = vadd.f32 %v4978_v27, %v4973_v15 }
 0x258   : > { %4980 = vst.msk [vmem:[%s7697_s15 + $0x1] sm:$0x1] %vm4976_vm3, %v4979_v40 }
 0x259 PF: > { %s12_s11 = sadd.s32 1, %s6625_s11   ;;  %s7918_s9 = smov %s6621_s10 }
 0x25a   : > { %p9_p6 = scmp.ge.s32.totalorder %s12_s11, 4   ;;  %s7919_s10 = smov %s7921_s12 }
 0x25c   :  { %11 = sbr.rel (!%p9_p6) target bundleno = 2 (0x2), region = 69 }

</bundles_post_ra>
